<compile_context>
chip_gen: v7x
topology: tpu7x:2x2x1
jax: 0.10.0
libtpu: 0.0.40
codegen_flags: <defaults>
</compile_context>

<pallas_src>
import functools

import jax
import jax.numpy as jnp
from jax.experimental import pallas as pl
from jax.experimental.pallas import tpu as pltpu

LANE = 128        # TPU lane width: all channel dims are padded to multiples of this.
W_SCALE = 0.05    # random-init scale for the toy weights.


def _round_up(x, m):
    return (x + m - 1) // m * m


@functools.lru_cache(maxsize=None)
def _vmem_capacity_bytes():
    try:
        return int(pltpu.get_tpu_info().vmem_capacity_bytes)
    except Exception:
        return 64 * 1024 * 1024     # conservative (v7x-sized) default


def _tm_cap():
    # v7x has 64 MiB VMEM per TensorCore (vs 128 MiB on v5e/v6e): use smaller row tiles
    # there so the double-buffered input streams never spill.
    return 256 if _vmem_capacity_bytes() <= 64 * 1024 * 1024 else 512


def _pick_tm(m):
    cap = _tm_cap()
    m16 = _round_up(m, 16)          # bf16 sublane packing: keep row tiles % 16
    tm = min(cap, m16)
    return tm, _round_up(m16, tm)   # (tile, padded M)


def _pick_div(d, candidates):
    for c in candidates:
        if d % c == 0:
            return c
    return d


# -----------------------------------------------------------------------------
# Pallas kernels
# -----------------------------------------------------------------------------

def _matmul_bias_kernel(x_ref, w_ref, b_ref, o_ref, acc_ref, *, relu):
    """o = act(x @ w + b), K-tiled with an f32 VMEM accumulator."""
    k = pl.program_id(2)

    @pl.when(k == 0)
    def _init():
        acc_ref[...] = jnp.zeros_like(acc_ref)

    acc_ref[...] += jnp.dot(x_ref[...], w_ref[...],
                            preferred_element_type=jnp.float32)

    @pl.when(k == pl.num_programs(2) - 1)
    def _epilogue():
        out = acc_ref[...] + b_ref[...]
        if relu:
            out = jnp.maximum(out, 0.0)
        o_ref[...] = out.astype(o_ref.dtype)


def _matmul_bias_res_relu_kernel(x_ref, w_ref, b_ref, r_ref, o_ref, acc_ref):
    """o = relu(x @ w + b + residual)."""
    k = pl.program_id(2)

    @pl.when(k == 0)
    def _init():
        acc_ref[...] = jnp.zeros_like(acc_ref)

    acc_ref[...] += jnp.dot(x_ref[...], w_ref[...],
                            preferred_element_type=jnp.float32)

    @pl.when(k == pl.num_programs(2) - 1)
    def _epilogue():
        out = acc_ref[...] + b_ref[...] + r_ref[...].astype(jnp.float32)
        o_ref[...] = jnp.maximum(out, 0.0).astype(o_ref.dtype)


def _mean_pool_kernel(x_ref, o_ref, *, inv_s):
    """Accumulate spatial sums into the lane-dense output block; normalize on last step."""
    s = pl.program_id(0)

    @pl.when(s == 0)
    def _init():
        o_ref[...] = jnp.zeros_like(o_ref)

    o_ref[...] = o_ref[...] + jnp.sum(x_ref[...].astype(jnp.float32), axis=1)

    @pl.when(s == pl.num_programs(0) - 1)
    def _finalize():
        o_ref[...] = o_ref[...] * inv_s


# -----------------------------------------------------------------------------
# Pallas wrappers
# -----------------------------------------------------------------------------

def fused_matmul(x, w, b, residual=None, *, relu=True, out_dtype=jnp.bfloat16):
    """act(x @ w + b [+ residual]) via a tiled Pallas TPU kernel.

    x: (M, K) bf16, w: (K, N) bf16, b: (1, N) f32, residual: (M, N) bf16 or None.
    K and N must be multiples of 128 (lane-dense); M is padded internally.
    """
    M, K = x.shape
    Kw, Np = w.shape
    assert K == Kw and K % LANE == 0 and Np % LANE == 0, (x.shape, w.shape)

    TM, Mp = _pick_tm(M)
    TN = _pick_div(Np, (512, 256, 128))
    TK = _pick_div(K, (512, 256, 128))

    if Mp != M:
        x = jnp.pad(x, ((0, Mp - M), (0, 0)))
        if residual is not None:
            residual = jnp.pad(residual, ((0, Mp - M), (0, 0)))

    in_specs = [
        pl.BlockSpec((TM, TK), lambda i, j, k: (i, k)),
        pl.BlockSpec((TK, TN), lambda i, j, k: (k, j)),
        pl.BlockSpec((1, TN), lambda i, j, k: (0, j)),   # bias: constant along K
    ]
    args = [x, w, b]
    if residual is None:
        kernel = functools.partial(_matmul_bias_kernel, relu=relu)
    else:
        kernel = _matmul_bias_res_relu_kernel
        in_specs.append(pl.BlockSpec((TM, TN), lambda i, j, k: (i, j)))
        args.append(residual)

    n_bytes = sum(int(a.size) * a.dtype.itemsize for a in args) + Mp * Np * 2
    cost = pl.CostEstimate(flops=2 * Mp * K * Np, transcendentals=0,
                           bytes_accessed=int(n_bytes))

    # Double-buffered bf16 in/out tiles + f32 accumulator, with headroom.
    vmem_need = 2 * 2 * (TM * TK + TK * TN + TM * TN) + 2 * 4 * TN + 4 * TM * TN
    if residual is not None:
        vmem_need += 2 * 2 * TM * TN
    vmem_limit = int(min(_vmem_capacity_bytes() // 2,
                         max(32 * 1024 * 1024, 4 * vmem_need)))

    out = pl.pallas_call(
        kernel,
        out_shape=jax.ShapeDtypeStruct((Mp, Np), out_dtype),
        grid_spec=pltpu.PrefetchScalarGridSpec(
            num_scalar_prefetch=0,
            grid=(Mp // TM, Np // TN, K // TK),
            in_specs=in_specs,
            out_specs=pl.BlockSpec((TM, TN), lambda i, j, k: (i, j)),
            scratch_shapes=[pltpu.VMEM((TM, TN), jnp.float32)],
        ),
        compiler_params=pltpu.CompilerParams(
            dimension_semantics=("parallel", "parallel", "arbitrary"),
            vmem_limit_bytes=vmem_limit,
        ),
        cost_estimate=cost,
    )(*args)

    return out if Mp == M else out[:M]


def spatial_mean_pool(x_nhwc):
    """(N, H, W, C) bf16 -> (N, C) f32 mean over H*W, tiled over spatial chunks."""
    N, H, W, C = x_nhwc.shape
    assert C % LANE == 0, x_nhwc.shape
    S = H * W
    x3 = x_nhwc.reshape(N, S, C)
    TS = _pick_div(S, (32, 16))      # falls back to the full S if it is not a multiple
    return pl.pallas_call(
        functools.partial(_mean_pool_kernel, inv_s=1.0 / S),
        out_shape=jax.ShapeDtypeStruct((N, C), jnp.float32),
        grid_spec=pltpu.PrefetchScalarGridSpec(
            num_scalar_prefetch=0,
            grid=(S // TS,),
            in_specs=[pl.BlockSpec((N, TS, C), lambda s: (0, s, 0))],
            out_specs=pl.BlockSpec((N, C), lambda s: (0, 0)),
        ),
        compiler_params=pltpu.CompilerParams(
            dimension_semantics=("arbitrary",)),
    )(x3)


# -----------------------------------------------------------------------------
# Pure-JAX references (same dtype policy, used for a correctness check)
# -----------------------------------------------------------------------------

def _ref_matmul(x, w, b, residual=None, *, relu=True, out_dtype=jnp.bfloat16):
    acc = jnp.dot(x, w, preferred_element_type=jnp.float32) + b
    if residual is not None:
        acc = acc + residual.astype(jnp.float32)
    if relu:
        acc = jnp.maximum(acc, 0.0)
    return acc.astype(out_dtype)


def _ref_pool(x_nhwc):
    N, H, W, C = x_nhwc.shape
    return jnp.mean(x_nhwc.astype(jnp.float32).reshape(N, H * W, C), axis=1)


# -----------------------------------------------------------------------------
# Glue: im2col for the 3x3 conv, parameter init, frozen-BN folding
# -----------------------------------------------------------------------------

def im2col_3x3(x_nhwc, stride):
    """3x3 / pad=1 patches (tap order dy, dx, cin); returns ((N*Ho*Wo, 9*C), (Ho, Wo)).

    # TODO(synk): fold the 9 taps into the matmul kernel (9 accumulating dots over
    # shifted windows) to avoid materializing the 9x-inflated patches in HBM.
    """
    N, H, W, C = x_nhwc.shape
    xp = jnp.pad(x_nhwc, ((0, 0), (1, 1), (1, 1), (0, 0)))
    Ho = (H - 1) // stride + 1
    Wo = (W - 1) // stride + 1
    patches = []
    for dy in range(3):
        for dx in range(3):
            patches.append(
                xp[:, dy:dy + stride * (Ho - 1) + 1:stride,
                      dx:dx + stride * (Wo - 1) + 1:stride, :])
    cols = jnp.concatenate(patches, axis=-1)
    return cols.reshape(N * Ho * Wo, 9 * C), (Ho, Wo)


def init_bn(key, c):
    k1, k2, k3, k4 = jax.random.split(key, 4)
    gamma = 1.0 + 0.1 * jax.random.normal(k1, (c,), jnp.float32)
    beta = 0.1 * jax.random.normal(k2, (c,), jnp.float32)
    mean = 0.1 * jax.random.normal(k3, (c,), jnp.float32)
    var = jax.random.uniform(k4, (c,), jnp.float32, minval=0.5, maxval=1.5)
    return gamma, beta, mean, var


def fold_bn(w_mat_padded, bn, cout_p, eps=1e-5):
    """Fold frozen BN into a (zero-padded) matmul-form conv weight. f32 math, bf16 weight."""
    gamma, beta, mean, var = bn
    scale = gamma / jnp.sqrt(var + eps)
    bias = beta - mean * scale
    cout = scale.shape[0]
    scale_p = jnp.pad(scale, (0, cout_p - cout))
    bias_p = jnp.pad(bias, (0, cout_p - cout))
    w_f = (w_mat_padded * scale_p[None, :]).astype(jnp.bfloat16)
    return w_f, bias_p.reshape(1, -1)            # bias stays float32


def init_conv1x1_mat(key, cin, cout, cin_p, cout_p):
    # PyTorch layout (cout, cin, 1, 1) -> matmul form (cin_p, cout_p), zero-padded.
    w = W_SCALE * jax.random.normal(key, (cout, cin), jnp.float32)
    return jnp.pad(w.T, ((0, cin_p - cin), (0, cout_p - cout)))


def init_conv3x3_mat(key, cin, cout, cin_p, cout_p):
    # PyTorch layout (cout, cin, 3, 3) -> im2col matmul form (9*cin_p, cout_p),
    # tap order (dy, dx, cin) matching im2col_3x3; zero-padded per tap.
    w = W_SCALE * jax.random.normal(key, (cout, cin, 3, 3), jnp.float32)
    w = jnp.transpose(w, (2, 3, 1, 0))                              # (3, 3, cin, cout)
    w = jnp.pad(w, ((0, 0), (0, 0), (0, cin_p - cin), (0, cout_p - cout)))
    return w.reshape(9 * cin_p, cout_p)


def make_bottleneck_params(key, cin, planes, stride, downsample, expansion=4):
    keys = jax.random.split(key, 8)
    cin_p = _round_up(cin, LANE)
    planes_p = _round_up(planes, LANE)
    cout_p = _round_up(planes * expansion, LANE)

    p = {'stride': stride}
    p['conv1'] = fold_bn(init_conv1x1_mat(keys[0], cin, planes, cin_p, planes_p),
                         init_bn(keys[1], planes), planes_p)
    p['conv2'] = fold_bn(init_conv3x3_mat(keys[2], planes, planes, planes_p, planes_p),
                         init_bn(keys[3], planes), planes_p)
    w3, b3 = fold_bn(init_conv1x1_mat(keys[4], planes, planes * expansion, planes_p, cout_p),
                     init_bn(keys[5], planes * expansion), cout_p)
    if downsample:
        wd, bd = fold_bn(init_conv1x1_mat(keys[6], cin, planes * expansion, cin_p, cout_p),
                         init_bn(keys[7], planes * expansion), cout_p)
        # Algebraic fusion of the shortcut 1x1 conv into conv3 (single matmul):
        #   relu(a @ w3 + b3 + xs @ wd + bd) == relu([a | xs] @ [[w3]; [wd]] + (b3 + bd))
        p['conv3_down'] = (jnp.concatenate([w3, wd], axis=0), b3 + bd)
    else:
        p['conv3'] = (w3, b3)
    return p


def make_layer4_params(key, cin, planes, num_blocks=3, stride=2):
    keys = jax.random.split(key, num_blocks)
    params = [make_bottleneck_params(keys[0], cin, planes, stride, downsample=True)]
    for i in range(1, num_blocks):
        params.append(make_bottleneck_params(keys[i], planes * 4, planes, 1,
                                             downsample=False))
    return params


# -----------------------------------------------------------------------------
# Forward pass (Bottleneck x3 + global mean pool), channel-padded NHWC
# -----------------------------------------------------------------------------

def bottleneck_forward(x, p, mm):
    N, H, W, Cp = x.shape
    stride = p['stride']

    # conv1 (1x1) + bn1 + relu
    w1, b1 = p['conv1']
    planes_p = w1.shape[1]
    out = mm(x.reshape(N * H * W, Cp), w1, b1, relu=True)
    out = out.reshape(N, H, W, planes_p)

    # conv2 (3x3, stride) + bn2 + relu
    w2, b2 = p['conv2']
    patches, (Ho, Wo) = im2col_3x3(out, stride)
    out = mm(patches, w2, b2, relu=True)                      # (N*Ho*Wo, planes_p)

    if 'conv3_down' in p:
        # conv3 + bn3 + downsample-shortcut + relu, all in ONE fused matmul kernel.
        wcd, bcd = p['conv3_down']
        # TODO(synk): fold this strided shortcut subsample into the kernel's BlockSpec
        # index_map instead of materializing the sliced tensor in HBM.
        xs = x[:, ::stride, ::stride, :].reshape(N * Ho * Wo, Cp)
        out = mm(jnp.concatenate([out, xs], axis=-1), wcd, bcd, relu=True)
        cout_p = wcd.shape[1]
    else:
        # conv3 + bn3 + identity-residual + relu fused in one kernel.
        w3, b3 = p['conv3']
        identity = x.reshape(N * Ho * Wo, Cp)
        out = mm(out, w3, b3, residual=identity, relu=True)
        cout_p = w3.shape[1]
    return out.reshape(N, Ho, Wo, cout_p)


def pool_to_feature_vector(rois_nchw, params, c_in, c_out, *,
                           mm=fused_matmul, pool=spatial_mean_pool):
    """rois: (N, C, H, W) float32 -> feature vectors (N, c_out) float32."""
    x = jnp.transpose(rois_nchw, (0, 2, 3, 1)).astype(jnp.bfloat16)   # NCHW -> NHWC, bf16
    cin_p = _round_up(c_in, LANE)
    if cin_p != c_in:
        x = jnp.pad(x, ((0, 0), (0, 0), (0, 0), (0, cin_p - c_in)))
    for p in params:
        x = bottleneck_forward(x, p, mm)
    feats = pool(x)                                                   # (N, cout_p) f32
    return feats[:, :c_out]                                           # strip channel padding


# -----------------------------------------------------------------------------
# Main
# -----------------------------------------------------------------------------

if __name__ == "__main__":
    key = jax.random.PRNGKey(0)
    k_in, k_params = jax.random.split(key)

    # Scaled-down ResNet-101 layer4: input channels 256 (stand-in for 1024),
    # planes 128 (stand-in for 512) -> 512 output channels, 3 bottleneck blocks,
    # first block stride 2.  Channel counts are multiples of 128 so every matmul
    # output is lane-dense.
    N, C_IN, H, W = 2, 256, 16, 16
    PLANES = 128
    C_OUT = PLANES * 4

    rois = jax.random.normal(k_in, (N, C_IN, H, W), jnp.float32)
    params = make_layer4_params(k_params, C_IN, PLANES, num_blocks=3, stride=2)

    fwd = jax.jit(functools.partial(pool_to_feature_vector, params=params,
                                    c_in=C_IN, c_out=C_OUT))
    y = jax.block_until_ready(fwd(rois))

    # Pure-JAX reference with the identical folded-BN params and dtype policy.
    y_ref = jax.block_until_ready(
        pool_to_feature_vector(rois, params, C_IN, C_OUT,
                               mm=_ref_matmul, pool=_ref_pool))

    assert y.shape == (N, C_OUT), y.shape
    assert bool(jnp.all(jnp.isfinite(y)))
    assert bool(jnp.allclose(y, y_ref, rtol=3e-2, atol=1e-1)), \
        float(jnp.max(jnp.abs(y - y_ref)))
    print("KERNEL_OK")
</pallas_src>

<mosaic_0001>
module attributes {stable_mosaic.version = 11 : i64} {
  func.func @_matmul_bias_kernel(%arg0: i32, %arg1: i32, %arg2: i32, %arg3: memref<256x256xbf16, #tpu.memory_space<vmem>>, %arg4: memref<256x128xbf16, #tpu.memory_space<vmem>>, %arg5: memref<1x128xf32, #tpu.memory_space<vmem>>, %arg6: memref<256x128xbf16, #tpu.memory_space<vmem>>, %arg7: memref<256x128xf32, #tpu.memory_space<vmem>>) attributes {dimension_semantics = [#tpu.dimension_semantics<parallel>, #tpu.dimension_semantics<parallel>, #tpu.dimension_semantics<arbitrary>], iteration_bounds = array<i64: 2, 1, 1>, scalar_prefetch = 0 : i64, scratch_operands = 1 : i64, tpu.core_type = #tpu.core_type<tc>, window_params = [{transform_indices = @transform_0, window_bounds = array<i64: 256, 256>}, {transform_indices = @transform_1, window_bounds = array<i64: 256, 128>}, {transform_indices = @transform_2, window_bounds = array<i64: 1, 128>}, {transform_indices = @transform_3, window_bounds = array<i64: 256, 128>}]} {
    %c0_i32 = arith.constant 0 : i32
    %0 = arith.cmpi eq, %arg2, %c0_i32 : i32
    %1 = arith.extui %0 : i1 to i32
    %c0_i32_0 = arith.constant 0 : i32
    %2 = arith.cmpi ne, %1, %c0_i32_0 : i32
    scf.if %2 {
      %cst_10 = arith.constant 0.000000e+00 : f32
      %12 = vector.broadcast %cst_10 : f32 to vector<256x128xf32>
      %c0_11 = arith.constant 0 : index
      %c0_12 = arith.constant 0 : index
      %13 = vector.load %arg7[%c0_11, %c0_12] : memref<256x128xf32, #tpu.memory_space<vmem>>, vector<256x128xf32>
      tpu.vector_store %arg7[%c0_11, %c0_12], %12 {strides = array<i32>} : memref<256x128xf32, #tpu.memory_space<vmem>>, vector<256x128xf32>,
    } else {
    }
    %c0 = arith.constant 0 : index
    %c0_1 = arith.constant 0 : index
    %3 = vector.load %arg7[%c0, %c0_1] : memref<256x128xf32, #tpu.memory_space<vmem>>, vector<256x128xf32>
    %c0_2 = arith.constant 0 : index
    %c0_3 = arith.constant 0 : index
    %4 = vector.load %arg3[%c0_2, %c0_3] : memref<256x256xbf16, #tpu.memory_space<vmem>>, vector<256x256xbf16>
    %c0_4 = arith.constant 0 : index
    %c0_5 = arith.constant 0 : index
    %5 = vector.load %arg4[%c0_4, %c0_5] : memref<256x128xbf16, #tpu.memory_space<vmem>>, vector<256x128xbf16>
    %cst = arith.constant dense<0.000000e+00> : vector<256x128xf32>
    %6 = tpu.matmul %4, %5, %cst {dimension_numbers = #tpu.dot_dimension_numbers<[1], [0], [0], [1], [0, 0, 1, 1], [], []>} : vector<256x256xbf16>, vector<256x128xbf16>, vector<256x128xf32> -> vector<256x128xf32>
    %7 = arith.addf %3, %6 : vector<256x128xf32>
    %c0_6 = arith.constant 0 : index
    %c0_7 = arith.constant 0 : index
    %8 = vector.load %arg7[%c0_6, %c0_7] : memref<256x128xf32, #tpu.memory_space<vmem>>, vector<256x128xf32>
    tpu.vector_store %arg7[%c0_6, %c0_7], %7 {strides = array<i32>} : memref<256x128xf32, #tpu.memory_space<vmem>>, vector<256x128xf32>,
    %c0_i32_8 = arith.constant 0 : i32
    %9 = arith.cmpi eq, %arg2, %c0_i32_8 : i32
    %10 = arith.extui %9 : i1 to i32
    %c0_i32_9 = arith.constant 0 : i32
    %11 = arith.cmpi ne, %10, %c0_i32_9 : i32
    scf.if %11 {
      %c0_10 = arith.constant 0 : index
      %c0_11 = arith.constant 0 : index
      %12 = vector.load %arg7[%c0_10, %c0_11] : memref<256x128xf32, #tpu.memory_space<vmem>>, vector<256x128xf32>
      %c0_12 = arith.constant 0 : index
      %c0_13 = arith.constant 0 : index
      %13 = vector.load %arg5[%c0_12, %c0_13] : memref<1x128xf32, #tpu.memory_space<vmem>>, vector<1x128xf32>
      %14 = vector.broadcast %13 : vector<1x128xf32> to vector<256x128xf32>
      %15 = arith.addf %12, %14 : vector<256x128xf32>
      %cst_14 = arith.constant 0.000000e+00 : f32
      %16 = vector.broadcast %cst_14 : f32 to vector<256x128xf32>
      %17 = arith.maximumf %15, %16 : vector<256x128xf32>
      %18 = arith.truncf %17 : vector<256x128xf32> to vector<256x128xbf16>
      %c0_15 = arith.constant 0 : index
      %c0_16 = arith.constant 0 : index
      %19 = vector.load %arg6[%c0_15, %c0_16] : memref<256x128xbf16, #tpu.memory_space<vmem>>, vector<256x128xbf16>
      tpu.vector_store %arg6[%c0_15, %c0_16], %18 {strides = array<i32>} : memref<256x128xbf16, #tpu.memory_space<vmem>>, vector<256x128xbf16>,
    } else {
    }
    return
  }
  func.func @transform_0(%arg0: i32, %arg1: i32, %arg2: i32) -> (i32, i32) {
    %c0_i32 = arith.constant 0 : i32
    return %arg0, %arg2 : i32, i32
  }
  func.func @transform_1(%arg0: i32, %arg1: i32, %arg2: i32) -> (i32, i32) {
    %c0_i32 = arith.constant 0 : i32
    return %arg2, %arg1 : i32, i32
  }
  func.func @transform_2(%arg0: i32, %arg1: i32, %arg2: i32) -> (i32, i32) {
    %c0_i32 = arith.constant 0 : i32
    %c0_i32_0 = arith.constant 0 : i32
    return %c0_i32, %arg1 : i32, i32
  }
  func.func @transform_3(%arg0: i32, %arg1: i32, %arg2: i32) -> (i32, i32) {
    %c0_i32 = arith.constant 0 : i32
    return %arg0, %arg1 : i32, i32
  }
}

module attributes {stable_mosaic.version = 11 : i64} {
  func.func @_matmul_bias_kernel(%arg0: i32, %arg1: i32, %arg2: i32, %arg3: memref<128x512xbf16, #tpu.memory_space<vmem>>, %arg4: memref<512x128xbf16, #tpu.memory_space<vmem>>, %arg5: memref<1x128xf32, #tpu.memory_space<vmem>>, %arg6: memref<128x128xbf16, #tpu.memory_space<vmem>>, %arg7: memref<128x128xf32, #tpu.memory_space<vmem>>) attributes {dimension_semantics = [#tpu.dimension_semantics<parallel>, #tpu.dimension_semantics<parallel>, #tpu.dimension_semantics<arbitrary>], iteration_bounds = array<i64: 1, 1, 1>, scalar_prefetch = 0 : i64, scratch_operands = 1 : i64, tpu.core_type = #tpu.core_type<tc>, window_params = [{transform_indices = @transform_0, window_bounds = array<i64: 128, 512>}, {transform_indices = @transform_1, window_bounds = array<i64: 512, 128>}, {transform_indices = @transform_2, window_bounds = array<i64: 1, 128>}, {transform_indices = @transform_3, window_bounds = array<i64: 128, 128>}]} {
    %c0_i32 = arith.constant 0 : i32
    %0 = arith.cmpi eq, %arg2, %c0_i32 : i32
    %1 = arith.extui %0 : i1 to i32
    %c0_i32_0 = arith.constant 0 : i32
    %2 = arith.cmpi ne, %1, %c0_i32_0 : i32
    scf.if %2 {
      %cst_10 = arith.constant 0.000000e+00 : f32
      %12 = vector.broadcast %cst_10 : f32 to vector<128x128xf32>
      %c0_11 = arith.constant 0 : index
      %c0_12 = arith.constant 0 : index
      %13 = vector.load %arg7[%c0_11, %c0_12] : memref<128x128xf32, #tpu.memory_space<vmem>>, vector<128x128xf32>
      tpu.vector_store %arg7[%c0_11, %c0_12], %12 {strides = array<i32>} : memref<128x128xf32, #tpu.memory_space<vmem>>, vector<128x128xf32>,
    } else {
    }
    %c0 = arith.constant 0 : index
    %c0_1 = arith.constant 0 : index
    %3 = vector.load %arg7[%c0, %c0_1] : memref<128x128xf32, #tpu.memory_space<vmem>>, vector<128x128xf32>
    %c0_2 = arith.constant 0 : index
    %c0_3 = arith.constant 0 : index
    %4 = vector.load %arg3[%c0_2, %c0_3] : memref<128x512xbf16, #tpu.memory_space<vmem>>, vector<128x512xbf16>
    %c0_4 = arith.constant 0 : index
    %c0_5 = arith.constant 0 : index
    %5 = vector.load %arg4[%c0_4, %c0_5] : memref<512x128xbf16, #tpu.memory_space<vmem>>, vector<512x128xbf16>
    %cst = arith.constant dense<0.000000e+00> : vector<128x128xf32>
    %6 = tpu.matmul %4, %5, %cst {dimension_numbers = #tpu.dot_dimension_numbers<[1], [0], [0], [1], [0, 0, 1, 1], [], []>} : vector<128x512xbf16>, vector<512x128xbf16>, vector<128x128xf32> -> vector<128x128xf32>
    %7 = arith.addf %3, %6 : vector<128x128xf32>
    %c0_6 = arith.constant 0 : index
    %c0_7 = arith.constant 0 : index
    %8 = vector.load %arg7[%c0_6, %c0_7] : memref<128x128xf32, #tpu.memory_space<vmem>>, vector<128x128xf32>
    tpu.vector_store %arg7[%c0_6, %c0_7], %7 {strides = array<i32>} : memref<128x128xf32, #tpu.memory_space<vmem>>, vector<128x128xf32>,
    %c0_i32_8 = arith.constant 0 : i32
    %9 = arith.cmpi eq, %arg2, %c0_i32_8 : i32
    %10 = arith.extui %9 : i1 to i32
    %c0_i32_9 = arith.constant 0 : i32
    %11 = arith.cmpi ne, %10, %c0_i32_9 : i32
    scf.if %11 {
      %c0_10 = arith.constant 0 : index
      %c0_11 = arith.constant 0 : index
      %12 = vector.load %arg7[%c0_10, %c0_11] : memref<128x128xf32, #tpu.memory_space<vmem>>, vector<128x128xf32>
      %c0_12 = arith.constant 0 : index
      %c0_13 = arith.constant 0 : index
      %13 = vector.load %arg5[%c0_12, %c0_13] : memref<1x128xf32, #tpu.memory_space<vmem>>, vector<1x128xf32>
      %14 = vector.broadcast %13 : vector<1x128xf32> to vector<128x128xf32>
      %15 = arith.addf %12, %14 : vector<128x128xf32>
      %cst_14 = arith.constant 0.000000e+00 : f32
      %16 = vector.broadcast %cst_14 : f32 to vector<128x128xf32>
      %17 = arith.maximumf %15, %16 : vector<128x128xf32>
      %18 = arith.truncf %17 : vector<128x128xf32> to vector<128x128xbf16>
      %c0_15 = arith.constant 0 : index
      %c0_16 = arith.constant 0 : index
      %19 = vector.load %arg6[%c0_15, %c0_16] : memref<128x128xbf16, #tpu.memory_space<vmem>>, vector<128x128xbf16>
      tpu.vector_store %arg6[%c0_15, %c0_16], %18 {strides = array<i32>} : memref<128x128xbf16, #tpu.memory_space<vmem>>, vector<128x128xbf16>,
    } else {
    }
    return
  }
  func.func @transform_0(%arg0: i32, %arg1: i32, %arg2: i32) -> (i32, i32) {
    %c0_i32 = arith.constant 0 : i32
    return %arg0, %arg2 : i32, i32
  }
  func.func @transform_1(%arg0: i32, %arg1: i32, %arg2: i32) -> (i32, i32) {
    %c0_i32 = arith.constant 0 : i32
    return %arg2, %arg1 : i32, i32
  }
  func.func @transform_2(%arg0: i32, %arg1: i32, %arg2: i32) -> (i32, i32) {
    %c0_i32 = arith.constant 0 : i32
    %c0_i32_0 = arith.constant 0 : i32
    return %c0_i32, %arg1 : i32, i32
  }
  func.func @transform_3(%arg0: i32, %arg1: i32, %arg2: i32) -> (i32, i32) {
    %c0_i32 = arith.constant 0 : i32
    return %arg0, %arg1 : i32, i32
  }
}

module attributes {stable_mosaic.version = 11 : i64} {
  func.func @_matmul_bias_kernel(%arg0: i32, %arg1: i32, %arg2: i32, %arg3: memref<128x128xbf16, #tpu.memory_space<vmem>>, %arg4: memref<128x128xbf16, #tpu.memory_space<vmem>>, %arg5: memref<1x128xf32, #tpu.memory_space<vmem>>, %arg6: memref<128x128xbf16, #tpu.memory_space<vmem>>, %arg7: memref<128x128xf32, #tpu.memory_space<vmem>>) attributes {dimension_semantics = [#tpu.dimension_semantics<parallel>, #tpu.dimension_semantics<parallel>, #tpu.dimension_semantics<arbitrary>], iteration_bounds = array<i64: 1, 1, 9>, scalar_prefetch = 0 : i64, scratch_operands = 1 : i64, tpu.core_type = #tpu.core_type<tc>, window_params = [{transform_indices = @transform_0, window_bounds = array<i64: 128, 128>}, {transform_indices = @transform_1, window_bounds = array<i64: 128, 128>}, {transform_indices = @transform_2, window_bounds = array<i64: 1, 128>}, {transform_indices = @transform_3, window_bounds = array<i64: 128, 128>}]} {
    %c0_i32 = arith.constant 0 : i32
    %0 = arith.cmpi eq, %arg2, %c0_i32 : i32
    %1 = arith.extui %0 : i1 to i32
    %c0_i32_0 = arith.constant 0 : i32
    %2 = arith.cmpi ne, %1, %c0_i32_0 : i32
    scf.if %2 {
      %cst_9 = arith.constant 0.000000e+00 : f32
      %12 = vector.broadcast %cst_9 : f32 to vector<128x128xf32>
      %c0_10 = arith.constant 0 : index
      %c0_11 = arith.constant 0 : index
      %13 = vector.load %arg7[%c0_10, %c0_11] : memref<128x128xf32, #tpu.memory_space<vmem>>, vector<128x128xf32>
      tpu.vector_store %arg7[%c0_10, %c0_11], %12 {strides = array<i32>} : memref<128x128xf32, #tpu.memory_space<vmem>>, vector<128x128xf32>,
    } else {
    }
    %c0 = arith.constant 0 : index
    %c0_1 = arith.constant 0 : index
    %3 = vector.load %arg7[%c0, %c0_1] : memref<128x128xf32, #tpu.memory_space<vmem>>, vector<128x128xf32>
    %c0_2 = arith.constant 0 : index
    %c0_3 = arith.constant 0 : index
    %4 = vector.load %arg3[%c0_2, %c0_3] : memref<128x128xbf16, #tpu.memory_space<vmem>>, vector<128x128xbf16>
    %c0_4 = arith.constant 0 : index
    %c0_5 = arith.constant 0 : index
    %5 = vector.load %arg4[%c0_4, %c0_5] : memref<128x128xbf16, #tpu.memory_space<vmem>>, vector<128x128xbf16>
    %cst = arith.constant dense<0.000000e+00> : vector<128x128xf32>
    %6 = tpu.matmul %4, %5, %cst {dimension_numbers = #tpu.dot_dimension_numbers<[1], [0], [0], [1], [0, 0, 1, 1], [], []>} : vector<128x128xbf16>, vector<128x128xbf16>, vector<128x128xf32> -> vector<128x128xf32>
    %7 = arith.addf %3, %6 : vector<128x128xf32>
    %c0_6 = arith.constant 0 : index
    %c0_7 = arith.constant 0 : index
    %8 = vector.load %arg7[%c0_6, %c0_7] : memref<128x128xf32, #tpu.memory_space<vmem>>, vector<128x128xf32>
    tpu.vector_store %arg7[%c0_6, %c0_7], %7 {strides = array<i32>} : memref<128x128xf32, #tpu.memory_space<vmem>>, vector<128x128xf32>,
    %c8_i32 = arith.constant 8 : i32
    %9 = arith.cmpi eq, %arg2, %c8_i32 : i32
    %10 = arith.extui %9 : i1 to i32
    %c0_i32_8 = arith.constant 0 : i32
    %11 = arith.cmpi ne, %10, %c0_i32_8 : i32
    scf.if %11 {
      %c0_9 = arith.constant 0 : index
      %c0_10 = arith.constant 0 : index
      %12 = vector.load %arg7[%c0_9, %c0_10] : memref<128x128xf32, #tpu.memory_space<vmem>>, vector<128x128xf32>
      %c0_11 = arith.constant 0 : index
      %c0_12 = arith.constant 0 : index
      %13 = vector.load %arg5[%c0_11, %c0_12] : memref<1x128xf32, #tpu.memory_space<vmem>>, vector<1x128xf32>
      %14 = vector.broadcast %13 : vector<1x128xf32> to vector<128x128xf32>
      %15 = arith.addf %12, %14 : vector<128x128xf32>
      %cst_13 = arith.constant 0.000000e+00 : f32
      %16 = vector.broadcast %cst_13 : f32 to vector<128x128xf32>
      %17 = arith.maximumf %15, %16 : vector<128x128xf32>
      %18 = arith.truncf %17 : vector<128x128xf32> to vector<128x128xbf16>
      %c0_14 = arith.constant 0 : index
      %c0_15 = arith.constant 0 : index
      %19 = vector.load %arg6[%c0_14, %c0_15] : memref<128x128xbf16, #tpu.memory_space<vmem>>, vector<128x128xbf16>
      tpu.vector_store %arg6[%c0_14, %c0_15], %18 {strides = array<i32>} : memref<128x128xbf16, #tpu.memory_space<vmem>>, vector<128x128xbf16>,
    } else {
    }
    return
  }
  func.func @transform_0(%arg0: i32, %arg1: i32, %arg2: i32) -> (i32, i32) {
    %c0_i32 = arith.constant 0 : i32
    return %arg0, %arg2 : i32, i32
  }
  func.func @transform_1(%arg0: i32, %arg1: i32, %arg2: i32) -> (i32, i32) {
    %c0_i32 = arith.constant 0 : i32
    return %arg2, %arg1 : i32, i32
  }
  func.func @transform_2(%arg0: i32, %arg1: i32, %arg2: i32) -> (i32, i32) {
    %c0_i32 = arith.constant 0 : i32
    %c0_i32_0 = arith.constant 0 : i32
    return %c0_i32, %arg1 : i32, i32
  }
  func.func @transform_3(%arg0: i32, %arg1: i32, %arg2: i32) -> (i32, i32) {
    %c0_i32 = arith.constant 0 : i32
    return %arg0, %arg1 : i32, i32
  }
}

module attributes {stable_mosaic.version = 11 : i64} {
  func.func @_matmul_bias_kernel(%arg0: i32, %arg1: i32, %arg2: i32, %arg3: memref<128x128xbf16, #tpu.memory_space<vmem>>, %arg4: memref<128x512xbf16, #tpu.memory_space<vmem>>, %arg5: memref<1x512xf32, #tpu.memory_space<vmem>>, %arg6: memref<128x512xbf16, #tpu.memory_space<vmem>>, %arg7: memref<128x512xf32, #tpu.memory_space<vmem>>) attributes {dimension_semantics = [#tpu.dimension_semantics<parallel>, #tpu.dimension_semantics<parallel>, #tpu.dimension_semantics<arbitrary>], iteration_bounds = array<i64: 1, 1, 3>, scalar_prefetch = 0 : i64, scratch_operands = 1 : i64, tpu.core_type = #tpu.core_type<tc>, window_params = [{transform_indices = @transform_0, window_bounds = array<i64: 128, 128>}, {transform_indices = @transform_1, window_bounds = array<i64: 128, 512>}, {transform_indices = @transform_2, window_bounds = array<i64: 1, 512>}, {transform_indices = @transform_3, window_bounds = array<i64: 128, 512>}]} {
    %c0_i32 = arith.constant 0 : i32
    %0 = arith.cmpi eq, %arg2, %c0_i32 : i32
    %1 = arith.extui %0 : i1 to i32
    %c0_i32_0 = arith.constant 0 : i32
    %2 = arith.cmpi ne, %1, %c0_i32_0 : i32
    scf.if %2 {
      %cst_9 = arith.constant 0.000000e+00 : f32
      %12 = vector.broadcast %cst_9 : f32 to vector<128x512xf32>
      %c0_10 = arith.constant 0 : index
      %c0_11 = arith.constant 0 : index
      %13 = vector.load %arg7[%c0_10, %c0_11] : memref<128x512xf32, #tpu.memory_space<vmem>>, vector<128x512xf32>
      tpu.vector_store %arg7[%c0_10, %c0_11], %12 {strides = array<i32>} : memref<128x512xf32, #tpu.memory_space<vmem>>, vector<128x512xf32>,
    } else {
    }
    %c0 = arith.constant 0 : index
    %c0_1 = arith.constant 0 : index
    %3 = vector.load %arg7[%c0, %c0_1] : memref<128x512xf32, #tpu.memory_space<vmem>>, vector<128x512xf32>
    %c0_2 = arith.constant 0 : index
    %c0_3 = arith.constant 0 : index
    %4 = vector.load %arg3[%c0_2, %c0_3] : memref<128x128xbf16, #tpu.memory_space<vmem>>, vector<128x128xbf16>
    %c0_4 = arith.constant 0 : index
    %c0_5 = arith.constant 0 : index
    %5 = vector.load %arg4[%c0_4, %c0_5] : memref<128x512xbf16, #tpu.memory_space<vmem>>, vector<128x512xbf16>
    %cst = arith.constant dense<0.000000e+00> : vector<128x512xf32>
    %6 = tpu.matmul %4, %5, %cst {dimension_numbers = #tpu.dot_dimension_numbers<[1], [0], [0], [1], [0, 0, 1, 1], [], []>} : vector<128x128xbf16>, vector<128x512xbf16>, vector<128x512xf32> -> vector<128x512xf32>
    %7 = arith.addf %3, %6 : vector<128x512xf32>
    %c0_6 = arith.constant 0 : index
    %c0_7 = arith.constant 0 : index
    %8 = vector.load %arg7[%c0_6, %c0_7] : memref<128x512xf32, #tpu.memory_space<vmem>>, vector<128x512xf32>
    tpu.vector_store %arg7[%c0_6, %c0_7], %7 {strides = array<i32>} : memref<128x512xf32, #tpu.memory_space<vmem>>, vector<128x512xf32>,
    %c2_i32 = arith.constant 2 : i32
    %9 = arith.cmpi eq, %arg2, %c2_i32 : i32
    %10 = arith.extui %9 : i1 to i32
    %c0_i32_8 = arith.constant 0 : i32
    %11 = arith.cmpi ne, %10, %c0_i32_8 : i32
    scf.if %11 {
      %c0_9 = arith.constant 0 : index
      %c0_10 = arith.constant 0 : index
      %12 = vector.load %arg7[%c0_9, %c0_10] : memref<128x512xf32, #tpu.memory_space<vmem>>, vector<128x512xf32>
      %c0_11 = arith.constant 0 : index
      %c0_12 = arith.constant 0 : index
      %13 = vector.load %arg5[%c0_11, %c0_12] : memref<1x512xf32, #tpu.memory_space<vmem>>, vector<1x512xf32>
      %14 = vector.broadcast %13 : vector<1x512xf32> to vector<128x512xf32>
      %15 = arith.addf %12, %14 : vector<128x512xf32>
      %cst_13 = arith.constant 0.000000e+00 : f32
      %16 = vector.broadcast %cst_13 : f32 to vector<128x512xf32>
      %17 = arith.maximumf %15, %16 : vector<128x512xf32>
      %18 = arith.truncf %17 : vector<128x512xf32> to vector<128x512xbf16>
      %c0_14 = arith.constant 0 : index
      %c0_15 = arith.constant 0 : index
      %19 = vector.load %arg6[%c0_14, %c0_15] : memref<128x512xbf16, #tpu.memory_space<vmem>>, vector<128x512xbf16>
      tpu.vector_store %arg6[%c0_14, %c0_15], %18 {strides = array<i32>} : memref<128x512xbf16, #tpu.memory_space<vmem>>, vector<128x512xbf16>,
    } else {
    }
    return
  }
  func.func @transform_0(%arg0: i32, %arg1: i32, %arg2: i32) -> (i32, i32) {
    %c0_i32 = arith.constant 0 : i32
    return %arg0, %arg2 : i32, i32
  }
  func.func @transform_1(%arg0: i32, %arg1: i32, %arg2: i32) -> (i32, i32) {
    %c0_i32 = arith.constant 0 : i32
    return %arg2, %arg1 : i32, i32
  }
  func.func @transform_2(%arg0: i32, %arg1: i32, %arg2: i32) -> (i32, i32) {
    %c0_i32 = arith.constant 0 : i32
    %c0_i32_0 = arith.constant 0 : i32
    return %c0_i32, %arg1 : i32, i32
  }
  func.func @transform_3(%arg0: i32, %arg1: i32, %arg2: i32) -> (i32, i32) {
    %c0_i32 = arith.constant 0 : i32
    return %arg0, %arg1 : i32, i32
  }
}

module attributes {stable_mosaic.version = 11 : i64} {
  func.func @_matmul_bias_res_relu_kernel(%arg0: i32, %arg1: i32, %arg2: i32, %arg3: memref<128x128xbf16, #tpu.memory_space<vmem>>, %arg4: memref<128x512xbf16, #tpu.memory_space<vmem>>, %arg5: memref<1x512xf32, #tpu.memory_space<vmem>>, %arg6: memref<128x512xbf16, #tpu.memory_space<vmem>>, %arg7: memref<128x512xbf16, #tpu.memory_space<vmem>>, %arg8: memref<128x512xf32, #tpu.memory_space<vmem>>) attributes {dimension_semantics = [#tpu.dimension_semantics<parallel>, #tpu.dimension_semantics<parallel>, #tpu.dimension_semantics<arbitrary>], iteration_bounds = array<i64: 1, 1, 1>, scalar_prefetch = 0 : i64, scratch_operands = 1 : i64, tpu.core_type = #tpu.core_type<tc>, window_params = [{transform_indices = @transform_0, window_bounds = array<i64: 128, 128>}, {transform_indices = @transform_1, window_bounds = array<i64: 128, 512>}, {transform_indices = @transform_2, window_bounds = array<i64: 1, 512>}, {transform_indices = @transform_3, window_bounds = array<i64: 128, 512>}, {transform_indices = @transform_4, window_bounds = array<i64: 128, 512>}]} {
    %c0_i32 = arith.constant 0 : i32
    %0 = arith.cmpi eq, %arg2, %c0_i32 : i32
    %1 = arith.extui %0 : i1 to i32
    %c0_i32_0 = arith.constant 0 : i32
    %2 = arith.cmpi ne, %1, %c0_i32_0 : i32
    scf.if %2 {
      %cst_10 = arith.constant 0.000000e+00 : f32
      %12 = vector.broadcast %cst_10 : f32 to vector<128x512xf32>
      %c0_11 = arith.constant 0 : index
      %c0_12 = arith.constant 0 : index
      %13 = vector.load %arg8[%c0_11, %c0_12] : memref<128x512xf32, #tpu.memory_space<vmem>>, vector<128x512xf32>
      tpu.vector_store %arg8[%c0_11, %c0_12], %12 {strides = array<i32>} : memref<128x512xf32, #tpu.memory_space<vmem>>, vector<128x512xf32>,
    } else {
    }
    %c0 = arith.constant 0 : index
    %c0_1 = arith.constant 0 : index
    %3 = vector.load %arg8[%c0, %c0_1] : memref<128x512xf32, #tpu.memory_space<vmem>>, vector<128x512xf32>
    %c0_2 = arith.constant 0 : index
    %c0_3 = arith.constant 0 : index
    %4 = vector.load %arg3[%c0_2, %c0_3] : memref<128x128xbf16, #tpu.memory_space<vmem>>, vector<128x128xbf16>
    %c0_4 = arith.constant 0 : index
    %c0_5 = arith.constant 0 : index
    %5 = vector.load %arg4[%c0_4, %c0_5] : memref<128x512xbf16, #tpu.memory_space<vmem>>, vector<128x512xbf16>
    %cst = arith.constant dense<0.000000e+00> : vector<128x512xf32>
    %6 = tpu.matmul %4, %5, %cst {dimension_numbers = #tpu.dot_dimension_numbers<[1], [0], [0], [1], [0, 0, 1, 1], [], []>} : vector<128x128xbf16>, vector<128x512xbf16>, vector<128x512xf32> -> vector<128x512xf32>
    %7 = arith.addf %3, %6 : vector<128x512xf32>
    %c0_6 = arith.constant 0 : index
    %c0_7 = arith.constant 0 : index
    %8 = vector.load %arg8[%c0_6, %c0_7] : memref<128x512xf32, #tpu.memory_space<vmem>>, vector<128x512xf32>
    tpu.vector_store %arg8[%c0_6, %c0_7], %7 {strides = array<i32>} : memref<128x512xf32, #tpu.memory_space<vmem>>, vector<128x512xf32>,
    %c0_i32_8 = arith.constant 0 : i32
    %9 = arith.cmpi eq, %arg2, %c0_i32_8 : i32
    %10 = arith.extui %9 : i1 to i32
    %c0_i32_9 = arith.constant 0 : i32
    %11 = arith.cmpi ne, %10, %c0_i32_9 : i32
    scf.if %11 {
      %c0_10 = arith.constant 0 : index
      %c0_11 = arith.constant 0 : index
      %12 = vector.load %arg8[%c0_10, %c0_11] : memref<128x512xf32, #tpu.memory_space<vmem>>, vector<128x512xf32>
      %c0_12 = arith.constant 0 : index
      %c0_13 = arith.constant 0 : index
      %13 = vector.load %arg5[%c0_12, %c0_13] : memref<1x512xf32, #tpu.memory_space<vmem>>, vector<1x512xf32>
      %14 = vector.broadcast %13 : vector<1x512xf32> to vector<128x512xf32>
      %15 = arith.addf %12, %14 : vector<128x512xf32>
      %c0_14 = arith.constant 0 : index
      %c0_15 = arith.constant 0 : index
      %16 = vector.load %arg6[%c0_14, %c0_15] : memref<128x512xbf16, #tpu.memory_space<vmem>>, vector<128x512xbf16>
      %17 = arith.extf %16 : vector<128x512xbf16> to vector<128x512xf32>
      %18 = arith.addf %15, %17 : vector<128x512xf32>
      %cst_16 = arith.constant 0.000000e+00 : f32
      %19 = vector.broadcast %cst_16 : f32 to vector<128x512xf32>
      %20 = arith.maximumf %18, %19 : vector<128x512xf32>
      %21 = arith.truncf %20 : vector<128x512xf32> to vector<128x512xbf16>
      %c0_17 = arith.constant 0 : index
      %c0_18 = arith.constant 0 : index
      %22 = vector.load %arg7[%c0_17, %c0_18] : memref<128x512xbf16, #tpu.memory_space<vmem>>, vector<128x512xbf16>
      tpu.vector_store %arg7[%c0_17, %c0_18], %21 {strides = array<i32>} : memref<128x512xbf16, #tpu.memory_space<vmem>>, vector<128x512xbf16>,
    } else {
    }
    return
  }
  func.func @transform_0(%arg0: i32, %arg1: i32, %arg2: i32) -> (i32, i32) {
    %c0_i32 = arith.constant 0 : i32
    return %arg0, %arg2 : i32, i32
  }
  func.func @transform_1(%arg0: i32, %arg1: i32, %arg2: i32) -> (i32, i32) {
    %c0_i32 = arith.constant 0 : i32
    return %arg2, %arg1 : i32, i32
  }
  func.func @transform_2(%arg0: i32, %arg1: i32, %arg2: i32) -> (i32, i32) {
    %c0_i32 = arith.constant 0 : i32
    %c0_i32_0 = arith.constant 0 : i32
    return %c0_i32, %arg1 : i32, i32
  }
  func.func @transform_3(%arg0: i32, %arg1: i32, %arg2: i32) -> (i32, i32) {
    %c0_i32 = arith.constant 0 : i32
    return %arg0, %arg1 : i32, i32
  }
  func.func @transform_4(%arg0: i32, %arg1: i32, %arg2: i32) -> (i32, i32) {
    %c0_i32 = arith.constant 0 : i32
    return %arg0, %arg1 : i32, i32
  }
}

module attributes {stable_mosaic.version = 11 : i64} {
  func.func @_mean_pool_kernel(%arg0: i32, %arg1: memref<2x32x512xbf16, #tpu.memory_space<vmem>>, %arg2: memref<2x512xf32, #tpu.memory_space<vmem>>) attributes {dimension_semantics = [#tpu.dimension_semantics<arbitrary>], iteration_bounds = array<i64: 2>, scalar_prefetch = 0 : i64, scratch_operands = 0 : i64, tpu.core_type = #tpu.core_type<tc>, window_params = [{transform_indices = @transform_0, window_bounds = array<i64: 2, 32, 512>}, {pipeline_mode = #tpu.pipeline_mode<synchronous>, transform_indices = @transform_1, window_bounds = array<i64: 2, 512>}]} {
    %c0_i32 = arith.constant 0 : i32
    %0 = arith.cmpi eq, %arg0, %c0_i32 : i32
    %1 = arith.extui %0 : i1 to i32
    %c0_i32_0 = arith.constant 0 : i32
    %2 = arith.cmpi ne, %1, %c0_i32_0 : i32
    scf.if %2 {
      %cst_8 = arith.constant 0.000000e+00 : f32
      %12 = vector.broadcast %cst_8 : f32 to vector<2x512xf32>
      %c0_9 = arith.constant 0 : index
      %c0_10 = arith.constant 0 : index
      %13 = vector.load %arg2[%c0_9, %c0_10] : memref<2x512xf32, #tpu.memory_space<vmem>>, vector<2x512xf32>
      tpu.vector_store %arg2[%c0_9, %c0_10], %12 {strides = array<i32>} : memref<2x512xf32, #tpu.memory_space<vmem>>, vector<2x512xf32>,
    } else {
    }
    %c0 = arith.constant 0 : index
    %c0_1 = arith.constant 0 : index
    %3 = vector.load %arg2[%c0, %c0_1] : memref<2x512xf32, #tpu.memory_space<vmem>>, vector<2x512xf32>
    %c0_2 = arith.constant 0 : index
    %c0_3 = arith.constant 0 : index
    %c0_4 = arith.constant 0 : index
    %4 = vector.load %arg1[%c0_2, %c0_3, %c0_4] : memref<2x32x512xbf16, #tpu.memory_space<vmem>>, vector<2x32x512xbf16>
    %5 = arith.extf %4 : vector<2x32x512xbf16> to vector<2x32x512xf32>
    %cst = arith.constant dense<0.000000e+00> : vector<2x512xf32>
    %6 = vector.multi_reduction <add>, %5, %cst [1] : vector<2x32x512xf32> to vector<2x512xf32>
    %7 = arith.addf %3, %6 : vector<2x512xf32>
    %c0_5 = arith.constant 0 : index
    %c0_6 = arith.constant 0 : index
    %8 = vector.load %arg2[%c0_5, %c0_6] : memref<2x512xf32, #tpu.memory_space<vmem>>, vector<2x512xf32>
    tpu.vector_store %arg2[%c0_5, %c0_6], %7 {strides = array<i32>} : memref<2x512xf32, #tpu.memory_space<vmem>>, vector<2x512xf32>,
    %c1_i32 = arith.constant 1 : i32
    %9 = arith.cmpi eq, %arg0, %c1_i32 : i32
    %10 = arith.extui %9 : i1 to i32
    %c0_i32_7 = arith.constant 0 : i32
    %11 = arith.cmpi ne, %10, %c0_i32_7 : i32
    scf.if %11 {
      %c0_8 = arith.constant 0 : index
      %c0_9 = arith.constant 0 : index
      %12 = vector.load %arg2[%c0_8, %c0_9] : memref<2x512xf32, #tpu.memory_space<vmem>>, vector<2x512xf32>
      %cst_10 = arith.constant 1.562500e-02 : f32
      %13 = vector.broadcast %cst_10 : f32 to vector<2x512xf32>
      %14 = arith.mulf %12, %13 : vector<2x512xf32>
      %c0_11 = arith.constant 0 : index
      %c0_12 = arith.constant 0 : index
      %15 = vector.load %arg2[%c0_11, %c0_12] : memref<2x512xf32, #tpu.memory_space<vmem>>, vector<2x512xf32>
      tpu.vector_store %arg2[%c0_11, %c0_12], %14 {strides = array<i32>} : memref<2x512xf32, #tpu.memory_space<vmem>>, vector<2x512xf32>,
    } else {
    }
    return
  }
  func.func @transform_0(%arg0: i32) -> (i32, i32, i32) {
    %c0_i32 = arith.constant 0 : i32
    %c0_i32_0 = arith.constant 0 : i32
    %c0_i32_1 = arith.constant 0 : i32
    return %c0_i32, %arg0, %c0_i32_0 : i32, i32, i32
  }
  func.func @transform_1(%arg0: i32) -> (i32, i32) {
    %c0_i32 = arith.constant 0 : i32
    %c0_i32_0 = arith.constant 0 : i32
    %c0_i32_1 = arith.constant 0 : i32
    return %c0_i32, %c0_i32_0 : i32, i32
  }
}

</mosaic_0001>

<bundles_post_ra>
// kernel: pool_to_feature_vector.10
= control target key start
LH: loop header
LB: loop body
LE: loop exit
PB: predicated region body
PF: predicated region fallthrough
CT: control target
= control target key end

     0   :  { %s1744_s12 = smov 0   ;;  %s1746_s13 = smov 0   ;;  %s1918_s0 = inlined_call_operand.vmem [shape: bf16[512,256], index: 0, kind: input, shape index: {}]   ;;  %s1919_s1 = inlined_call_operand.vmem [shape: bf16[256,128], index: 1, kind: input, shape index: {}]   ;;  %s1920_s2 = inlined_call_operand.vmem [shape: f32[1,128], index: 2, kind: input, shape index: {}]   ;;  %s1921_s3 = inlined_call_operand.vmem [shape: bf16[512,128], index: 3, kind: output, shape index: {}]  }
   0x1   :  { %s1748_s14 = smov 0  }
   0x2 LB: > { %s32_s15 = sadd.s32 1, %s1718_s13  ;;  %p1267_p0 = scmp.ge.s32.totalorder %s1722_s14, 1  ;;  %s1722_s14 = sphi %s1748_s14, %s13_s14   ;;  %s1718_s13 = sphi %s1746_s13, %s1923_s13   ;;  %s1714_s12 = sphi %s1744_s12, %s1922_s12  }
   0x3   : > { %p34_p1 = scmp.ge.s32.totalorder %s32_s15, 2  ;;  %p191_p2 = scmp.lt.s32.totalorder %s1722_s14, 3 }
   0x5   : > { %s1925_s15 = smov (%p34_p1, %s32_s15), 0  ;;  %p192_p3 = pnand %p1267_p0, %p191_p2 }
   0x6   : > { %v1636_v0 = vld [vmem:[%s1919_s1 + $0x40] sm:$0xff] (!%p192_p3)   ;;  %s1268_s18 = sshll.u32 (!%p192_p3), %s1714_s12, 5  ;;  %v1638_v2 = vld [vmem:[%s1919_s1 + $0x48] sm:$0xff] (!%p192_p3)   ;;  %v1640_v4 = vld [vmem:[%s1919_s1 + $0x50] sm:$0xff] (!%p192_p3)  }
   0x7   : > { %195 = sbr.rel (%p192_p3) target bundleno = 320 (0x140), region = 32  ;;  %v1637_v1 = vld [vmem:[%s1919_s1] sm:$0xff] (!%p192_p3)   ;;  %1484 = vmatprep.subr.bf16.mxu0 (!%p192_p3), %v1636_v0  ;;  %1596 = vmatprep.subr.bf16.mxu1 (!%p192_p3), %v1636_v0  ;;  %v1639_v3 = vld [vmem:[%s1919_s1 + $0x8] sm:$0xff] (!%p192_p3)   ;;  %p236_p4 = scmp.lt.s32.totalorder (!%p192_p3), %s1268_s18, 63  ;;  %v1641_v5 = vld [vmem:[%s1919_s1 + $0x10] sm:$0xff] (!%p192_p3)  }
   0x8   : > { %1485 = vmatpush3.bf16.msra.mxu0 (!%p192_p3), %v1637_v1  ;;  %1604 = vmatpush3.bf16.msra.mxu1 (!%p192_p3), %v1637_v1  ;;  %v1642_v6 = vld [vmem:[%s1919_s1 + $0x58] sm:$0xff] (!%p192_p3)   ;;  %v1644_v8 = vld [vmem:[%s1919_s1 + $0x60] sm:$0xff] (!%p192_p3)   ;;  %v1646_v10 = vld [vmem:[%s1919_s1 + $0x68] sm:$0xff] (!%p192_p3)  }
   0x9   : > { %1486 = vmatprep.subr.bf16.mxu0 (!%p192_p3), %v1638_v2  ;;  %1597 = vmatprep.subr.bf16.mxu1 (!%p192_p3), %v1638_v2  ;;  %v1643_v7 = vld [vmem:[%s1919_s1 + $0x18] sm:$0xff] (!%p192_p3)   ;;  %v1645_v9 = vld [vmem:[%s1919_s1 + $0x20] sm:$0xff] (!%p192_p3)   ;;  %v1647_v13 = vld [vmem:[%s1919_s1 + $0x28] sm:$0xff] (!%p192_p3)  }
   0xa   : > { %v1648_v14 = vld [vmem:[%s1919_s1 + $0x70] sm:$0xff] (!%p192_p3)   ;;  %v1650_v16 = vld [vmem:[%s1919_s1 + $0x78] sm:$0xff] (!%p192_p3)   ;;  %v1853_v51 = vld [vmem:[%s1920_s2] ss:$0 sm:$0xff] (!%p192_p3) }
   0xb   : > { %v1649_v15 = vld [vmem:[%s1919_s1 + $0x30] sm:$0xff] (!%p192_p3)   ;;  %v1651_v17 = vld [vmem:[%s1919_s1 + $0x38] sm:$0xff] (!%p192_p3)  }
   0xc   : > { %1487 = vmatpush3.bf16.msra.mxu0 (!%p192_p3), %v1639_v3  ;;  %1605 = vmatpush3.bf16.msra.mxu1 (!%p192_p3), %v1639_v3 }
   0xd   : > { %1488 = vmatprep.subr.bf16.mxu0 (!%p192_p3), %v1640_v4  ;;  %1598 = vmatprep.subr.bf16.mxu1 (!%p192_p3), %v1640_v4 }
   0xe   : > { %s1927_s18 = smov (!%p236_p4, %s1268_s18), 63 }
   0xf   : > { %s1356_s6 = sshll.u32 %s1927_s18, 3  ;;  %s1272_s5 = sshll.u32 %s1927_s18, 2 }
  0x10   : > { %1489 = vmatpush3.bf16.msra.mxu0 %v1641_v5  ;;  %1606 = vmatpush3.bf16.msra.mxu1 %v1641_v5  ;;  %s1795_s11 = scalar_lea.vmem %s1918_s0, %s1356_s6  ;;  %s1863_s8 = scalar_lea.vmem %s1921_s3, %s1272_s5 }
  0x11   : > { %1490 = vmatprep.subr.bf16.mxu0 %v1642_v6  ;;  %1599 = vmatprep.subr.bf16.mxu1 %v1642_v6  ;;  %v1654_v11 = vld [vmem:[%s1795_s11 + $0x4] ss:$8 sps:$4 sm:$0xff]   ;;  %v1652_v18 = vld [vmem:[%s1795_s11] ss:$8 sps:$4 sm:$0xff]   ;;  %v1658_v20 = vld [vmem:[%s1795_s11 + $0x14] ss:$8 sps:$4 sm:$0xff]  }
  0x12   : > { %v1657_v12 = vld [vmem:[%s1795_s11 + $0x84] ss:$8 sps:$4 sm:$0xff]   ;;  %688 = vmatprep.mubr.bf16.mxu0 %v1654_v11  ;;  %v1655_v19 = vld [vmem:[%s1795_s11 + $0x80] ss:$8 sps:$4 sm:$0xff]   ;;  %v1660_v21 = vld [vmem:[%s1795_s11 + $0x94] ss:$8 sps:$4 sm:$0xff]  }
  0x13   : > { %752 = vmatprep.mubr.bf16.mxu1 %v1657_v12  ;;  %v1662_v22 = vld [vmem:[%s1795_s11 + $0x10] ss:$8 sps:$4 sm:$0xff]   ;;  %v1664_v24 = vld [vmem:[%s1795_s11 + $0x24] ss:$8 sps:$4 sm:$0xff]   ;;  %v1668_v26 = vld [vmem:[%s1795_s11 + $0x20] ss:$8 sps:$4 sm:$0xff]  }
  0x14   : > { %1491 = vmatpush3.bf16.msra.mxu0 %v1643_v7  ;;  %1607 = vmatpush3.bf16.msra.mxu1 %v1643_v7  ;;  %v1663_v23 = vld [vmem:[%s1795_s11 + $0x90] ss:$8 sps:$4 sm:$0xff]   ;;  %v1666_v25 = vld [vmem:[%s1795_s11 + $0xa4] ss:$8 sps:$4 sm:$0xff]   ;;  %v1669_v27 = vld [vmem:[%s1795_s11 + $0xa0] ss:$8 sps:$4 sm:$0xff]  }
  0x15   : > { %1492 = vmatprep.subr.bf16.mxu0 %v1644_v8  ;;  %1600 = vmatprep.subr.bf16.mxu1 %v1644_v8  ;;  %v1670_v28 = vld [vmem:[%s1795_s11 + $0x34] ss:$8 sps:$4 sm:$0xff]   ;;  %v1674_v30 = vld [vmem:[%s1795_s11 + $0x30] ss:$8 sps:$4 sm:$0xff]   ;;  %v1676_v32 = vld [vmem:[%s1795_s11 + $0x44] ss:$8 sps:$4 sm:$0xff]  }
  0x16   : > { %v1672_v29 = vld [vmem:[%s1795_s11 + $0xb4] ss:$8 sps:$4 sm:$0xff]   ;;  %v1675_v31 = vld [vmem:[%s1795_s11 + $0xb0] ss:$8 sps:$4 sm:$0xff]   ;;  %v1678_v33 = vld [vmem:[%s1795_s11 + $0xc4] ss:$8 sps:$4 sm:$0xff]  }
  0x17   : > { %v1680_v34 = vld [vmem:[%s1795_s11 + $0x40] ss:$8 sps:$4 sm:$0xff]   ;;  %v1682_v36 = vld [vmem:[%s1795_s11 + $0x54] ss:$8 sps:$4 sm:$0xff]   ;;  %v1686_v38 = vld [vmem:[%s1795_s11 + $0x50] ss:$8 sps:$4 sm:$0xff]  }
  0x18   : > { %1493 = vmatpush3.bf16.msra.mxu0 %v1645_v9  ;;  %1608 = vmatpush3.bf16.msra.mxu1 %v1645_v9  ;;  %v1681_v35 = vld [vmem:[%s1795_s11 + $0xc0] ss:$8 sps:$4 sm:$0xff]   ;;  %v1684_v37 = vld [vmem:[%s1795_s11 + $0xd4] ss:$8 sps:$4 sm:$0xff]   ;;  %v1687_v39 = vld [vmem:[%s1795_s11 + $0xd0] ss:$8 sps:$4 sm:$0xff]  }
  0x19   : > { %1494 = vmatprep.subr.bf16.mxu0 %v1646_v10  ;;  %1601 = vmatprep.subr.bf16.mxu1 %v1646_v10  ;;  %v1688_v40 = vld [vmem:[%s1795_s11 + $0x64] ss:$8 sps:$4 sm:$0xff]   ;;  %v1692_v42 = vld [vmem:[%s1795_s11 + $0x60] ss:$8 sps:$4 sm:$0xff]   ;;  %v1694_v44 = vld [vmem:[%s1795_s11 + $0x74] ss:$8 sps:$4 sm:$0xff]  }
  0x1a   : > { %v1690_v41 = vld [vmem:[%s1795_s11 + $0xe4] ss:$8 sps:$4 sm:$0xff]   ;;  %v1693_v43 = vld [vmem:[%s1795_s11 + $0xe0] ss:$8 sps:$4 sm:$0xff]   ;;  %v1696_v45 = vld [vmem:[%s1795_s11 + $0xf4] ss:$8 sps:$4 sm:$0xff]  }
  0x1b   : > { %v1698_v46 = vld [vmem:[%s1795_s11 + $0x70] ss:$8 sps:$4 sm:$0xff]  }
  0x1c   : > { %1495 = vmatpush3.bf16.msra.mxu0 %v1647_v13  ;;  %1609 = vmatpush3.bf16.msra.mxu1 %v1647_v13  ;;  %v1699_v47 = vld [vmem:[%s1795_s11 + $0xf0] ss:$8 sps:$4 sm:$0xff]  }
  0x1d   : > { %1496 = vmatprep.subr.bf16.mxu0 %v1648_v14  ;;  %1602 = vmatprep.subr.bf16.mxu1 %v1648_v14 }
  0x20   : > { %1497 = vmatpush3.bf16.msra.mxu0 %v1649_v15  ;;  %1610 = vmatpush3.bf16.msra.mxu1 %v1649_v15 }
  0x21   : > { %1498 = vmatprep.subr.bf16.mxu0 %v1650_v16  ;;  %1603 = vmatprep.subr.bf16.mxu1 %v1650_v16 }
  0x24   : > { %1499 = vmatpush3.bf16.msra.mxu0 %v1651_v17  ;;  %1611 = vmatpush3.bf16.msra.mxu1 %v1651_v17 }
  0x27   : > { %689 = vmatmul.mubr.bf16.vlgmr.msra.gmra.mrb[0].mxu0 %v1652_v18  ;;  %753 = vmatmul.mubr.bf16.vlgmr.msra.gmra.mrb[0].mxu1 %v1655_v19 }
  0x28   : > { %696 = vmatprep.mubr.bf16.mxu0 %v1658_v20  ;;  %760 = vmatprep.mubr.bf16.mxu1 %v1660_v21 }
  0x2f   : > { %697 = vmatmul.mubr.bf16.gmra.mrb[4].mxu0 %v1662_v22  ;;  %761 = vmatmul.mubr.bf16.gmra.mrb[4].mxu1 %v1663_v23 }
  0x30   : > { %704 = vmatprep.mubr.bf16.mxu0 %v1664_v24  ;;  %768 = vmatprep.mubr.bf16.mxu1 %v1666_v25 }
  0x37   : > { %705 = vmatmul.mubr.bf16.gmra.mrb[8].mxu0 %v1668_v26  ;;  %769 = vmatmul.mubr.bf16.gmra.mrb[8].mxu1 %v1669_v27 }
  0x38   : > { %712 = vmatprep.mubr.bf16.mxu0 %v1670_v28  ;;  %776 = vmatprep.mubr.bf16.mxu1 %v1672_v29 }
  0x3f   : > { %713 = vmatmul.mubr.bf16.gmra.mrb[12].mxu0 %v1674_v30  ;;  %777 = vmatmul.mubr.bf16.gmra.mrb[12].mxu1 %v1675_v31 }
  0x40   : > { %720 = vmatprep.mubr.bf16.mxu0 %v1676_v32  ;;  %784 = vmatprep.mubr.bf16.mxu1 %v1678_v33 }
  0x47   : > { %721 = vmatmul.mubr.bf16.gmra.mrb[16].mxu0 %v1680_v34  ;;  %785 = vmatmul.mubr.bf16.gmra.mrb[16].mxu1 %v1681_v35 }
  0x48   : > { %728 = vmatprep.mubr.bf16.mxu0 %v1682_v36  ;;  %792 = vmatprep.mubr.bf16.mxu1 %v1684_v37 }
  0x4f   : > { %729 = vmatmul.mubr.bf16.gmra.mrb[20].mxu0 %v1686_v38  ;;  %793 = vmatmul.mubr.bf16.gmra.mrb[20].mxu1 %v1687_v39 }
  0x50   : > { %736 = vmatprep.mubr.bf16.mxu0 %v1688_v40  ;;  %800 = vmatprep.mubr.bf16.mxu1 %v1690_v41 }
  0x57   : > { %737 = vmatmul.mubr.bf16.gmra.mrb[24].mxu0 %v1692_v42  ;;  %801 = vmatmul.mubr.bf16.gmra.mrb[24].mxu1 %v1693_v43 }
  0x58   : > { %744 = vmatprep.mubr.bf16.mxu0 %v1694_v44  ;;  %808 = vmatprep.mubr.bf16.mxu1 %v1696_v45 }
  0x5f   : > { %745 = vmatmul.mubr.bf16.gmra.mrb[28].mxu0 %v1698_v46  ;;  %809 = vmatmul.mubr.bf16.gmra.mrb[28].mxu1 %v1699_v47 }
  0xfa   : > { %v1500_v48 = vpop.f32.mrb[0].mxu0  ;;  %v1548_v49 = vpop.f32.mrb[0].mxu1 }
  0xfb   : > { %v1501_v50 = vpop.f32.mrb[1].mxu0  ;;  %v1549_v52 = vpop.f32.mrb[1].mxu1 }
  0xfc   : > { %v1502_v53 = vadd.f32 %v1501_v50, %v1500_v48  ;;  %v1550_v54 = vadd.f32 %v1549_v52, %v1548_v49  ;;  %v1503_v55 = vpop.f32.mrb[2].mxu0  ;;  %v1551_v56 = vpop.f32.mrb[2].mxu1 }
  0xfd   : > { %v1504_v57 = vpop.f32.mrb[3].mxu0  ;;  %v1552_v58 = vpop.f32.mrb[3].mxu1 }
  0xfe   : > { %v923_v59 = vadd.f32 %v1502_v53, %v1853_v51  ;;  %v939_v60 = vadd.f32 %v1550_v54, %v1853_v51  ;;  %v1505_v61 = vadd.f32 %v1504_v57, %v1503_v55  ;;  %v1553_v62 = vadd.f32 %v1552_v58, %v1551_v56 }
 0x100   : > { %v924_v63 = vadd.f32 %v1505_v61, %v1853_v51  ;;  %v940_v0 = vadd.f32 %v1553_v62, %v1853_v51  ;;  %v955_v1 = vmax.f32 %v923_v59, 0.0  ;;  %v971_v2 = vmax.f32 %v939_v60, 0.0 }
 0x102   : > { %v956_v3 = vmax.f32 %v924_v63, 0.0  ;;  %v972_v4 = vmax.f32 %v940_v0, 0.0  ;;  %v1506_v5 = vpop.f32.mrb[4].mxu0  ;;  %v1554_v6 = vpop.f32.mrb[4].mxu1 }
 0x103   : > { %v1507_v7 = vpop.f32.mrb[5].mxu0  ;;  %v1555_v8 = vpop.f32.mrb[5].mxu1 }
 0x104   : > { %v1392_v9 = vpack.c.bf16 %v956_v3, %v955_v1  ;;  %v1432_v10 = vpack.c.bf16 %v972_v4, %v971_v2  ;;  %v1508_v11 = vadd.f32 %v1507_v7, %v1506_v5  ;;  %v1556_v12 = vadd.f32 %v1555_v8, %v1554_v6  ;;  %v1509_v13 = vpop.f32.mrb[6].mxu0  ;;  %v1557_v14 = vpop.f32.mrb[6].mxu1 }
 0x105   : > { %v1510_v15 = vpop.f32.mrb[7].mxu0  ;;  %v1558_v16 = vpop.f32.mrb[7].mxu1 }
 0x106   : > { %1393 = vst [vmem:[%s1863_s8] sm:$0xff] %v1392_v9   ;;  %1476 = vst [vmem:[%s1863_s8 + $0x40] sm:$0xff] %v1432_v10   ;;  %v925_v17 = vadd.f32 %v1508_v11, %v1853_v51  ;;  %v941_v18 = vadd.f32 %v1556_v12, %v1853_v51  ;;  %v1511_v19 = vadd.f32 %v1510_v15, %v1509_v13 }
 0x107   : > { %v1559_v20 = vadd.f32 %v1558_v16, %v1557_v14 }
 0x108   : > { %v926_v21 = vadd.f32 %v1511_v19, %v1853_v51  ;;  %v957_v23 = vmax.f32 %v925_v17, 0.0  ;;  %v973_v24 = vmax.f32 %v941_v18, 0.0 }
 0x109   : > { %v942_v22 = vadd.f32 %v1559_v20, %v1853_v51 }
 0x10a   : > { %v958_v25 = vmax.f32 %v926_v21, 0.0  ;;  %v1512_v27 = vpop.f32.mrb[8].mxu0  ;;  %v1560_v28 = vpop.f32.mrb[8].mxu1 }
 0x10b   : > { %v974_v26 = vmax.f32 %v942_v22, 0.0  ;;  %v1513_v29 = vpop.f32.mrb[9].mxu0  ;;  %v1561_v30 = vpop.f32.mrb[9].mxu1 }
 0x10c   : > { %v1397_v31 = vpack.c.bf16 %v958_v25, %v957_v23  ;;  %v1514_v33 = vadd.f32 %v1513_v29, %v1512_v27  ;;  %v1562_v34 = vadd.f32 %v1561_v30, %v1560_v28  ;;  %v1515_v35 = vpop.f32.mrb[10].mxu0  ;;  %v1563_v36 = vpop.f32.mrb[10].mxu1 }
 0x10d   : > { %v1437_v32 = vpack.c.bf16 %v974_v26, %v973_v24  ;;  %v1516_v37 = vpop.f32.mrb[11].mxu0  ;;  %v1564_v38 = vpop.f32.mrb[11].mxu1 }
 0x10e   : > { %1469 = vst [vmem:[%s1863_s8 + $0x8] sm:$0xff] %v1397_v31   ;;  %v927_v39 = vadd.f32 %v1514_v33, %v1853_v51  ;;  %v943_v40 = vadd.f32 %v1562_v34, %v1853_v51  ;;  %v1517_v41 = vadd.f32 %v1516_v37, %v1515_v35  ;;  %v1565_v42 = vadd.f32 %v1564_v38, %v1563_v36 }
 0x10f   : > { %1477 = vst [vmem:[%s1863_s8 + $0x48] sm:$0xff] %v1437_v32  }
 0x110   : > { %v928_v43 = vadd.f32 %v1517_v41, %v1853_v51  ;;  %v944_v44 = vadd.f32 %v1565_v42, %v1853_v51  ;;  %v959_v45 = vmax.f32 %v927_v39, 0.0  ;;  %v975_v46 = vmax.f32 %v943_v40, 0.0 }
 0x112   : > { %v960_v47 = vmax.f32 %v928_v43, 0.0  ;;  %v976_v48 = vmax.f32 %v944_v44, 0.0  ;;  %v1518_v49 = vpop.f32.mrb[12].mxu0  ;;  %v1566_v50 = vpop.f32.mrb[12].mxu1 }
 0x113   : > { %v1519_v52 = vpop.f32.mrb[13].mxu0  ;;  %v1567_v53 = vpop.f32.mrb[13].mxu1 }
 0x114   : > { %v1402_v54 = vpack.c.bf16 %v960_v47, %v959_v45  ;;  %v1442_v55 = vpack.c.bf16 %v976_v48, %v975_v46  ;;  %v1520_v56 = vadd.f32 %v1519_v52, %v1518_v49  ;;  %v1568_v57 = vadd.f32 %v1567_v53, %v1566_v50  ;;  %v1521_v58 = vpop.f32.mrb[14].mxu0  ;;  %v1569_v59 = vpop.f32.mrb[14].mxu1 }
 0x115   : > { %v1522_v60 = vpop.f32.mrb[15].mxu0  ;;  %v1570_v61 = vpop.f32.mrb[15].mxu1 }
 0x116   : > { %1470 = vst [vmem:[%s1863_s8 + $0x10] sm:$0xff] %v1402_v54   ;;  %1478 = vst [vmem:[%s1863_s8 + $0x50] sm:$0xff] %v1442_v55   ;;  %v929_v62 = vadd.f32 %v1520_v56, %v1853_v51  ;;  %v945_v63 = vadd.f32 %v1568_v57, %v1853_v51  ;;  %v1523_v0 = vadd.f32 %v1522_v60, %v1521_v58 }
 0x117   : > { %v1571_v1 = vadd.f32 %v1570_v61, %v1569_v59 }
 0x118   : > { %v930_v2 = vadd.f32 %v1523_v0, %v1853_v51  ;;  %v961_v4 = vmax.f32 %v929_v62, 0.0  ;;  %v977_v5 = vmax.f32 %v945_v63, 0.0 }
 0x119   : > { %v946_v3 = vadd.f32 %v1571_v1, %v1853_v51 }
 0x11a   : > { %v962_v6 = vmax.f32 %v930_v2, 0.0  ;;  %v1524_v8 = vpop.f32.mrb[16].mxu0  ;;  %v1572_v9 = vpop.f32.mrb[16].mxu1 }
 0x11b   : > { %v978_v7 = vmax.f32 %v946_v3, 0.0  ;;  %v1525_v10 = vpop.f32.mrb[17].mxu0  ;;  %v1573_v11 = vpop.f32.mrb[17].mxu1 }
 0x11c   : > { %v1407_v12 = vpack.c.bf16 %v962_v6, %v961_v4  ;;  %v1526_v14 = vadd.f32 %v1525_v10, %v1524_v8  ;;  %v1574_v15 = vadd.f32 %v1573_v11, %v1572_v9  ;;  %v1527_v16 = vpop.f32.mrb[18].mxu0  ;;  %v1575_v17 = vpop.f32.mrb[18].mxu1 }
 0x11d   : > { %v1447_v13 = vpack.c.bf16 %v978_v7, %v977_v5  ;;  %v1528_v18 = vpop.f32.mrb[19].mxu0  ;;  %v1576_v19 = vpop.f32.mrb[19].mxu1 }
 0x11e   : > { %1471 = vst [vmem:[%s1863_s8 + $0x18] sm:$0xff] %v1407_v12   ;;  %v931_v20 = vadd.f32 %v1526_v14, %v1853_v51  ;;  %v947_v21 = vadd.f32 %v1574_v15, %v1853_v51  ;;  %v1529_v22 = vadd.f32 %v1528_v18, %v1527_v16  ;;  %v1577_v23 = vadd.f32 %v1576_v19, %v1575_v17 }
 0x11f   : > { %1479 = vst [vmem:[%s1863_s8 + $0x58] sm:$0xff] %v1447_v13  }
 0x120   : > { %v932_v24 = vadd.f32 %v1529_v22, %v1853_v51  ;;  %v948_v25 = vadd.f32 %v1577_v23, %v1853_v51  ;;  %v963_v26 = vmax.f32 %v931_v20, 0.0  ;;  %v979_v27 = vmax.f32 %v947_v21, 0.0 }
 0x122   : > { %v964_v28 = vmax.f32 %v932_v24, 0.0  ;;  %v980_v29 = vmax.f32 %v948_v25, 0.0  ;;  %v1530_v30 = vpop.f32.mrb[20].mxu0  ;;  %v1578_v31 = vpop.f32.mrb[20].mxu1 }
 0x123   : > { %v1531_v32 = vpop.f32.mrb[21].mxu0  ;;  %v1579_v33 = vpop.f32.mrb[21].mxu1 }
 0x124   : > { %v1412_v34 = vpack.c.bf16 %v964_v28, %v963_v26  ;;  %v1452_v35 = vpack.c.bf16 %v980_v29, %v979_v27  ;;  %v1532_v36 = vadd.f32 %v1531_v32, %v1530_v30  ;;  %v1580_v37 = vadd.f32 %v1579_v33, %v1578_v31  ;;  %v1533_v38 = vpop.f32.mrb[22].mxu0  ;;  %v1581_v39 = vpop.f32.mrb[22].mxu1 }
 0x125   : > { %v1534_v40 = vpop.f32.mrb[23].mxu0  ;;  %v1582_v41 = vpop.f32.mrb[23].mxu1 }
 0x126   : > { %1472 = vst [vmem:[%s1863_s8 + $0x20] sm:$0xff] %v1412_v34   ;;  %1480 = vst [vmem:[%s1863_s8 + $0x60] sm:$0xff] %v1452_v35   ;;  %v933_v42 = vadd.f32 %v1532_v36, %v1853_v51  ;;  %v949_v43 = vadd.f32 %v1580_v37, %v1853_v51  ;;  %v1535_v44 = vadd.f32 %v1534_v40, %v1533_v38 }
 0x127   : > { %v1583_v45 = vadd.f32 %v1582_v41, %v1581_v39 }
 0x128   : > { %v934_v46 = vadd.f32 %v1535_v44, %v1853_v51  ;;  %v965_v48 = vmax.f32 %v933_v42, 0.0  ;;  %v981_v49 = vmax.f32 %v949_v43, 0.0 }
 0x129   : > { %v950_v47 = vadd.f32 %v1583_v45, %v1853_v51 }
 0x12a   : > { %v966_v50 = vmax.f32 %v934_v46, 0.0  ;;  %v1536_v53 = vpop.f32.mrb[24].mxu0  ;;  %v1584_v54 = vpop.f32.mrb[24].mxu1 }
 0x12b   : > { %v982_v52 = vmax.f32 %v950_v47, 0.0  ;;  %v1537_v55 = vpop.f32.mrb[25].mxu0  ;;  %v1585_v56 = vpop.f32.mrb[25].mxu1 }
 0x12c   : > { %v1417_v57 = vpack.c.bf16 %v966_v50, %v965_v48  ;;  %v1538_v59 = vadd.f32 %v1537_v55, %v1536_v53  ;;  %v1586_v60 = vadd.f32 %v1585_v56, %v1584_v54  ;;  %v1539_v61 = vpop.f32.mrb[26].mxu0  ;;  %v1587_v62 = vpop.f32.mrb[26].mxu1 }
 0x12d   : > { %v1457_v58 = vpack.c.bf16 %v982_v52, %v981_v49  ;;  %v1540_v63 = vpop.f32.mrb[27].mxu0  ;;  %v1588_v0 = vpop.f32.mrb[27].mxu1 }
 0x12e   : > { %1473 = vst [vmem:[%s1863_s8 + $0x28] sm:$0xff] %v1417_v57   ;;  %v935_v1 = vadd.f32 %v1538_v59, %v1853_v51  ;;  %v951_v2 = vadd.f32 %v1586_v60, %v1853_v51  ;;  %v1541_v3 = vadd.f32 %v1540_v63, %v1539_v61  ;;  %v1589_v4 = vadd.f32 %v1588_v0, %v1587_v62 }
 0x12f   : > { %1481 = vst [vmem:[%s1863_s8 + $0x68] sm:$0xff] %v1457_v58  }
 0x130   : > { %v936_v5 = vadd.f32 %v1541_v3, %v1853_v51  ;;  %v952_v6 = vadd.f32 %v1589_v4, %v1853_v51  ;;  %v967_v7 = vmax.f32 %v935_v1, 0.0  ;;  %v983_v8 = vmax.f32 %v951_v2, 0.0 }
 0x132   : > { %v968_v9 = vmax.f32 %v936_v5, 0.0  ;;  %v984_v10 = vmax.f32 %v952_v6, 0.0  ;;  %v1542_v11 = vpop.f32.mrb[28].mxu0  ;;  %v1590_v12 = vpop.f32.mrb[28].mxu1 }
 0x133   : > { %v1543_v13 = vpop.f32.mrb[29].mxu0  ;;  %v1591_v14 = vpop.f32.mrb[29].mxu1 }
 0x134   : > { %v1422_v15 = vpack.c.bf16 %v968_v9, %v967_v7  ;;  %v1462_v16 = vpack.c.bf16 %v984_v10, %v983_v8  ;;  %v1544_v17 = vadd.f32 %v1543_v13, %v1542_v11  ;;  %v1592_v18 = vadd.f32 %v1591_v14, %v1590_v12  ;;  %v1545_v19 = vpop.f32.mrb[30].mxu0  ;;  %v1593_v20 = vpop.f32.mrb[30].mxu1 }
 0x135   : > { %v1546_v21 = vpop.f32.mrb[31].mxu0  ;;  %v1594_v22 = vpop.f32.mrb[31].mxu1 }
 0x136   : > { %1474 = vst [vmem:[%s1863_s8 + $0x30] sm:$0xff] %v1422_v15   ;;  %1482 = vst [vmem:[%s1863_s8 + $0x70] sm:$0xff] %v1462_v16   ;;  %v937_v23 = vadd.f32 %v1544_v17, %v1853_v51  ;;  %v953_v24 = vadd.f32 %v1592_v18, %v1853_v51  ;;  %v1547_v25 = vadd.f32 %v1546_v21, %v1545_v19 }
 0x137   : > { %v1595_v26 = vadd.f32 %v1594_v22, %v1593_v20 }
 0x138   : > { %v938_v27 = vadd.f32 %v1547_v25, %v1853_v51  ;;  %v969_v29 = vmax.f32 %v937_v23, 0.0  ;;  %v985_v30 = vmax.f32 %v953_v24, 0.0 }
 0x139   : > { %v954_v28 = vadd.f32 %v1595_v26, %v1853_v51 }
 0x13a   : > { %v970_v31 = vmax.f32 %v938_v27, 0.0 }
 0x13b   : > { %v986_v32 = vmax.f32 %v954_v28, 0.0 }
 0x13c   : > { %v1427_v33 = vpack.c.bf16 %v970_v31, %v969_v29 }
 0x13d   : > { %v1467_v34 = vpack.c.bf16 %v986_v32, %v985_v30 }
 0x13e   : > { %1475 = vst [vmem:[%s1863_s8 + $0x38] sm:$0xff] %v1427_v33  }
 0x13f   : > { %1483 = vst [vmem:[%s1863_s8 + $0x78] sm:$0xff] %v1467_v34  }
 0x140 PF: > { %s13_s14 = sadd.s32 1, %s1722_s14   ;;  %s1922_s12 = smov %s1718_s13 }
 0x141   : > { %p10_p5 = scmp.ge.s32.totalorder %s13_s14, 4   ;;  %s1923_s13 = smov %s1925_s15 }
 0x143   :  { %12 = sbr.rel (!%p10_p5) target bundleno = 2 (0x2), region = 76 }

// kernel: pool_to_feature_vector.13
= control target key start
LH: loop header
LB: loop body
LE: loop exit
PB: predicated region body
PF: predicated region fallthrough
CT: control target
= control target key end

     0   :  { %s1476_s1 = inlined_call_operand.vmem [shape: bf16[512,128], index: 1, kind: input, shape index: {}]   ;;  %s1477_s0 = inlined_call_operand.vmem [shape: bf16[128,512], index: 0, kind: input, shape index: {}]   ;;  %s1478_s2 = inlined_call_operand.vmem [shape: f32[1,128], index: 2, kind: input, shape index: {}]   ;;  %s1479_s3 = inlined_call_operand.vmem [shape: bf16[128,128], index: 3, kind: output, shape index: {}]  }
   0x1   :  { %v1139_v0 = vld [vmem:[%s1476_s1 + $0x40] sm:$0xff]   ;;  %v1143_v4 = vld [vmem:[%s1476_s1 + $0x48] sm:$0xff]   ;;  %v1147_v8 = vld [vmem:[%s1476_s1 + $0x50] sm:$0xff]  }
   0x2   :  { %v1140_v1 = vld [vmem:[%s1476_s1 + $0xc0] sm:$0xff]   ;;  %1011 = vmatprep.subr.bf16.mxu0 %v1139_v0  ;;  %v1144_v5 = vld [vmem:[%s1476_s1 + $0xc8] sm:$0xff]   ;;  %v1148_v9 = vld [vmem:[%s1476_s1 + $0xd0] sm:$0xff]  }
   0x3   :  { %v1141_v2 = vld [vmem:[%s1476_s1] sm:$0xff]   ;;  %1075 = vmatprep.subr.bf16.mxu1 %v1140_v1  ;;  %v1145_v6 = vld [vmem:[%s1476_s1 + $0x8] sm:$0xff]   ;;  %v1149_v10 = vld [vmem:[%s1476_s1 + $0x10] sm:$0xff]  }
   0x4   :  { %v1142_v3 = vld [vmem:[%s1476_s1 + $0x80] sm:$0xff]   ;;  %1012 = vmatpush3.bf16.msra.mxu0 %v1141_v2  ;;  %v1146_v7 = vld [vmem:[%s1476_s1 + $0x88] sm:$0xff]   ;;  %v1150_v11 = vld [vmem:[%s1476_s1 + $0x90] sm:$0xff]  }
   0x5   :  { %1076 = vmatpush3.bf16.msra.mxu1 %v1142_v3  ;;  %1013 = vmatprep.subr.bf16.mxu0 %v1143_v4  ;;  %v1151_v12 = vld [vmem:[%s1476_s1 + $0x58] sm:$0xff]   ;;  %v1155_v16 = vld [vmem:[%s1476_s1 + $0x60] sm:$0xff]   ;;  %v1159_v20 = vld [vmem:[%s1476_s1 + $0x68] sm:$0xff]  }
   0x6   :  { %1077 = vmatprep.subr.bf16.mxu1 %v1144_v5  ;;  %v1152_v13 = vld [vmem:[%s1476_s1 + $0xd8] sm:$0xff]   ;;  %v1156_v17 = vld [vmem:[%s1476_s1 + $0xe0] sm:$0xff]   ;;  %v1160_v21 = vld [vmem:[%s1476_s1 + $0xe8] sm:$0xff]  }
   0x7   :  { %v1153_v14 = vld [vmem:[%s1476_s1 + $0x18] sm:$0xff]   ;;  %v1157_v18 = vld [vmem:[%s1476_s1 + $0x20] sm:$0xff]   ;;  %v1161_v22 = vld [vmem:[%s1476_s1 + $0x28] sm:$0xff]  }
   0x8   :  { %1014 = vmatpush3.bf16.msra.mxu0 %v1145_v6  ;;  %v1154_v15 = vld [vmem:[%s1476_s1 + $0x98] sm:$0xff]   ;;  %v1158_v19 = vld [vmem:[%s1476_s1 + $0xa0] sm:$0xff]   ;;  %v1162_v23 = vld [vmem:[%s1476_s1 + $0xa8] sm:$0xff]  }
   0x9   :  { %1078 = vmatpush3.bf16.msra.mxu1 %v1146_v7  ;;  %1015 = vmatprep.subr.bf16.mxu0 %v1147_v8  ;;  %v1163_v24 = vld [vmem:[%s1476_s1 + $0x70] sm:$0xff]   ;;  %v1167_v28 = vld [vmem:[%s1476_s1 + $0x78] sm:$0xff]  }
   0xa   :  { %1079 = vmatprep.subr.bf16.mxu1 %v1148_v9  ;;  %v1164_v25 = vld [vmem:[%s1476_s1 + $0xf0] sm:$0xff]   ;;  %v1168_v29 = vld [vmem:[%s1476_s1 + $0xf8] sm:$0xff]   ;;  %v1434_v9 = vld [vmem:[%s1478_s2] ss:$0 sm:$0xff] }
   0xb   :  { %v1165_v26 = vld [vmem:[%s1476_s1 + $0x30] sm:$0xff]   ;;  %v1169_v30 = vld [vmem:[%s1476_s1 + $0x38] sm:$0xff]  }
   0xc   :  { %1016 = vmatpush3.bf16.msra.mxu0 %v1149_v10  ;;  %v1166_v27 = vld [vmem:[%s1476_s1 + $0xb0] sm:$0xff]   ;;  %v1170_v31 = vld [vmem:[%s1476_s1 + $0xb8] sm:$0xff]  }
   0xd   :  { %1080 = vmatpush3.bf16.msra.mxu1 %v1150_v11  ;;  %1017 = vmatprep.subr.bf16.mxu0 %v1151_v12  ;;  %v1171_v32 = vld [vmem:[%s1477_s0] ss:$16 sps:$4 sm:$0xff]   ;;  %v1173_v33 = vld [vmem:[%s1477_s0 + $0x4] ss:$16 sps:$4 sm:$0xff]   ;;  %v1174_v34 = vld [vmem:[%s1477_s0 + $0x8] ss:$16 sps:$4 sm:$0xff]  }
   0xe   :  { %1081 = vmatprep.subr.bf16.mxu1 %v1152_v13  ;;  %v1176_v35 = vld [vmem:[%s1477_s0 + $0xc] ss:$16 sps:$4 sm:$0xff]   ;;  %531 = vmatprep.mubr.bf16.mxu0 %v1173_v33  ;;  %v1177_v36 = vld [vmem:[%s1477_s0 + $0x24] ss:$16 sps:$4 sm:$0xff]   ;;  %v1181_v38 = vld [vmem:[%s1477_s0 + $0x20] ss:$16 sps:$4 sm:$0xff]  }
   0xf   :  { %628 = vmatprep.mubr.bf16.mxu1 %v1176_v35  ;;  %v1179_v37 = vld [vmem:[%s1477_s0 + $0x2c] ss:$16 sps:$4 sm:$0xff]   ;;  %v1182_v39 = vld [vmem:[%s1477_s0 + $0x28] ss:$16 sps:$4 sm:$0xff]   ;;  %v1183_v40 = vld [vmem:[%s1477_s0 + $0x44] ss:$16 sps:$4 sm:$0xff]  }
  0x10   :  { %1018 = vmatpush3.bf16.msra.mxu0 %v1153_v14  ;;  %v1185_v41 = vld [vmem:[%s1477_s0 + $0x4c] ss:$16 sps:$4 sm:$0xff]   ;;  %v1187_v42 = vld [vmem:[%s1477_s0 + $0x40] ss:$16 sps:$4 sm:$0xff]   ;;  %v1188_v43 = vld [vmem:[%s1477_s0 + $0x48] ss:$16 sps:$4 sm:$0xff]  }
  0x11   :  { %1082 = vmatpush3.bf16.msra.mxu1 %v1154_v15  ;;  %1019 = vmatprep.subr.bf16.mxu0 %v1155_v16  ;;  %v1189_v44 = vld [vmem:[%s1477_s0 + $0x64] ss:$16 sps:$4 sm:$0xff]   ;;  %v1191_v45 = vld [vmem:[%s1477_s0 + $0x6c] ss:$16 sps:$4 sm:$0xff]   ;;  %v1193_v46 = vld [vmem:[%s1477_s0 + $0x60] ss:$16 sps:$4 sm:$0xff]  }
  0x12   :  { %1083 = vmatprep.subr.bf16.mxu1 %v1156_v17  ;;  %v1194_v47 = vld [vmem:[%s1477_s0 + $0x68] ss:$16 sps:$4 sm:$0xff]   ;;  %v1195_v48 = vld [vmem:[%s1477_s0 + $0x84] ss:$16 sps:$4 sm:$0xff]   ;;  %v1197_v49 = vld [vmem:[%s1477_s0 + $0x8c] ss:$16 sps:$4 sm:$0xff]  }
  0x13   :  { %v1199_v50 = vld [vmem:[%s1477_s0 + $0x80] ss:$16 sps:$4 sm:$0xff]   ;;  %v1200_v51 = vld [vmem:[%s1477_s0 + $0x88] ss:$16 sps:$4 sm:$0xff]   ;;  %v1201_v52 = vld [vmem:[%s1477_s0 + $0xa4] ss:$16 sps:$4 sm:$0xff]  }
  0x14   :  { %1020 = vmatpush3.bf16.msra.mxu0 %v1157_v18  ;;  %v1203_v53 = vld [vmem:[%s1477_s0 + $0xac] ss:$16 sps:$4 sm:$0xff]   ;;  %v1205_v54 = vld [vmem:[%s1477_s0 + $0xa0] ss:$16 sps:$4 sm:$0xff]   ;;  %v1206_v55 = vld [vmem:[%s1477_s0 + $0xa8] ss:$16 sps:$4 sm:$0xff]  }
  0x15   :  { %1084 = vmatpush3.bf16.msra.mxu1 %v1158_v19  ;;  %1021 = vmatprep.subr.bf16.mxu0 %v1159_v20  ;;  %v1207_v56 = vld [vmem:[%s1477_s0 + $0xc4] ss:$16 sps:$4 sm:$0xff]   ;;  %v1209_v57 = vld [vmem:[%s1477_s0 + $0xcc] ss:$16 sps:$4 sm:$0xff]   ;;  %v1211_v58 = vld [vmem:[%s1477_s0 + $0xc0] ss:$16 sps:$4 sm:$0xff]  }
  0x16   :  { %1085 = vmatprep.subr.bf16.mxu1 %v1160_v21  ;;  %v1212_v59 = vld [vmem:[%s1477_s0 + $0xc8] ss:$16 sps:$4 sm:$0xff]   ;;  %v1213_v60 = vld [vmem:[%s1477_s0 + $0xe4] ss:$16 sps:$4 sm:$0xff]   ;;  %v1215_v61 = vld [vmem:[%s1477_s0 + $0xec] ss:$16 sps:$4 sm:$0xff]  }
  0x17   :  { %v1217_v62 = vld [vmem:[%s1477_s0 + $0xe0] ss:$16 sps:$4 sm:$0xff]   ;;  %v1218_v63 = vld [vmem:[%s1477_s0 + $0xe8] ss:$16 sps:$4 sm:$0xff]  }
  0x18   :  { %1022 = vmatpush3.bf16.msra.mxu0 %v1161_v22 }
  0x19   :  { %1086 = vmatpush3.bf16.msra.mxu1 %v1162_v23  ;;  %1023 = vmatprep.subr.bf16.mxu0 %v1163_v24 }
  0x1a   :  { %1087 = vmatprep.subr.bf16.mxu1 %v1164_v25 }
  0x1c   :  { %1024 = vmatpush3.bf16.msra.mxu0 %v1165_v26 }
  0x1d   :  { %1088 = vmatpush3.bf16.msra.mxu1 %v1166_v27  ;;  %1025 = vmatprep.subr.bf16.mxu0 %v1167_v28 }
  0x1e   :  { %1089 = vmatprep.subr.bf16.mxu1 %v1168_v29 }
  0x20   :  { %1026 = vmatpush3.bf16.msra.mxu0 %v1169_v30 }
  0x21   :  { %1090 = vmatpush3.bf16.msra.mxu1 %v1170_v31 }
  0x23   :  { %532 = vmatmul.mubr.bf16.vlgmr.msra.gmra.mrb[0].mxu0 %v1171_v32 }
  0x24   :  { %629 = vmatmul.mubr.bf16.vlgmr.msra.gmra.mrb[0].mxu1 %v1174_v34  ;;  %539 = vmatprep.mubr.bf16.mxu0 %v1177_v36 }
  0x25   :  { %636 = vmatprep.mubr.bf16.mxu1 %v1179_v37 }
  0x2b   :  { %540 = vmatmul.mubr.bf16.gmra.mrb[4].mxu0 %v1181_v38 }
  0x2c   :  { %637 = vmatmul.mubr.bf16.gmra.mrb[4].mxu1 %v1182_v39  ;;  %547 = vmatprep.mubr.bf16.mxu0 %v1183_v40 }
  0x2d   :  { %644 = vmatprep.mubr.bf16.mxu1 %v1185_v41 }
  0x33   :  { %548 = vmatmul.mubr.bf16.gmra.mrb[8].mxu0 %v1187_v42 }
  0x34   :  { %645 = vmatmul.mubr.bf16.gmra.mrb[8].mxu1 %v1188_v43  ;;  %555 = vmatprep.mubr.bf16.mxu0 %v1189_v44 }
  0x35   :  { %652 = vmatprep.mubr.bf16.mxu1 %v1191_v45 }
  0x3b   :  { %556 = vmatmul.mubr.bf16.gmra.mrb[12].mxu0 %v1193_v46 }
  0x3c   :  { %653 = vmatmul.mubr.bf16.gmra.mrb[12].mxu1 %v1194_v47  ;;  %563 = vmatprep.mubr.bf16.mxu0 %v1195_v48 }
  0x3d   :  { %660 = vmatprep.mubr.bf16.mxu1 %v1197_v49 }
  0x43   :  { %564 = vmatmul.mubr.bf16.gmra.mrb[16].mxu0 %v1199_v50 }
  0x44   :  { %661 = vmatmul.mubr.bf16.gmra.mrb[16].mxu1 %v1200_v51  ;;  %571 = vmatprep.mubr.bf16.mxu0 %v1201_v52 }
  0x45   :  { %668 = vmatprep.mubr.bf16.mxu1 %v1203_v53 }
  0x4b   :  { %572 = vmatmul.mubr.bf16.gmra.mrb[20].mxu0 %v1205_v54 }
  0x4c   :  { %669 = vmatmul.mubr.bf16.gmra.mrb[20].mxu1 %v1206_v55  ;;  %579 = vmatprep.mubr.bf16.mxu0 %v1207_v56 }
  0x4d   :  { %676 = vmatprep.mubr.bf16.mxu1 %v1209_v57 }
  0x53   :  { %580 = vmatmul.mubr.bf16.gmra.mrb[24].mxu0 %v1211_v58 }
  0x54   :  { %677 = vmatmul.mubr.bf16.gmra.mrb[24].mxu1 %v1212_v59  ;;  %587 = vmatprep.mubr.bf16.mxu0 %v1213_v60 }
  0x55   :  { %684 = vmatprep.mubr.bf16.mxu1 %v1215_v61 }
  0x5b   :  { %588 = vmatmul.mubr.bf16.gmra.mrb[28].mxu0 %v1217_v62 }
  0x5c   :  { %685 = vmatmul.mubr.bf16.gmra.mrb[28].mxu1 %v1218_v63 }
  0xf6   :  { %v1027_v0 = vpop.f32.mrb[0].mxu0 }
  0xf7   :  { %v1091_v1 = vpop.f32.mrb[0].mxu1  ;;  %v1028_v2 = vpop.f32.mrb[1].mxu0 }
  0xf8   :  { %v1029_v3 = vadd.f32 %v1028_v2, %v1027_v0  ;;  %v1092_v4 = vpop.f32.mrb[1].mxu1  ;;  %v1030_v5 = vpop.f32.mrb[2].mxu0 }
  0xf9   :  { %v1093_v6 = vadd.f32 %v1092_v4, %v1091_v1  ;;  %v1094_v7 = vpop.f32.mrb[2].mxu1  ;;  %v1031_v8 = vpop.f32.mrb[3].mxu0 }
  0xfa   :  { %v1032_v10 = vadd.f32 %v1031_v8, %v1030_v5  ;;  %v1095_v11 = vpop.f32.mrb[3].mxu1 }
  0xfb   :  { %v631_v12 = vadd.f32 %v1093_v6, %v1029_v3  ;;  %v1096_v13 = vadd.f32 %v1095_v11, %v1094_v7 }
  0xfd   :  { %v751_v14 = vadd.f32 %v1434_v9, %v631_v12  ;;  %v634_v15 = vadd.f32 %v1096_v13, %v1032_v10 }
  0xfe   :  { %v1033_v16 = vpop.f32.mrb[4].mxu0 }
  0xff   :  { %v752_v17 = vadd.f32 %v1434_v9, %v634_v15  ;;  %v1097_v18 = vpop.f32.mrb[4].mxu1  ;;  %v1034_v19 = vpop.f32.mrb[5].mxu0  ;;  %v767_v23 = vmax.f32 %v751_v14, 0.0 }
 0x100   :  { %v1035_v20 = vadd.f32 %v1034_v19, %v1033_v16  ;;  %v1098_v21 = vpop.f32.mrb[5].mxu1  ;;  %v1036_v22 = vpop.f32.mrb[6].mxu0 }
 0x101   :  { %v768_v24 = vmax.f32 %v752_v17, 0.0  ;;  %v1099_v25 = vadd.f32 %v1098_v21, %v1097_v18  ;;  %v1100_v26 = vpop.f32.mrb[6].mxu1  ;;  %v1037_v27 = vpop.f32.mrb[7].mxu0 }
 0x102   :  { %v1038_v28 = vadd.f32 %v1037_v27, %v1036_v22  ;;  %v1101_v29 = vpop.f32.mrb[7].mxu1 }
 0x103   :  { %v967_v30 = vpack.c.bf16 %v768_v24, %v767_v23  ;;  %v639_v31 = vadd.f32 %v1099_v25, %v1035_v20  ;;  %v1102_v32 = vadd.f32 %v1101_v29, %v1100_v26 }
 0x105   :  { %968 = vst [vmem:[%s1479_s3] sm:$0xff] %v967_v30   ;;  %v753_v33 = vadd.f32 %v1434_v9, %v639_v31  ;;  %v642_v34 = vadd.f32 %v1102_v32, %v1038_v28 }
 0x106   :  { %v1039_v35 = vpop.f32.mrb[8].mxu0 }
 0x107   :  { %v754_v36 = vadd.f32 %v1434_v9, %v642_v34  ;;  %v1103_v37 = vpop.f32.mrb[8].mxu1  ;;  %v1040_v38 = vpop.f32.mrb[9].mxu0  ;;  %v769_v42 = vmax.f32 %v753_v33, 0.0 }
 0x108   :  { %v1041_v39 = vadd.f32 %v1040_v38, %v1039_v35  ;;  %v1104_v40 = vpop.f32.mrb[9].mxu1  ;;  %v1042_v41 = vpop.f32.mrb[10].mxu0 }
 0x109   :  { %v770_v43 = vmax.f32 %v754_v36, 0.0  ;;  %v1105_v44 = vadd.f32 %v1104_v40, %v1103_v37  ;;  %v1106_v45 = vpop.f32.mrb[10].mxu1  ;;  %v1043_v46 = vpop.f32.mrb[11].mxu0 }
 0x10a   :  { %v1044_v47 = vadd.f32 %v1043_v46, %v1042_v41  ;;  %v1107_v48 = vpop.f32.mrb[11].mxu1 }
 0x10b   :  { %v972_v49 = vpack.c.bf16 %v770_v43, %v769_v42  ;;  %v647_v50 = vadd.f32 %v1105_v44, %v1041_v39  ;;  %v1108_v51 = vadd.f32 %v1107_v48, %v1106_v45 }
 0x10d   :  { %1004 = vst [vmem:[%s1479_s3 + $0x8] sm:$0xff] %v972_v49   ;;  %v755_v52 = vadd.f32 %v1434_v9, %v647_v50  ;;  %v650_v53 = vadd.f32 %v1108_v51, %v1044_v47 }
 0x10e   :  { %v1045_v54 = vpop.f32.mrb[12].mxu0 }
 0x10f   :  { %v756_v55 = vadd.f32 %v1434_v9, %v650_v53  ;;  %v1109_v56 = vpop.f32.mrb[12].mxu1  ;;  %v1046_v57 = vpop.f32.mrb[13].mxu0  ;;  %v771_v61 = vmax.f32 %v755_v52, 0.0 }
 0x110   :  { %v1047_v58 = vadd.f32 %v1046_v57, %v1045_v54  ;;  %v1110_v59 = vpop.f32.mrb[13].mxu1  ;;  %v1048_v60 = vpop.f32.mrb[14].mxu0 }
 0x111   :  { %v772_v62 = vmax.f32 %v756_v55, 0.0  ;;  %v1111_v63 = vadd.f32 %v1110_v59, %v1109_v56  ;;  %v1112_v0 = vpop.f32.mrb[14].mxu1  ;;  %v1049_v1 = vpop.f32.mrb[15].mxu0 }
 0x112   :  { %v1050_v2 = vadd.f32 %v1049_v1, %v1048_v60  ;;  %v1113_v3 = vpop.f32.mrb[15].mxu1 }
 0x113   :  { %v977_v4 = vpack.c.bf16 %v772_v62, %v771_v61  ;;  %v655_v5 = vadd.f32 %v1111_v63, %v1047_v58  ;;  %v1114_v6 = vadd.f32 %v1113_v3, %v1112_v0 }
 0x115   :  { %1005 = vst [vmem:[%s1479_s3 + $0x10] sm:$0xff] %v977_v4   ;;  %v757_v7 = vadd.f32 %v1434_v9, %v655_v5  ;;  %v658_v8 = vadd.f32 %v1114_v6, %v1050_v2 }
 0x116   :  { %v1051_v10 = vpop.f32.mrb[16].mxu0 }
 0x117   :  { %v758_v11 = vadd.f32 %v1434_v9, %v658_v8  ;;  %v1115_v12 = vpop.f32.mrb[16].mxu1  ;;  %v1052_v13 = vpop.f32.mrb[17].mxu0  ;;  %v773_v17 = vmax.f32 %v757_v7, 0.0 }
 0x118   :  { %v1053_v14 = vadd.f32 %v1052_v13, %v1051_v10  ;;  %v1116_v15 = vpop.f32.mrb[17].mxu1  ;;  %v1054_v16 = vpop.f32.mrb[18].mxu0 }
 0x119   :  { %v774_v18 = vmax.f32 %v758_v11, 0.0  ;;  %v1117_v19 = vadd.f32 %v1116_v15, %v1115_v12  ;;  %v1118_v20 = vpop.f32.mrb[18].mxu1  ;;  %v1055_v21 = vpop.f32.mrb[19].mxu0 }
 0x11a   :  { %v1056_v22 = vadd.f32 %v1055_v21, %v1054_v16  ;;  %v1119_v23 = vpop.f32.mrb[19].mxu1 }
 0x11b   :  { %v982_v24 = vpack.c.bf16 %v774_v18, %v773_v17  ;;  %v663_v25 = vadd.f32 %v1117_v19, %v1053_v14  ;;  %v1120_v26 = vadd.f32 %v1119_v23, %v1118_v20 }
 0x11d   :  { %1006 = vst [vmem:[%s1479_s3 + $0x18] sm:$0xff] %v982_v24   ;;  %v759_v27 = vadd.f32 %v1434_v9, %v663_v25  ;;  %v666_v28 = vadd.f32 %v1120_v26, %v1056_v22 }
 0x11e   :  { %v1057_v29 = vpop.f32.mrb[20].mxu0 }
 0x11f   :  { %v760_v30 = vadd.f32 %v1434_v9, %v666_v28  ;;  %v1121_v31 = vpop.f32.mrb[20].mxu1  ;;  %v1058_v32 = vpop.f32.mrb[21].mxu0  ;;  %v775_v36 = vmax.f32 %v759_v27, 0.0 }
 0x120   :  { %v1059_v33 = vadd.f32 %v1058_v32, %v1057_v29  ;;  %v1122_v34 = vpop.f32.mrb[21].mxu1  ;;  %v1060_v35 = vpop.f32.mrb[22].mxu0 }
 0x121   :  { %v776_v37 = vmax.f32 %v760_v30, 0.0  ;;  %v1123_v38 = vadd.f32 %v1122_v34, %v1121_v31  ;;  %v1124_v39 = vpop.f32.mrb[22].mxu1  ;;  %v1061_v40 = vpop.f32.mrb[23].mxu0 }
 0x122   :  { %v1062_v41 = vadd.f32 %v1061_v40, %v1060_v35  ;;  %v1125_v42 = vpop.f32.mrb[23].mxu1 }
 0x123   :  { %v987_v43 = vpack.c.bf16 %v776_v37, %v775_v36  ;;  %v671_v44 = vadd.f32 %v1123_v38, %v1059_v33  ;;  %v1126_v45 = vadd.f32 %v1125_v42, %v1124_v39 }
 0x125   :  { %1007 = vst [vmem:[%s1479_s3 + $0x20] sm:$0xff] %v987_v43   ;;  %v761_v46 = vadd.f32 %v1434_v9, %v671_v44  ;;  %v674_v47 = vadd.f32 %v1126_v45, %v1062_v41 }
 0x126   :  { %v1063_v48 = vpop.f32.mrb[24].mxu0 }
 0x127   :  { %v762_v49 = vadd.f32 %v1434_v9, %v674_v47  ;;  %v1127_v50 = vpop.f32.mrb[24].mxu1  ;;  %v1064_v51 = vpop.f32.mrb[25].mxu0  ;;  %v777_v55 = vmax.f32 %v761_v46, 0.0 }
 0x128   :  { %v1065_v52 = vadd.f32 %v1064_v51, %v1063_v48  ;;  %v1128_v53 = vpop.f32.mrb[25].mxu1  ;;  %v1066_v54 = vpop.f32.mrb[26].mxu0 }
 0x129   :  { %v778_v56 = vmax.f32 %v762_v49, 0.0  ;;  %v1129_v57 = vadd.f32 %v1128_v53, %v1127_v50  ;;  %v1130_v58 = vpop.f32.mrb[26].mxu1  ;;  %v1067_v59 = vpop.f32.mrb[27].mxu0 }
 0x12a   :  { %v1068_v60 = vadd.f32 %v1067_v59, %v1066_v54  ;;  %v1131_v61 = vpop.f32.mrb[27].mxu1 }
 0x12b   :  { %v992_v62 = vpack.c.bf16 %v778_v56, %v777_v55  ;;  %v679_v63 = vadd.f32 %v1129_v57, %v1065_v52  ;;  %v1132_v0 = vadd.f32 %v1131_v61, %v1130_v58 }
 0x12d   :  { %1008 = vst [vmem:[%s1479_s3 + $0x28] sm:$0xff] %v992_v62   ;;  %v763_v1 = vadd.f32 %v1434_v9, %v679_v63  ;;  %v682_v2 = vadd.f32 %v1132_v0, %v1068_v60 }
 0x12e   :  { %v1069_v3 = vpop.f32.mrb[28].mxu0 }
 0x12f   :  { %v764_v4 = vadd.f32 %v1434_v9, %v682_v2  ;;  %v1133_v5 = vpop.f32.mrb[28].mxu1  ;;  %v1070_v6 = vpop.f32.mrb[29].mxu0  ;;  %v779_v11 = vmax.f32 %v763_v1, 0.0 }
 0x130   :  { %v1071_v7 = vadd.f32 %v1070_v6, %v1069_v3  ;;  %v1134_v8 = vpop.f32.mrb[29].mxu1  ;;  %v1072_v10 = vpop.f32.mrb[30].mxu0 }
 0x131   :  { %v780_v12 = vmax.f32 %v764_v4, 0.0  ;;  %v1135_v13 = vadd.f32 %v1134_v8, %v1133_v5  ;;  %v1136_v14 = vpop.f32.mrb[30].mxu1  ;;  %v1073_v15 = vpop.f32.mrb[31].mxu0 }
 0x132   :  { %v1074_v16 = vadd.f32 %v1073_v15, %v1072_v10  ;;  %v1137_v17 = vpop.f32.mrb[31].mxu1 }
 0x133   :  { %v997_v18 = vpack.c.bf16 %v780_v12, %v779_v11  ;;  %v687_v19 = vadd.f32 %v1135_v13, %v1071_v7  ;;  %v1138_v20 = vadd.f32 %v1137_v17, %v1136_v14 }
 0x135   :  { %1009 = vst [vmem:[%s1479_s3 + $0x30] sm:$0xff] %v997_v18   ;;  %v765_v21 = vadd.f32 %v1434_v9, %v687_v19  ;;  %v690_v22 = vadd.f32 %v1138_v20, %v1074_v16 }
 0x137   :  { %v766_v23 = vadd.f32 %v1434_v9, %v690_v22  ;;  %v781_v24 = vmax.f32 %v765_v21, 0.0 }
 0x139   :  { %v782_v25 = vmax.f32 %v766_v23, 0.0 }
 0x13b   :  { %v1002_v26 = vpack.c.bf16 %v782_v25, %v781_v24 }
 0x13d   :  { %1010 = vst [vmem:[%s1479_s3 + $0x38] sm:$0xff] %v1002_v26  }

// kernel: pool_to_feature_vector.11
= control target key start
LH: loop header
LB: loop body
LE: loop exit
PB: predicated region body
PF: predicated region fallthrough
CT: control target
= control target key end

     0   :  { %s1190_s12 = smov 0   ;;  %s1192_s13 = smov 0   ;;  %s1322_s0 = inlined_call_operand.vmem [shape: bf16[128,1152], index: 0, kind: input, shape index: {}]   ;;  %s1323_s1 = inlined_call_operand.vmem [shape: bf16[1152,128], index: 1, kind: input, shape index: {}]   ;;  %s1324_s2 = inlined_call_operand.vmem [shape: f32[1,128], index: 2, kind: input, shape index: {}]   ;;  %s1325_s3 = inlined_call_operand.vmem [shape: bf16[128,128], index: 3, kind: output, shape index: {}]  }
   0x1   :  { %s1194_s14 = smov 0   ;;  %s1196_s15 = smov 0  }
   0x2   :  { %s1198_s16 = smov 0  }
   0x3 LB: > { %s25_s17 = sadd.s32 1, %s1163_s15  ;;  %p48_p1 = scmp.ne.s32.totalorder %s1155_s13, %s1151_s12  ;;  %s1167_s16 = sphi %s1198_s16, %s13_s16   ;;  %s1163_s15 = sphi %s1196_s15, %s1329_s15   ;;  %s1159_s14 = sphi %s1194_s14, %s1328_s14   ;;  %s1155_s13 = sphi %s1192_s13, %s1327_s13   ;;  %s1151_s12 = sphi %s1190_s12, %s1326_s12  }
   0x4   : > { %p26_p0 = scmp.ge.s32.totalorder %s25_s17, 9  ;;  %p49_p2 = scmp.eq.s32.totalorder %s1167_s16, 0 }
   0x5   : > { %s41_s19 = sadd.s32 1, %s1155_s13  ;;  %p899_p5 = scmp.ge.s32.totalorder %s1167_s16, 9 }
   0x6   : > { %s1331_s17 = smov (%p26_p0, %s25_s17), 0  ;;  %p50_p3 = por %p49_p2, %p48_p1 }
   0x7   : > { %s37_s18 = ssub.s32 %s1163_s15, %s1331_s17  ;;  %162 = sbr.rel (%p899_p5) target bundleno = 28 (0x1c), region = 20 }
   0x8   : > { %p39_p4 = scmp.eq.s32.totalorder %s37_s18, 0 }
   0xa   : > { %s1225_s20 = scalar_select %p39_p4, %s1155_s13, %s41_s19  }
   0xe   : > { %165 = sbr.rel (!%p50_p3) target bundleno = 28 (0x1c), region = 24  ;;  %s167_s21 = sand.u32 (%p50_p3), 1, %s1155_s13  }
   0xf   : > { %s901_s22 = sshll.u32 (%p50_p3), %s1163_s15, 2  ;;  %s900_s23 = sshll.u32 (%p50_p3), %s167_s21, 6 }
  0x10   : > { %s1233_s26 = scalar_lea.vmem (%p50_p3), %s1322_s0, %s901_s22  ;;  %s169_s27 = scalar_lea.vmem (%p50_p3), [#allocation3], %s900_s23 }
  0x11   : > { %v190_v0 = vld [vmem:[%s1233_s26] sm:$0xf] (%p50_p3)  ;;  %v192_v1 = vld [vmem:[%s1233_s26 + $0x24] sm:$0xf] (%p50_p3)  ;;  %v194_v2 = vld [vmem:[%s1233_s26 + $0x48] sm:$0xf] (%p50_p3) }
  0x12   : > { %191 = vst [vmem:[%s169_s27] sm:$0xf] (%p50_p3), %v190_v0  ;;  %193 = vst [vmem:[%s169_s27 + $0x4] sm:$0xf] (%p50_p3), %v192_v1  ;;  %v196_v3 = vld [vmem:[%s1233_s26 + $0x6c] sm:$0xf] (%p50_p3) }
  0x13   : > { %v198_v4 = vld [vmem:[%s1233_s26 + $0x90] sm:$0xf] (%p50_p3)  ;;  %195 = vst [vmem:[%s169_s27 + $0x8] sm:$0xf] (%p50_p3), %v194_v2  ;;  %197 = vst [vmem:[%s169_s27 + $0xc] sm:$0xf] (%p50_p3), %v196_v3 }
  0x14   : > { %199 = vst [vmem:[%s169_s27 + $0x10] sm:$0xf] (%p50_p3), %v198_v4  ;;  %v200_v5 = vld [vmem:[%s1233_s26 + $0xb4] sm:$0xf] (%p50_p3)  ;;  %v202_v6 = vld [vmem:[%s1233_s26 + $0xd8] sm:$0xf] (%p50_p3) }
  0x15   : > { %v204_v7 = vld [vmem:[%s1233_s26 + $0xfc] sm:$0xf]  ;;  %201 = vst [vmem:[%s169_s27 + $0x14] sm:$0xf] %v200_v5  ;;  %203 = vst [vmem:[%s169_s27 + $0x18] sm:$0xf] %v202_v6 }
  0x16   : > { %205 = vst [vmem:[%s169_s27 + $0x1c] sm:$0xf] %v204_v7  ;;  %v206_v8 = vld [vmem:[%s1233_s26 + $0x120] sm:$0xf]  ;;  %v208_v9 = vld [vmem:[%s1233_s26 + $0x144] sm:$0xf] }
  0x17   : > { %v210_v10 = vld [vmem:[%s1233_s26 + $0x168] sm:$0xf]  ;;  %207 = vst [vmem:[%s169_s27 + $0x20] sm:$0xf] %v206_v8  ;;  %209 = vst [vmem:[%s169_s27 + $0x24] sm:$0xf] %v208_v9 }
  0x18   : > { %211 = vst [vmem:[%s169_s27 + $0x28] sm:$0xf] %v210_v10  ;;  %v212_v11 = vld [vmem:[%s1233_s26 + $0x18c] sm:$0xf]  ;;  %v214_v12 = vld [vmem:[%s1233_s26 + $0x1b0] sm:$0xf] }
  0x19   : > { %v216_v13 = vld [vmem:[%s1233_s26 + $0x1d4] sm:$0xf]  ;;  %213 = vst [vmem:[%s169_s27 + $0x2c] sm:$0xf] %v212_v11  ;;  %215 = vst [vmem:[%s169_s27 + $0x30] sm:$0xf] %v214_v12 }
  0x1a   : > { %217 = vst [vmem:[%s169_s27 + $0x34] sm:$0xf] %v216_v13  ;;  %v218_v14 = vld [vmem:[%s1233_s26 + $0x1f8] sm:$0xf]  ;;  %v220_v15 = vld [vmem:[%s1233_s26 + $0x21c] sm:$0xf] }
  0x1b   : > { %219 = vst [vmem:[%s169_s27 + $0x38] sm:$0xf] %v218_v14  ;;  %221 = vst [vmem:[%s169_s27 + $0x3c] sm:$0xf] %v220_v15 }
  0x1c PF: > { %p902_p6 = scmp.ge.s32.totalorder %s1167_s16, 1  ;;  %p287_p7 = scmp.lt.s32.totalorder %s1167_s16, 10 }
  0x1e   : > { %p288_p8 = pnand %p902_p6, %p287_p7 }
  0x1f   : > { %s294_s28 = sand.u32 (!%p288_p8), 1, %s1151_s12   ;;  %s904_s29 = sshll.u32 (!%p288_p8), %s1159_s14, 4 }
  0x20   : > { %291 = sbr.rel (%p288_p8) target bundleno = 323 (0x143), region = 69  ;;  %s903_s30 = sshll.u32 (!%p288_p8), %s294_s28, 6 }
  0x21   : > { %p333_p9 = scmp.lt.s32.totalorder (!%p288_p8), %s904_s29, 143  ;;  %s1260_s8 = scalar_lea.vmem (!%p288_p8), [#allocation3], %s903_s30 }
  0x22   : > { %p906_p10 = scmp.ne.s32.totalorder (!%p288_p8), %s1159_s14, 0 }
  0x27   : > { %s1333_s29 = smov (!%p333_p9, %s904_s29), 143  ;;  %357 = sbr.rel (%p906_p10) target bundleno = 49 (0x31), region = 77 }
  0x28   : > { %s905_s4 = sshll.u32 %s1333_s29, 2  ;;  %v1169_v16 = vmov (!%p906_p10), 0.0  }
  0x29   : > { %s1258_s7 = scalar_lea.vmem %s1323_s1, %s905_s4  ;;  %358 = vst [vmem:[#allocation2] sm:$0xff] (!%p906_p10), %v1169_v16  ;;  %359 = vst [vmem:[#allocation2 + $0x8] sm:$0xff] (!%p906_p10), %v1169_v16 }
  0x2a   : > { %360 = vst [vmem:[#allocation2 + $0x10] sm:$0xff] (!%p906_p10), %v1169_v16  ;;  %361 = vst [vmem:[#allocation2 + $0x18] sm:$0xff] (!%p906_p10), %v1169_v16 }
  0x2b   : > { %362 = vst [vmem:[#allocation2 + $0x20] sm:$0xff] (!%p906_p10), %v1169_v16  ;;  %363 = vst [vmem:[#allocation2 + $0x28] sm:$0xff] (!%p906_p10), %v1169_v16 }
  0x2c   : > { %364 = vst [vmem:[#allocation2 + $0x30] sm:$0xff] (!%p906_p10), %v1169_v16  ;;  %365 = vst [vmem:[#allocation2 + $0x38] sm:$0xff] (!%p906_p10), %v1169_v16 }
  0x2d   : > { %366 = vst [vmem:[#allocation2 + $0x40] sm:$0xff] (!%p906_p10), %v1169_v16  ;;  %367 = vst [vmem:[#allocation2 + $0x48] sm:$0xff] (!%p906_p10), %v1169_v16 }
  0x2e   : > { %368 = vst [vmem:[#allocation2 + $0x50] sm:$0xff] %v1169_v16  ;;  %369 = vst [vmem:[#allocation2 + $0x58] sm:$0xff] %v1169_v16 }
  0x2f   : > { %370 = vst [vmem:[#allocation2 + $0x60] sm:$0xff] %v1169_v16  ;;  %371 = vst [vmem:[#allocation2 + $0x68] sm:$0xff] %v1169_v16 }
  0x30   : > { %372 = vst [vmem:[#allocation2 + $0x70] sm:$0xff] %v1169_v16  ;;  %373 = vst [vmem:[#allocation2 + $0x78] sm:$0xff] %v1169_v16 }
  0x31 PF: > { %v1113_v17 = vld [vmem:[%s1258_s7] sm:$0xff]   ;;  %v1114_v18 = vld [vmem:[%s1258_s7 + $0x8] sm:$0xff]   ;;  %v1115_v19 = vld [vmem:[%s1258_s7 + $0x10] sm:$0xff]   ;;  %p923_p11 = scmp.ne.s32.totalorder %s1159_s14, 8 }
  0x32   : > { %1024 = vmatprep.subr.bf16.mxu0 %v1113_v17  ;;  %1056 = vmatprep.subr.bf16.mxu1 %v1113_v17  ;;  %v1116_v20 = vld [vmem:[%s1258_s7 + $0x18] sm:$0xff]   ;;  %v1121_v21 = vld [vmem:[%s1260_s8] sm:$0xff]   ;;  %v1118_v24 = vld [vmem:[%s1258_s7 + $0x28] sm:$0xff]  }
  0x33   : > { %1025 = vmatpush3.bf16.msra.mxu0 %v1113_v17  ;;  %1064 = vmatpush3.bf16.msra.mxu1 %v1113_v17  ;;  %v1122_v22 = vld [vmem:[%s1260_s8 + $0x20] sm:$0xff]   ;;  %v1119_v25 = vld [vmem:[%s1258_s7 + $0x30] sm:$0xff]   ;;  %v1120_v26 = vld [vmem:[%s1258_s7 + $0x38] sm:$0xff]  }
  0x34   : > { %1026 = vmatprep.subr.bf16.mxu0 %v1114_v18  ;;  %1057 = vmatprep.subr.bf16.mxu1 %v1114_v18  ;;  %v1117_v23 = vld [vmem:[%s1258_s7 + $0x20] sm:$0xff]   ;;  %v1123_v27 = vld [vmem:[%s1260_s8 + $0x8] sm:$0xff]   ;;  %v1125_v29 = vld [vmem:[%s1260_s8 + $0x10] sm:$0xff]  }
  0x35   : > { %1040 = vmatprep.mubr.bf16.mxu0 %v1121_v21  ;;  %1048 = vmatprep.mubr.bf16.mxu1 %v1122_v22  ;;  %v1124_v28 = vld [vmem:[%s1260_s8 + $0x28] sm:$0xff]   ;;  %v1126_v30 = vld [vmem:[%s1260_s8 + $0x30] sm:$0xff]   ;;  %v1127_v31 = vld [vmem:[%s1260_s8 + $0x18] sm:$0xff]  }
  0x36   : > { %v1128_v32 = vld [vmem:[%s1260_s8 + $0x38] sm:$0xff]   ;;  %v376_v33 = vld [vmem:[#allocation2 + $0x10] sm:$0xff]  ;;  %v374_v35 = vld [vmem:[#allocation2] sm:$0xff] }
  0x37   : > { %1027 = vmatpush3.bf16.msra.mxu0 %v1114_v18  ;;  %1065 = vmatpush3.bf16.msra.mxu1 %v1114_v18  ;;  %v384_v34 = vld [vmem:[#allocation2 + $0x50] sm:$0xff]  ;;  %v382_v36 = vld [vmem:[#allocation2 + $0x40] sm:$0xff]  ;;  %v377_v39 = vld [vmem:[#allocation2 + $0x18] sm:$0xff] }
  0x38   : > { %1028 = vmatprep.subr.bf16.mxu0 %v1115_v19  ;;  %1058 = vmatprep.subr.bf16.mxu1 %v1115_v19  ;;  %v385_v40 = vld [vmem:[#allocation2 + $0x58] sm:$0xff]  ;;  %v375_v45 = vld [vmem:[#allocation2 + $0x8] sm:$0xff]  ;;  %v380_v57 = vld [vmem:[#allocation2 + $0x30] sm:$0xff] }
  0x39   : > { %v383_v46 = vld [vmem:[#allocation2 + $0x48] sm:$0xff]  ;;  %v388_v58 = vld [vmem:[#allocation2 + $0x70] sm:$0xff]  ;;  %v378_v59 = vld [vmem:[#allocation2 + $0x20] sm:$0xff] }
  0x3a   : > { %v386_v60 = vld [vmem:[#allocation2 + $0x60] sm:$0xff]  ;;  %v381_v63 = vld [vmem:[#allocation2 + $0x38] sm:$0xff]  ;;  %v379_v5 = vld [vmem:[#allocation2 + $0x28] sm:$0xff] }
  0x3b   : > { %1029 = vmatpush3.bf16.msra.mxu0 %v1115_v19  ;;  %1066 = vmatpush3.bf16.msra.mxu1 %v1115_v19  ;;  %v389_v0 = vld [vmem:[#allocation2 + $0x78] sm:$0xff]  ;;  %v387_v6 = vld [vmem:[#allocation2 + $0x68] sm:$0xff]  ;;  %v924_v19 = vld [vmem:[%s1324_s2] ss:$0 sm:$0xff] (!%p923_p11) }
  0x3c   : > { %1030 = vmatprep.subr.bf16.mxu0 %v1116_v20  ;;  %1059 = vmatprep.subr.bf16.mxu1 %v1116_v20 }
  0x3f   : > { %1031 = vmatpush3.bf16.msra.mxu0 %v1116_v20  ;;  %1067 = vmatpush3.bf16.msra.mxu1 %v1116_v20 }
  0x40   : > { %1032 = vmatprep.subr.bf16.mxu0 %v1117_v23  ;;  %1060 = vmatprep.subr.bf16.mxu1 %v1117_v23 }
  0x43   : > { %1033 = vmatpush3.bf16.msra.mxu0 %v1117_v23  ;;  %1068 = vmatpush3.bf16.msra.mxu1 %v1117_v23 }
  0x44   : > { %1034 = vmatprep.subr.bf16.mxu0 %v1118_v24  ;;  %1061 = vmatprep.subr.bf16.mxu1 %v1118_v24 }
  0x47   : > { %1035 = vmatpush3.bf16.msra.mxu0 %v1118_v24  ;;  %1069 = vmatpush3.bf16.msra.mxu1 %v1118_v24 }
  0x48   : > { %1036 = vmatprep.subr.bf16.mxu0 %v1119_v25  ;;  %1062 = vmatprep.subr.bf16.mxu1 %v1119_v25 }
  0x4b   : > { %1037 = vmatpush3.bf16.msra.mxu0 %v1119_v25  ;;  %1070 = vmatpush3.bf16.msra.mxu1 %v1119_v25 }
  0x4c   : > { %1038 = vmatprep.subr.bf16.mxu0 %v1120_v26  ;;  %1063 = vmatprep.subr.bf16.mxu1 %v1120_v26 }
  0x4f   : > { %1039 = vmatpush3.bf16.msra.mxu0 %v1120_v26  ;;  %1071 = vmatpush3.bf16.msra.mxu1 %v1120_v26 }
  0x52   : > { %1041 = vmatmul.mubr.bf16.vlgmr.msra.gmra.mrb[0].mxu0 %v1123_v27  ;;  %1049 = vmatmul.mubr.bf16.vlgmr.msra.gmra.mrb[0].mxu1 %v1124_v28 }
  0x53   : > { %1044 = vmatprep.mubr.bf16.mxu0 %v1125_v29  ;;  %1052 = vmatprep.mubr.bf16.mxu1 %v1126_v30 }
  0x5a   : > { %1045 = vmatmul.mubr.bf16.gmra.mrb[4].mxu0 %v1127_v31  ;;  %1053 = vmatmul.mubr.bf16.gmra.mrb[4].mxu1 %v1128_v32 }
 0x125   : > { %v1042_v37 = vpop.f32.mrb[0].mxu0  ;;  %v1050_v38 = vpop.f32.mrb[0].mxu1 }
 0x126   : > { %v617_v41 = vadd.f32 %v1042_v37, %v376_v33  ;;  %v625_v42 = vadd.f32 %v1050_v38, %v384_v34  ;;  %v552_v43 = vpop.f32.mrb[1].mxu0  ;;  %v584_v44 = vpop.f32.mrb[1].mxu1 }
 0x127   : > { %v615_v47 = vadd.f32 %v552_v43, %v374_v35  ;;  %v623_v48 = vadd.f32 %v584_v44, %v382_v36  ;;  %v1043_v49 = vpop.f32.mrb[2].mxu0  ;;  %v1051_v50 = vpop.f32.mrb[2].mxu1 }
 0x128   : > { %633 = vst [vmem:[#allocation2 + $0x10] sm:$0xff] %v617_v41  ;;  %641 = vst [vmem:[#allocation2 + $0x50] sm:$0xff] %v625_v42  ;;  %v618_v51 = vadd.f32 %v1043_v49, %v377_v39  ;;  %v626_v52 = vadd.f32 %v1051_v50, %v385_v40  ;;  %v555_v53 = vpop.f32.mrb[3].mxu0  ;;  %v587_v54 = vpop.f32.mrb[3].mxu1 }
 0x129   : > { %631 = vst [vmem:[#allocation2] sm:$0xff] %v615_v47  ;;  %639 = vst [vmem:[#allocation2 + $0x40] sm:$0xff] %v623_v48  ;;  %v616_v55 = vadd.f32 %v555_v53, %v375_v45  ;;  %v624_v56 = vadd.f32 %v587_v54, %v383_v46 }
 0x12a   : > { %634 = vst [vmem:[#allocation2 + $0x18] sm:$0xff] %v618_v51  ;;  %642 = vst [vmem:[#allocation2 + $0x58] sm:$0xff] %v626_v52 }
 0x12b   : > { %632 = vst [vmem:[#allocation2 + $0x8] sm:$0xff] %v616_v55  ;;  %640 = vst [vmem:[#allocation2 + $0x48] sm:$0xff] %v624_v56 }
 0x12d   : > { %v1046_v61 = vpop.f32.mrb[4].mxu0  ;;  %v1054_v62 = vpop.f32.mrb[4].mxu1  ;;  %650 = sbr.rel (%p923_p11) target bundleno = 323 (0x143), region = 81 }
 0x12e   : > { %v621_v1 = vadd.f32 %v1046_v61, %v380_v57  ;;  %v629_v2 = vadd.f32 %v1054_v62, %v388_v58  ;;  %v568_v3 = vpop.f32.mrb[5].mxu0  ;;  %v600_v4 = vpop.f32.mrb[5].mxu1 }
 0x12f   : > { %v619_v7 = vadd.f32 %v568_v3, %v378_v59  ;;  %v627_v8 = vadd.f32 %v600_v4, %v386_v60  ;;  %v1047_v9 = vpop.f32.mrb[6].mxu0  ;;  %v1055_v10 = vpop.f32.mrb[6].mxu1  ;;  %v653_v22 = vld [vmem:[#allocation2 + $0x10] sm:$0xff] (!%p923_p11) }
 0x130   : > { %637 = vst [vmem:[#allocation2 + $0x30] sm:$0xff] %v621_v1  ;;  %645 = vst [vmem:[#allocation2 + $0x70] sm:$0xff] %v629_v2  ;;  %v622_v11 = vadd.f32 %v1047_v9, %v381_v63  ;;  %v630_v12 = vadd.f32 %v1055_v10, %v389_v0  ;;  %v571_v13 = vpop.f32.mrb[7].mxu0  ;;  %v603_v14 = vpop.f32.mrb[7].mxu1  ;;  %v651_v17 = vld [vmem:[#allocation2] sm:$0xff] (!%p923_p11)  ;;  %v676_v25 = vadd.f32 (!%p923_p11), %v924_v19, %v653_v22  ;;  %v661_v37 = vld [vmem:[#allocation2 + $0x50] sm:$0xff] (!%p923_p11) }
 0x131   : > { %635 = vst [vmem:[#allocation2 + $0x20] sm:$0xff] %v619_v7  ;;  %643 = vst [vmem:[#allocation2 + $0x60] sm:$0xff] %v627_v8  ;;  %v620_v15 = vadd.f32 %v571_v13, %v379_v5  ;;  %v628_v16 = vadd.f32 %v603_v14, %v387_v6  ;;  %v674_v20 = vadd.f32 (!%p923_p11), %v924_v19, %v651_v17  ;;  %v654_v23 = vld [vmem:[#allocation2 + $0x18] sm:$0xff] (!%p923_p11)  ;;  %v659_v35 = vld [vmem:[#allocation2 + $0x40] sm:$0xff] (!%p923_p11) }
 0x132   : > { %638 = vst [vmem:[#allocation2 + $0x38] sm:$0xff] %v622_v11  ;;  %646 = vst [vmem:[#allocation2 + $0x78] sm:$0xff] %v630_v12  ;;  %v652_v18 = vld [vmem:[#allocation2 + $0x8] sm:$0xff] (!%p923_p11)  ;;  %v677_v26 = vadd.f32 (!%p923_p11), %v924_v19, %v654_v23  ;;  %v692_v38 = vmax.f32 (!%p923_p11), %v676_v25, 0.0  ;;  %v662_v42 = vld [vmem:[#allocation2 + $0x58] sm:$0xff] (!%p923_p11)  ;;  %v682_v47 = vadd.f32 (!%p923_p11), %v924_v19, %v659_v35  ;;  %v684_v52 = vadd.f32 (!%p923_p11), %v924_v19, %v661_v37 }
 0x133   : > { %636 = vst [vmem:[#allocation2 + $0x28] sm:$0xff] %v620_v15  ;;  %644 = vst [vmem:[#allocation2 + $0x68] sm:$0xff] %v628_v16  ;;  %v675_v21 = vadd.f32 (!%p923_p11), %v924_v19, %v652_v18  ;;  %v690_v31 = vmax.f32 (!%p923_p11), %v674_v20, 0.0  ;;  %v660_v36 = vld [vmem:[#allocation2 + $0x48] sm:$0xff] (!%p923_p11)  ;;  %v685_v57 = vadd.f32 (!%p923_p11), %v924_v19, %v662_v42 }
 0x134   : > { %v693_v39 = vmax.f32 %v677_v26, 0.0  ;;  %v683_v51 = vadd.f32 %v924_v19, %v660_v36  ;;  %v698_v56 = vmax.f32 %v682_v47, 0.0  ;;  %v700_v61 = vmax.f32 %v684_v52, 0.0 }
 0x135   : > { %v691_v32 = vmax.f32 %v675_v21, 0.0  ;;  %v701_v63 = vmax.f32 %v685_v57, 0.0 }
 0x136   : > { %v969_v49 = vpack.c.bf16 %v693_v39, %v692_v38  ;;  %v699_v60 = vmax.f32 %v683_v51, 0.0 }
 0x137   : > { %v657_v29 = vld [vmem:[#allocation2 + $0x30] sm:$0xff]  ;;  %v964_v44 = vpack.c.bf16 %v691_v32, %v690_v31  ;;  %v989_v5 = vpack.c.bf16 %v701_v63, %v700_v61 }
 0x138   : > { %v655_v24 = vld [vmem:[#allocation2 + $0x20] sm:$0xff]  ;;  %v680_v34 = vadd.f32 %v924_v19, %v657_v29  ;;  %v665_v53 = vld [vmem:[#allocation2 + $0x70] sm:$0xff]  ;;  %1001 = vst [vmem:[%s1325_s3 + $0x8] sm:$0xff] %v969_v49   ;;  %v984_v3 = vpack.c.bf16 %v699_v60, %v698_v56 }
 0x139   : > { %v678_v28 = vadd.f32 %v924_v19, %v655_v24  ;;  %v658_v30 = vld [vmem:[#allocation2 + $0x38] sm:$0xff]  ;;  %v663_v43 = vld [vmem:[#allocation2 + $0x60] sm:$0xff]  ;;  %965 = vst [vmem:[%s1325_s3] sm:$0xff] %v964_v44   ;;  %v688_v1 = vadd.f32 %v924_v19, %v665_v53  ;;  %1005 = vst [vmem:[%s1325_s3 + $0x28] sm:$0xff] %v989_v5  }
 0x13a   : > { %v656_v27 = vld [vmem:[#allocation2 + $0x28] sm:$0xff]  ;;  %v681_v41 = vadd.f32 %v924_v19, %v658_v30  ;;  %v696_v46 = vmax.f32 %v680_v34, 0.0  ;;  %v666_v54 = vld [vmem:[#allocation2 + $0x78] sm:$0xff]  ;;  %v686_v58 = vadd.f32 %v924_v19, %v663_v43  ;;  %1004 = vst [vmem:[%s1325_s3 + $0x20] sm:$0xff] %v984_v3  }
 0x13b   : > { %v679_v33 = vadd.f32 %v924_v19, %v656_v27  ;;  %v694_v40 = vmax.f32 %v678_v28, 0.0  ;;  %v664_v48 = vld [vmem:[#allocation2 + $0x68] sm:$0xff]  ;;  %v689_v2 = vadd.f32 %v924_v19, %v666_v54  ;;  %v704_v6 = vmax.f32 %v688_v1, 0.0 }
 0x13c   : > { %v697_v50 = vmax.f32 %v681_v41, 0.0  ;;  %v687_v62 = vadd.f32 %v924_v19, %v664_v48  ;;  %v702_v0 = vmax.f32 %v686_v58, 0.0 }
 0x13d   : > { %v695_v45 = vmax.f32 %v679_v33, 0.0  ;;  %v705_v7 = vmax.f32 %v689_v2, 0.0 }
 0x13e   : > { %v979_v59 = vpack.c.bf16 %v697_v50, %v696_v46  ;;  %v703_v4 = vmax.f32 %v687_v62, 0.0 }
 0x13f   : > { %v974_v55 = vpack.c.bf16 %v695_v45, %v694_v40  ;;  %v999_v9 = vpack.c.bf16 %v705_v7, %v704_v6 }
 0x140   : > { %1003 = vst [vmem:[%s1325_s3 + $0x18] sm:$0xff] %v979_v59   ;;  %v994_v8 = vpack.c.bf16 %v703_v4, %v702_v0 }
 0x141   : > { %1002 = vst [vmem:[%s1325_s3 + $0x10] sm:$0xff] %v974_v55   ;;  %1007 = vst [vmem:[%s1325_s3 + $0x38] sm:$0xff] %v999_v9  }
 0x142   : > { %1006 = vst [vmem:[%s1325_s3 + $0x30] sm:$0xff] %v994_v8  }
 0x143 PF: > { %s13_s16 = sadd.s32 1, %s1167_s16   ;;  %s1326_s12 = smov %s1155_s13 }
 0x144   : > { %p10_p12 = scmp.ge.s32.totalorder %s13_s16, 11   ;;  %s1327_s13 = smov %s1225_s20 }
 0x145   : > { %s1328_s14 = smov %s1163_s15  ;;  %s1329_s15 = smov %s1331_s17 }
 0x146   :  { %12 = sbr.rel (!%p10_p12) target bundleno = 3 (0x3), region = 122 }

// kernel: pool_to_feature_vector.12
= control target key start
LH: loop header
LB: loop body
LE: loop exit
PB: predicated region body
PF: predicated region fallthrough
CT: control target
= control target key end

     0   :  { %s1960_s12 = smov 0   ;;  %s1962_s13 = smov 0   ;;  %s2340_s0 = inlined_call_operand.vmem [shape: bf16[128,384], index: 0, kind: input, shape index: {}]   ;;  %s2341_s1 = inlined_call_operand.vmem [shape: bf16[384,512], index: 1, kind: input, shape index: {}]   ;;  %s2342_s2 = inlined_call_operand.vmem [shape: f32[1,512], index: 2, kind: input, shape index: {}]   ;;  %s2343_s3 = inlined_call_operand.vmem [shape: bf16[128,512], index: 3, kind: output, shape index: {}]  }
   0x1   :  { %s1964_s14 = smov 0   ;;  %s1966_s15 = smov 0  }
   0x2   :  { %s1968_s16 = smov 0  }
   0x3 LB: > { %s25_s17 = sadd.s32 1, %s1932_s15  ;;  %p48_p1 = scmp.ne.s32.totalorder %s1924_s13, %s1920_s12  ;;  %s1936_s16 = sphi %s1968_s16, %s13_s16   ;;  %s1932_s15 = sphi %s1966_s15, %s2347_s15   ;;  %s1928_s14 = sphi %s1964_s14, %s2346_s14   ;;  %s1924_s13 = sphi %s1962_s13, %s2345_s13   ;;  %s1920_s12 = sphi %s1960_s12, %s2344_s12  }
   0x4   : > { %p26_p0 = scmp.ge.s32.totalorder %s25_s17, 3  ;;  %p49_p2 = scmp.eq.s32.totalorder %s1936_s16, 0 }
   0x5   : > { %s41_s19 = sadd.s32 1, %s1924_s13  ;;  %p1681_p5 = scmp.ge.s32.totalorder %s1936_s16, 3 }
   0x6   : > { %s2349_s17 = smov (%p26_p0, %s25_s17), 0  ;;  %p50_p3 = por %p49_p2, %p48_p1 }
   0x7   : > { %s37_s18 = ssub.s32 %s1932_s15, %s2349_s17  ;;  %164 = sbr.rel (%p1681_p5) target bundleno = 28 (0x1c), region = 20 }
   0x8   : > { %p39_p4 = scmp.eq.s32.totalorder %s37_s18, 0 }
   0xa   : > { %s1995_s20 = scalar_select %p39_p4, %s1924_s13, %s41_s19  }
   0xe   : > { %167 = sbr.rel (!%p50_p3) target bundleno = 28 (0x1c), region = 24  ;;  %s169_s21 = sand.u32 (%p50_p3), 1, %s1924_s13  }
   0xf   : > { %s1683_s22 = sshll.u32 (%p50_p3), %s1932_s15, 2  ;;  %s1682_s23 = sshll.u32 (%p50_p3), %s169_s21, 6 }
  0x10   : > { %s2003_s26 = scalar_lea.vmem (%p50_p3), %s2340_s0, %s1683_s22  ;;  %s171_s27 = scalar_lea.vmem (%p50_p3), [#allocation3], %s1682_s23 }
  0x11   : > { %v192_v0 = vld [vmem:[%s2003_s26] sm:$0xf] (%p50_p3)  ;;  %v194_v1 = vld [vmem:[%s2003_s26 + $0xc] sm:$0xf] (%p50_p3)  ;;  %v196_v2 = vld [vmem:[%s2003_s26 + $0x18] sm:$0xf] (%p50_p3) }
  0x12   : > { %193 = vst [vmem:[%s171_s27] sm:$0xf] (%p50_p3), %v192_v0  ;;  %195 = vst [vmem:[%s171_s27 + $0x4] sm:$0xf] (%p50_p3), %v194_v1  ;;  %v198_v3 = vld [vmem:[%s2003_s26 + $0x24] sm:$0xf] (%p50_p3) }
  0x13   : > { %v200_v4 = vld [vmem:[%s2003_s26 + $0x30] sm:$0xf] (%p50_p3)  ;;  %197 = vst [vmem:[%s171_s27 + $0x8] sm:$0xf] (%p50_p3), %v196_v2  ;;  %199 = vst [vmem:[%s171_s27 + $0xc] sm:$0xf] (%p50_p3), %v198_v3 }
  0x14   : > { %201 = vst [vmem:[%s171_s27 + $0x10] sm:$0xf] (%p50_p3), %v200_v4  ;;  %v202_v5 = vld [vmem:[%s2003_s26 + $0x3c] sm:$0xf] (%p50_p3)  ;;  %v204_v6 = vld [vmem:[%s2003_s26 + $0x48] sm:$0xf] (%p50_p3) }
  0x15   : > { %v206_v7 = vld [vmem:[%s2003_s26 + $0x54] sm:$0xf]  ;;  %203 = vst [vmem:[%s171_s27 + $0x14] sm:$0xf] %v202_v5  ;;  %205 = vst [vmem:[%s171_s27 + $0x18] sm:$0xf] %v204_v6 }
  0x16   : > { %207 = vst [vmem:[%s171_s27 + $0x1c] sm:$0xf] %v206_v7  ;;  %v208_v8 = vld [vmem:[%s2003_s26 + $0x60] sm:$0xf]  ;;  %v210_v9 = vld [vmem:[%s2003_s26 + $0x6c] sm:$0xf] }
  0x17   : > { %v212_v10 = vld [vmem:[%s2003_s26 + $0x78] sm:$0xf]  ;;  %209 = vst [vmem:[%s171_s27 + $0x20] sm:$0xf] %v208_v8  ;;  %211 = vst [vmem:[%s171_s27 + $0x24] sm:$0xf] %v210_v9 }
  0x18   : > { %213 = vst [vmem:[%s171_s27 + $0x28] sm:$0xf] %v212_v10  ;;  %v214_v11 = vld [vmem:[%s2003_s26 + $0x84] sm:$0xf]  ;;  %v216_v12 = vld [vmem:[%s2003_s26 + $0x90] sm:$0xf] }
  0x19   : > { %v218_v13 = vld [vmem:[%s2003_s26 + $0x9c] sm:$0xf]  ;;  %215 = vst [vmem:[%s171_s27 + $0x2c] sm:$0xf] %v214_v11  ;;  %217 = vst [vmem:[%s171_s27 + $0x30] sm:$0xf] %v216_v12 }
  0x1a   : > { %219 = vst [vmem:[%s171_s27 + $0x34] sm:$0xf] %v218_v13  ;;  %v220_v14 = vld [vmem:[%s2003_s26 + $0xa8] sm:$0xf]  ;;  %v222_v15 = vld [vmem:[%s2003_s26 + $0xb4] sm:$0xf] }
  0x1b   : > { %221 = vst [vmem:[%s171_s27 + $0x38] sm:$0xf] %v220_v14  ;;  %223 = vst [vmem:[%s171_s27 + $0x3c] sm:$0xf] %v222_v15 }
  0x1c PF: > { %p1684_p6 = scmp.ge.s32.totalorder %s1936_s16, 1  ;;  %p292_p7 = scmp.lt.s32.totalorder %s1936_s16, 4 }
  0x1e   : > { %p293_p8 = pnand %p1684_p6, %p292_p7 }
  0x1f   : > { %s299_s28 = sand.u32 (!%p293_p8), 1, %s1920_s12   ;;  %s1686_s29 = sshll.u32 (!%p293_p8), %s1928_s14, 4 }
  0x20   : > { %296 = sbr.rel (%p293_p8) target bundleno = 417 (0x1a1), region = 69  ;;  %s1685_s30 = sshll.u32 (!%p293_p8), %s299_s28, 6 }
  0x21   : > { %p344_p9 = scmp.lt.s32.totalorder (!%p293_p8), %s1686_s29, 47  ;;  %s2030_s8 = scalar_lea.vmem (!%p293_p8), [#allocation3], %s1685_s30 }
  0x22   : > { %p1689_p10 = scmp.ne.s32.totalorder (!%p293_p8), %s1928_s14, 0 }
  0x27   : > { %s2351_s29 = smov (!%p344_p9, %s1686_s29), 47  ;;  %375 = sbr.rel (%p1689_p10) target bundleno = 73 (0x49), region = 77 }
  0x28   : > { %s1767_s4 = sshll.u32 %s2351_s29, 4  ;;  %v1938_v16 = vmov (!%p1689_p10), 0.0  }
  0x29   : > { %s2028_s7 = scalar_lea.vmem %s2341_s1, %s1767_s4  ;;  %376 = vst [vmem:[#allocation2] sm:$0xff] (!%p1689_p10), %v1938_v16  ;;  %377 = vst [vmem:[#allocation2 + $0x8] sm:$0xff] (!%p1689_p10), %v1938_v16 }
  0x2a   : > { %378 = vst [vmem:[#allocation2 + $0x10] sm:$0xff] (!%p1689_p10), %v1938_v16  ;;  %379 = vst [vmem:[#allocation2 + $0x18] sm:$0xff] (!%p1689_p10), %v1938_v16 }
  0x2b   : > { %380 = vst [vmem:[#allocation2 + $0x20] sm:$0xff] (!%p1689_p10), %v1938_v16  ;;  %381 = vst [vmem:[#allocation2 + $0x28] sm:$0xff] (!%p1689_p10), %v1938_v16 }
  0x2c   : > { %382 = vst [vmem:[#allocation2 + $0x30] sm:$0xff] (!%p1689_p10), %v1938_v16  ;;  %383 = vst [vmem:[#allocation2 + $0x38] sm:$0xff] (!%p1689_p10), %v1938_v16 }
  0x2d   : > { %384 = vst [vmem:[#allocation2 + $0x40] sm:$0xff] (!%p1689_p10), %v1938_v16  ;;  %385 = vst [vmem:[#allocation2 + $0x48] sm:$0xff] (!%p1689_p10), %v1938_v16 }
  0x2e   : > { %386 = vst [vmem:[#allocation2 + $0x50] sm:$0xff] %v1938_v16  ;;  %387 = vst [vmem:[#allocation2 + $0x58] sm:$0xff] %v1938_v16 }
  0x2f   : > { %388 = vst [vmem:[#allocation2 + $0x60] sm:$0xff] %v1938_v16  ;;  %389 = vst [vmem:[#allocation2 + $0x68] sm:$0xff] %v1938_v16 }
  0x30   : > { %390 = vst [vmem:[#allocation2 + $0x70] sm:$0xff] %v1938_v16  ;;  %391 = vst [vmem:[#allocation2 + $0x78] sm:$0xff] %v1938_v16 }
  0x31   : > { %392 = vst [vmem:[#allocation2 + $0x80] sm:$0xff] %v1938_v16  ;;  %393 = vst [vmem:[#allocation2 + $0x88] sm:$0xff] %v1938_v16 }
  0x32   : > { %394 = vst [vmem:[#allocation2 + $0x90] sm:$0xff] %v1938_v16  ;;  %395 = vst [vmem:[#allocation2 + $0x98] sm:$0xff] %v1938_v16 }
  0x33   : > { %396 = vst [vmem:[#allocation2 + $0xa0] sm:$0xff] %v1938_v16  ;;  %397 = vst [vmem:[#allocation2 + $0xa8] sm:$0xff] %v1938_v16 }
  0x34   : > { %398 = vst [vmem:[#allocation2 + $0xb0] sm:$0xff] %v1938_v16  ;;  %399 = vst [vmem:[#allocation2 + $0xb8] sm:$0xff] %v1938_v16 }
  0x35   : > { %400 = vst [vmem:[#allocation2 + $0xc0] sm:$0xff] %v1938_v16  ;;  %401 = vst [vmem:[#allocation2 + $0xc8] sm:$0xff] %v1938_v16 }
  0x36   : > { %402 = vst [vmem:[#allocation2 + $0xd0] sm:$0xff] %v1938_v16  ;;  %403 = vst [vmem:[#allocation2 + $0xd8] sm:$0xff] %v1938_v16 }
  0x37   : > { %404 = vst [vmem:[#allocation2 + $0xe0] sm:$0xff] %v1938_v16  ;;  %405 = vst [vmem:[#allocation2 + $0xe8] sm:$0xff] %v1938_v16 }
  0x38   : > { %406 = vst [vmem:[#allocation2 + $0xf0] sm:$0xff] %v1938_v16  ;;  %407 = vst [vmem:[#allocation2 + $0xf8] sm:$0xff] %v1938_v16 }
  0x39   : > { %408 = vst [vmem:[#allocation2 + $0x100] sm:$0xff] %v1938_v16  ;;  %409 = vst [vmem:[#allocation2 + $0x108] sm:$0xff] %v1938_v16 }
  0x3a   : > { %410 = vst [vmem:[#allocation2 + $0x110] sm:$0xff] %v1938_v16  ;;  %411 = vst [vmem:[#allocation2 + $0x118] sm:$0xff] %v1938_v16 }
  0x3b   : > { %412 = vst [vmem:[#allocation2 + $0x120] sm:$0xff] %v1938_v16  ;;  %413 = vst [vmem:[#allocation2 + $0x128] sm:$0xff] %v1938_v16 }
  0x3c   : > { %414 = vst [vmem:[#allocation2 + $0x130] sm:$0xff] %v1938_v16  ;;  %415 = vst [vmem:[#allocation2 + $0x138] sm:$0xff] %v1938_v16 }
  0x3d   : > { %416 = vst [vmem:[#allocation2 + $0x140] sm:$0xff] %v1938_v16  ;;  %417 = vst [vmem:[#allocation2 + $0x148] sm:$0xff] %v1938_v16 }
  0x3e   : > { %418 = vst [vmem:[#allocation2 + $0x150] sm:$0xff] %v1938_v16  ;;  %419 = vst [vmem:[#allocation2 + $0x158] sm:$0xff] %v1938_v16 }
  0x3f   : > { %420 = vst [vmem:[#allocation2 + $0x160] sm:$0xff] %v1938_v16  ;;  %421 = vst [vmem:[#allocation2 + $0x168] sm:$0xff] %v1938_v16 }
  0x40   : > { %422 = vst [vmem:[#allocation2 + $0x170] sm:$0xff] %v1938_v16  ;;  %423 = vst [vmem:[#allocation2 + $0x178] sm:$0xff] %v1938_v16 }
  0x41   : > { %424 = vst [vmem:[#allocation2 + $0x180] sm:$0xff] %v1938_v16  ;;  %425 = vst [vmem:[#allocation2 + $0x188] sm:$0xff] %v1938_v16 }
  0x42   : > { %426 = vst [vmem:[#allocation2 + $0x190] sm:$0xff] %v1938_v16  ;;  %427 = vst [vmem:[#allocation2 + $0x198] sm:$0xff] %v1938_v16 }
  0x43   : > { %428 = vst [vmem:[#allocation2 + $0x1a0] sm:$0xff] %v1938_v16  ;;  %429 = vst [vmem:[#allocation2 + $0x1a8] sm:$0xff] %v1938_v16 }
  0x44   : > { %430 = vst [vmem:[#allocation2 + $0x1b0] sm:$0xff] %v1938_v16  ;;  %431 = vst [vmem:[#allocation2 + $0x1b8] sm:$0xff] %v1938_v16 }
  0x45   : > { %432 = vst [vmem:[#allocation2 + $0x1c0] sm:$0xff] %v1938_v16  ;;  %433 = vst [vmem:[#allocation2 + $0x1c8] sm:$0xff] %v1938_v16 }
  0x46   : > { %434 = vst [vmem:[#allocation2 + $0x1d0] sm:$0xff] %v1938_v16  ;;  %435 = vst [vmem:[#allocation2 + $0x1d8] sm:$0xff] %v1938_v16 }
  0x47   : > { %436 = vst [vmem:[#allocation2 + $0x1e0] sm:$0xff] %v1938_v16  ;;  %437 = vst [vmem:[#allocation2 + $0x1e8] sm:$0xff] %v1938_v16 }
  0x48   : > { %438 = vst [vmem:[#allocation2 + $0x1f0] sm:$0xff] %v1938_v16  ;;  %439 = vst [vmem:[#allocation2 + $0x1f8] sm:$0xff] %v1938_v16 }
  0x49 PF: > { %v1842_v17 = vld [vmem:[%s2028_s7 + $0x4] ss:$16 sps:$4 sm:$0xff]   ;;  %v1844_v18 = vld [vmem:[%s2028_s7 + $0xc] ss:$16 sps:$4 sm:$0xff]   ;;  %v1939_v19 = vmov 0   ;;  %p1730_p11 = scmp.ne.s32.totalorder %s1928_s14, 2 }
  0x4a   : > { %792 = vmatprep.mubr.bf16.mxu0 %v1939_v19  ;;  %905 = vmatprep.mubr.bf16.mxu1 %v1939_v19  ;;  %v1846_v20 = vld [vmem:[%s2028_s7] ss:$16 sps:$4 sm:$0xff]   ;;  %v1847_v21 = vld [vmem:[%s2028_s7 + $0x8] ss:$16 sps:$4 sm:$0xff]   ;;  %v1848_v22 = vld [vmem:[%s2028_s7 + $0x24] ss:$16 sps:$4 sm:$0xff]  }
  0x4b   : > { %760 = vmatprep.subr.bf16.mxu0 %v1842_v17  ;;  %873 = vmatprep.subr.bf16.mxu1 %v1844_v18  ;;  %v1850_v23 = vld [vmem:[%s2028_s7 + $0x2c] ss:$16 sps:$4 sm:$0xff]   ;;  %v1852_v24 = vld [vmem:[%s2028_s7 + $0x20] ss:$16 sps:$4 sm:$0xff]   ;;  %v1853_v25 = vld [vmem:[%s2028_s7 + $0x28] ss:$16 sps:$4 sm:$0xff]  }
  0x4c   : > { %761 = vmatpush1.bf16.msra.mxu0 %v1846_v20  ;;  %874 = vmatpush1.bf16.msra.mxu1 %v1847_v21  ;;  %v1854_v26 = vld [vmem:[%s2028_s7 + $0x44] ss:$16 sps:$4 sm:$0xff]   ;;  %v1856_v27 = vld [vmem:[%s2028_s7 + $0x4c] ss:$16 sps:$4 sm:$0xff]   ;;  %v1858_v28 = vld [vmem:[%s2028_s7 + $0x40] ss:$16 sps:$4 sm:$0xff]  }
  0x4d   : > { %762 = vmatprep.subr.bf16.mxu0 %v1848_v22  ;;  %875 = vmatprep.subr.bf16.mxu1 %v1850_v23  ;;  %v1859_v29 = vld [vmem:[%s2028_s7 + $0x48] ss:$16 sps:$4 sm:$0xff]   ;;  %v1860_v30 = vld [vmem:[%s2028_s7 + $0x64] ss:$16 sps:$4 sm:$0xff]   ;;  %v1862_v31 = vld [vmem:[%s2028_s7 + $0x6c] ss:$16 sps:$4 sm:$0xff]  }
  0x4e   : > { %v1864_v32 = vld [vmem:[%s2028_s7 + $0x60] ss:$16 sps:$4 sm:$0xff]   ;;  %v1865_v33 = vld [vmem:[%s2028_s7 + $0x68] ss:$16 sps:$4 sm:$0xff]   ;;  %v1866_v34 = vld [vmem:[%s2028_s7 + $0x84] ss:$16 sps:$4 sm:$0xff]  }
  0x4f   : > { %v1868_v35 = vld [vmem:[%s2028_s7 + $0x8c] ss:$16 sps:$4 sm:$0xff]   ;;  %v1870_v36 = vld [vmem:[%s2028_s7 + $0x80] ss:$16 sps:$4 sm:$0xff]   ;;  %v1871_v37 = vld [vmem:[%s2028_s7 + $0x88] ss:$16 sps:$4 sm:$0xff]  }
  0x50   : > { %763 = vmatpush1.bf16.msra.mxu0 %v1852_v24  ;;  %876 = vmatpush1.bf16.msra.mxu1 %v1853_v25  ;;  %v1872_v38 = vld [vmem:[%s2028_s7 + $0xa4] ss:$16 sps:$4 sm:$0xff]   ;;  %v1874_v39 = vld [vmem:[%s2028_s7 + $0xac] ss:$16 sps:$4 sm:$0xff]   ;;  %v1876_v40 = vld [vmem:[%s2028_s7 + $0xa0] ss:$16 sps:$4 sm:$0xff]  }
  0x51   : > { %764 = vmatprep.subr.bf16.mxu0 %v1854_v26  ;;  %877 = vmatprep.subr.bf16.mxu1 %v1856_v27  ;;  %v1877_v41 = vld [vmem:[%s2028_s7 + $0xa8] ss:$16 sps:$4 sm:$0xff]   ;;  %v1878_v42 = vld [vmem:[%s2028_s7 + $0xc4] ss:$16 sps:$4 sm:$0xff]   ;;  %v1880_v43 = vld [vmem:[%s2028_s7 + $0xcc] ss:$16 sps:$4 sm:$0xff]  }
  0x52   : > { %v1882_v44 = vld [vmem:[%s2028_s7 + $0xc0] ss:$16 sps:$4 sm:$0xff]   ;;  %v1883_v45 = vld [vmem:[%s2028_s7 + $0xc8] ss:$16 sps:$4 sm:$0xff]   ;;  %v1884_v46 = vld [vmem:[%s2028_s7 + $0xe4] ss:$16 sps:$4 sm:$0xff]  }
  0x53   : > { %v1886_v47 = vld [vmem:[%s2028_s7 + $0xec] ss:$16 sps:$4 sm:$0xff]   ;;  %v1888_v48 = vld [vmem:[%s2028_s7 + $0xe0] ss:$16 sps:$4 sm:$0xff]   ;;  %v1889_v49 = vld [vmem:[%s2028_s7 + $0xe8] ss:$16 sps:$4 sm:$0xff]  }
  0x54   : > { %765 = vmatpush1.bf16.msra.mxu0 %v1858_v28  ;;  %878 = vmatpush1.bf16.msra.mxu1 %v1859_v29  ;;  %v1890_v50 = vld [vmem:[%s2030_s8] sm:$0xff]   ;;  %v1891_v51 = vld [vmem:[%s2030_s8 + $0x8] sm:$0xff]   ;;  %v1892_v52 = vld [vmem:[%s2030_s8 + $0x10] sm:$0xff]  }
  0x55   : > { %766 = vmatprep.subr.bf16.mxu0 %v1860_v30  ;;  %879 = vmatprep.subr.bf16.mxu1 %v1862_v31  ;;  %v1893_v53 = vld [vmem:[%s2030_s8 + $0x18] sm:$0xff]   ;;  %v1894_v54 = vld [vmem:[%s2030_s8 + $0x20] sm:$0xff]   ;;  %v1895_v55 = vld [vmem:[%s2030_s8 + $0x28] sm:$0xff]  }
  0x56   : > { %v1896_v56 = vld [vmem:[%s2030_s8 + $0x30] sm:$0xff]   ;;  %v1897_v57 = vld [vmem:[%s2030_s8 + $0x38] sm:$0xff]   ;;  %v440_v58 = vld [vmem:[#allocation2] sm:$0xff] }
  0x57   : > { %v442_v59 = vld [vmem:[#allocation2 + $0x10] sm:$0xff]  ;;  %v441_v60 = vld [vmem:[#allocation2 + $0x8] sm:$0xff]  ;;  %v443_v61 = vld [vmem:[#allocation2 + $0x18] sm:$0xff] }
  0x58   : > { %767 = vmatpush1.bf16.msra.mxu0 %v1864_v32  ;;  %880 = vmatpush1.bf16.msra.mxu1 %v1865_v33  ;;  %v444_v0 = vld [vmem:[#allocation2 + $0x20] sm:$0xff]  ;;  %v446_v1 = vld [vmem:[#allocation2 + $0x30] sm:$0xff]  ;;  %v445_v6 = vld [vmem:[#allocation2 + $0x28] sm:$0xff] }
  0x59   : > { %768 = vmatprep.subr.bf16.mxu0 %v1866_v34  ;;  %881 = vmatprep.subr.bf16.mxu1 %v1868_v35  ;;  %v447_v7 = vld [vmem:[#allocation2 + $0x38] sm:$0xff]  ;;  %v448_v18 = vld [vmem:[#allocation2 + $0x40] sm:$0xff]  ;;  %v449_v20 = vld [vmem:[#allocation2 + $0x48] sm:$0xff] }
  0x5a   : > { %v451_v21 = vld [vmem:[#allocation2 + $0x58] sm:$0xff]  ;;  %v452_v24 = vld [vmem:[#allocation2 + $0x60] sm:$0xff]  ;;  %v454_v25 = vld [vmem:[#allocation2 + $0x70] sm:$0xff] }
  0x5b   : > { %v453_v30 = vld [vmem:[#allocation2 + $0x68] sm:$0xff]  ;;  %v455_v31 = vld [vmem:[#allocation2 + $0x78] sm:$0xff] }
  0x5c   : > { %769 = vmatpush1.bf16.msra.mxu0 %v1870_v36  ;;  %882 = vmatpush1.bf16.msra.mxu1 %v1871_v37 }
  0x5d   : > { %770 = vmatprep.subr.bf16.mxu0 %v1872_v38  ;;  %883 = vmatprep.subr.bf16.mxu1 %v1874_v39 }
  0x60   : > { %771 = vmatpush1.bf16.msra.mxu0 %v1876_v40  ;;  %884 = vmatpush1.bf16.msra.mxu1 %v1877_v41 }
  0x61   : > { %772 = vmatprep.subr.bf16.mxu0 %v1878_v42  ;;  %885 = vmatprep.subr.bf16.mxu1 %v1880_v43  ;;  %v456_v42 = vld [vmem:[#allocation2 + $0x80] sm:$0xff]  ;;  %v458_v43 = vld [vmem:[#allocation2 + $0x90] sm:$0xff] }
  0x64   : > { %773 = vmatpush1.bf16.msra.mxu0 %v1882_v44  ;;  %886 = vmatpush1.bf16.msra.mxu1 %v1883_v45  ;;  %v457_v44 = vld [vmem:[#allocation2 + $0x88] sm:$0xff]  ;;  %v459_v45 = vld [vmem:[#allocation2 + $0x98] sm:$0xff] }
  0x65   : > { %774 = vmatprep.subr.bf16.mxu0 %v1884_v46  ;;  %887 = vmatprep.subr.bf16.mxu1 %v1886_v47 }
  0x68   : > { %775 = vmatpush1.bf16.msra.mxu0 %v1888_v48  ;;  %888 = vmatpush1.bf16.msra.mxu1 %v1889_v49  ;;  %v460_v48 = vld [vmem:[#allocation2 + $0xa0] sm:$0xff]  ;;  %v462_v49 = vld [vmem:[#allocation2 + $0xb0] sm:$0xff] }
  0x6b   : > { %793 = vmatmul.mubr.bf16.vlgmr.msra.gmra.mrb[0].mxu0 %v1890_v50  ;;  %906 = vmatmul.mubr.bf16.vlgmr.msra.gmra.mrb[0].mxu1 %v1890_v50 }
  0x6c   : > { %802 = vmatprep.mubr.bf16.mxu0 %v1939_v19  ;;  %915 = vmatprep.mubr.bf16.mxu1 %v1939_v19 }
  0x73   : > { %803 = vmatmul.mubr.bf16.gmra.mrb[4].mxu0 %v1891_v51  ;;  %916 = vmatmul.mubr.bf16.gmra.mrb[4].mxu1 %v1891_v51 }
  0x74   : > { %812 = vmatprep.mubr.bf16.mxu0 %v1939_v19  ;;  %925 = vmatprep.mubr.bf16.mxu1 %v1939_v19 }
  0x7b   : > { %813 = vmatmul.mubr.bf16.gmra.mrb[8].mxu0 %v1892_v52  ;;  %926 = vmatmul.mubr.bf16.gmra.mrb[8].mxu1 %v1892_v52 }
  0x7c   : > { %822 = vmatprep.mubr.bf16.mxu0 %v1939_v19  ;;  %935 = vmatprep.mubr.bf16.mxu1 %v1939_v19 }
  0x83   : > { %823 = vmatmul.mubr.bf16.gmra.mrb[12].mxu0 %v1893_v53  ;;  %936 = vmatmul.mubr.bf16.gmra.mrb[12].mxu1 %v1893_v53 }
  0x84   : > { %832 = vmatprep.mubr.bf16.mxu0 %v1939_v19  ;;  %945 = vmatprep.mubr.bf16.mxu1 %v1939_v19 }
  0x8b   : > { %833 = vmatmul.mubr.bf16.gmra.mrb[16].mxu0 %v1894_v54  ;;  %946 = vmatmul.mubr.bf16.gmra.mrb[16].mxu1 %v1894_v54  ;;  %v461_v54 = vld [vmem:[#allocation2 + $0xa8] sm:$0xff] }
  0x8c   : > { %842 = vmatprep.mubr.bf16.mxu0 %v1939_v19  ;;  %955 = vmatprep.mubr.bf16.mxu1 %v1939_v19 }
  0x93   : > { %843 = vmatmul.mubr.bf16.gmra.mrb[20].mxu0 %v1895_v55  ;;  %956 = vmatmul.mubr.bf16.gmra.mrb[20].mxu1 %v1895_v55  ;;  %v463_v55 = vld [vmem:[#allocation2 + $0xb8] sm:$0xff] }
  0x94   : > { %852 = vmatprep.mubr.bf16.mxu0 %v1939_v19  ;;  %965 = vmatprep.mubr.bf16.mxu1 %v1939_v19 }
  0x9b   : > { %853 = vmatmul.mubr.bf16.gmra.mrb[24].mxu0 %v1896_v56  ;;  %966 = vmatmul.mubr.bf16.gmra.mrb[24].mxu1 %v1896_v56 }
  0x9c   : > { %862 = vmatprep.mubr.bf16.mxu0 %v1939_v19  ;;  %975 = vmatprep.mubr.bf16.mxu1 %v1939_v19  ;;  %v450_v19 = vld [vmem:[#allocation2 + $0x50] sm:$0xff] }
  0xa3   : > { %863 = vmatmul.mubr.bf16.gmra.mrb[28].mxu0 %v1897_v57  ;;  %976 = vmatmul.mubr.bf16.gmra.mrb[28].mxu1 %v1897_v57 }
 0x13e   : > { %v794_v62 = vpop.f32.mrb[0].mxu0  ;;  %v907_v63 = vpop.f32.mrb[0].mxu1 }
 0x13f   : > { %v986_v2 = vadd.f32 %v794_v62, %v440_v58  ;;  %v988_v3 = vadd.f32 %v907_v63, %v442_v59  ;;  %v796_v4 = vpop.f32.mrb[1].mxu0  ;;  %v909_v5 = vpop.f32.mrb[1].mxu1 }
 0x140   : > { %v987_v8 = vadd.f32 %v796_v4, %v441_v60  ;;  %v989_v9 = vadd.f32 %v909_v5, %v443_v61  ;;  %v798_v10 = vpop.f32.mrb[2].mxu0  ;;  %v911_v11 = vpop.f32.mrb[2].mxu1  ;;  %v465_v4 = vld [vmem:[#allocation2 + $0xc8] sm:$0xff]  ;;  %v467_v5 = vld [vmem:[#allocation2 + $0xd8] sm:$0xff] }
 0x141   : > { %1050 = vst [vmem:[#allocation2] sm:$0xff] %v986_v2  ;;  %1052 = vst [vmem:[#allocation2 + $0x10] sm:$0xff] %v988_v3  ;;  %v990_v12 = vadd.f32 %v798_v10, %v444_v0  ;;  %v992_v13 = vadd.f32 %v911_v11, %v446_v1  ;;  %v800_v14 = vpop.f32.mrb[3].mxu0  ;;  %v913_v15 = vpop.f32.mrb[3].mxu1  ;;  %v464_v2 = vld [vmem:[#allocation2 + $0xc0] sm:$0xff]  ;;  %v466_v3 = vld [vmem:[#allocation2 + $0xd0] sm:$0xff] }
 0x142   : > { %1051 = vst [vmem:[#allocation2 + $0x8] sm:$0xff] %v987_v8  ;;  %1053 = vst [vmem:[#allocation2 + $0x18] sm:$0xff] %v989_v9  ;;  %v991_v16 = vadd.f32 %v800_v14, %v445_v6  ;;  %v993_v17 = vadd.f32 %v913_v15, %v447_v7  ;;  %v468_v8 = vld [vmem:[#allocation2 + $0xe0] sm:$0xff]  ;;  %v470_v9 = vld [vmem:[#allocation2 + $0xf0] sm:$0xff] }
 0x143   : > { %1054 = vst [vmem:[#allocation2 + $0x20] sm:$0xff] %v990_v12  ;;  %1056 = vst [vmem:[#allocation2 + $0x30] sm:$0xff] %v992_v13  ;;  %v469_v14 = vld [vmem:[#allocation2 + $0xe8] sm:$0xff]  ;;  %v471_v15 = vld [vmem:[#allocation2 + $0xf8] sm:$0xff] }
 0x144   : > { %1055 = vst [vmem:[#allocation2 + $0x28] sm:$0xff] %v991_v16  ;;  %1057 = vst [vmem:[#allocation2 + $0x38] sm:$0xff] %v993_v17 }
 0x146   : > { %v804_v22 = vpop.f32.mrb[4].mxu0  ;;  %v917_v23 = vpop.f32.mrb[4].mxu1 }
 0x147   : > { %v994_v26 = vadd.f32 %v804_v22, %v448_v18  ;;  %v996_v27 = vadd.f32 %v917_v23, %v450_v19  ;;  %v806_v28 = vpop.f32.mrb[5].mxu0  ;;  %v919_v29 = vpop.f32.mrb[5].mxu1 }
 0x148   : > { %v995_v32 = vadd.f32 %v806_v28, %v449_v20  ;;  %v997_v33 = vadd.f32 %v919_v29, %v451_v21  ;;  %v808_v34 = vpop.f32.mrb[6].mxu0  ;;  %v921_v35 = vpop.f32.mrb[6].mxu1  ;;  %v473_v28 = vld [vmem:[#allocation2 + $0x108] sm:$0xff]  ;;  %v475_v29 = vld [vmem:[#allocation2 + $0x118] sm:$0xff] }
 0x149   : > { %1058 = vst [vmem:[#allocation2 + $0x40] sm:$0xff] %v994_v26  ;;  %1060 = vst [vmem:[#allocation2 + $0x50] sm:$0xff] %v996_v27  ;;  %v998_v36 = vadd.f32 %v808_v34, %v452_v24  ;;  %v1000_v37 = vadd.f32 %v921_v35, %v454_v25  ;;  %v810_v38 = vpop.f32.mrb[7].mxu0  ;;  %v923_v39 = vpop.f32.mrb[7].mxu1  ;;  %v472_v26 = vld [vmem:[#allocation2 + $0x100] sm:$0xff]  ;;  %v474_v27 = vld [vmem:[#allocation2 + $0x110] sm:$0xff] }
 0x14a   : > { %1059 = vst [vmem:[#allocation2 + $0x48] sm:$0xff] %v995_v32  ;;  %1061 = vst [vmem:[#allocation2 + $0x58] sm:$0xff] %v997_v33  ;;  %v999_v40 = vadd.f32 %v810_v38, %v453_v30  ;;  %v1001_v41 = vadd.f32 %v923_v39, %v455_v31  ;;  %v476_v32 = vld [vmem:[#allocation2 + $0x120] sm:$0xff]  ;;  %v478_v33 = vld [vmem:[#allocation2 + $0x130] sm:$0xff] }
 0x14b   : > { %1062 = vst [vmem:[#allocation2 + $0x60] sm:$0xff] %v998_v36  ;;  %1064 = vst [vmem:[#allocation2 + $0x70] sm:$0xff] %v1000_v37  ;;  %v477_v38 = vld [vmem:[#allocation2 + $0x128] sm:$0xff]  ;;  %v479_v39 = vld [vmem:[#allocation2 + $0x138] sm:$0xff] }
 0x14c   : > { %1063 = vst [vmem:[#allocation2 + $0x68] sm:$0xff] %v999_v40  ;;  %1065 = vst [vmem:[#allocation2 + $0x78] sm:$0xff] %v1001_v41 }
 0x14e   : > { %v814_v46 = vpop.f32.mrb[8].mxu0  ;;  %v927_v47 = vpop.f32.mrb[8].mxu1 }
 0x14f   : > { %v1002_v50 = vadd.f32 %v814_v46, %v456_v42  ;;  %v1004_v51 = vadd.f32 %v927_v47, %v458_v43  ;;  %v816_v52 = vpop.f32.mrb[9].mxu0  ;;  %v929_v53 = vpop.f32.mrb[9].mxu1 }
 0x150   : > { %v1003_v56 = vadd.f32 %v816_v52, %v457_v44  ;;  %v1005_v57 = vadd.f32 %v929_v53, %v459_v45  ;;  %v818_v58 = vpop.f32.mrb[10].mxu0  ;;  %v931_v59 = vpop.f32.mrb[10].mxu1  ;;  %v481_v52 = vld [vmem:[#allocation2 + $0x148] sm:$0xff]  ;;  %v483_v53 = vld [vmem:[#allocation2 + $0x158] sm:$0xff] }
 0x151   : > { %1066 = vst [vmem:[#allocation2 + $0x80] sm:$0xff] %v1002_v50  ;;  %1068 = vst [vmem:[#allocation2 + $0x90] sm:$0xff] %v1004_v51  ;;  %v1006_v60 = vadd.f32 %v818_v58, %v460_v48  ;;  %v1008_v61 = vadd.f32 %v931_v59, %v462_v49  ;;  %v820_v62 = vpop.f32.mrb[11].mxu0  ;;  %v933_v63 = vpop.f32.mrb[11].mxu1  ;;  %v480_v50 = vld [vmem:[#allocation2 + $0x140] sm:$0xff]  ;;  %v482_v51 = vld [vmem:[#allocation2 + $0x150] sm:$0xff] }
 0x152   : > { %1067 = vst [vmem:[#allocation2 + $0x88] sm:$0xff] %v1003_v56  ;;  %1069 = vst [vmem:[#allocation2 + $0x98] sm:$0xff] %v1005_v57  ;;  %v1007_v0 = vadd.f32 %v820_v62, %v461_v54  ;;  %v1009_v1 = vadd.f32 %v933_v63, %v463_v55  ;;  %v484_v56 = vld [vmem:[#allocation2 + $0x160] sm:$0xff]  ;;  %v486_v57 = vld [vmem:[#allocation2 + $0x170] sm:$0xff] }
 0x153   : > { %1070 = vst [vmem:[#allocation2 + $0xa0] sm:$0xff] %v1006_v60  ;;  %1072 = vst [vmem:[#allocation2 + $0xb0] sm:$0xff] %v1008_v61  ;;  %v485_v62 = vld [vmem:[#allocation2 + $0x168] sm:$0xff]  ;;  %v487_v63 = vld [vmem:[#allocation2 + $0x178] sm:$0xff] }
 0x154   : > { %1071 = vst [vmem:[#allocation2 + $0xa8] sm:$0xff] %v1007_v0  ;;  %1073 = vst [vmem:[#allocation2 + $0xb8] sm:$0xff] %v1009_v1 }
 0x156   : > { %v824_v6 = vpop.f32.mrb[12].mxu0  ;;  %v937_v7 = vpop.f32.mrb[12].mxu1 }
 0x157   : > { %v1010_v10 = vadd.f32 %v824_v6, %v464_v2  ;;  %v1012_v11 = vadd.f32 %v937_v7, %v466_v3  ;;  %v826_v12 = vpop.f32.mrb[13].mxu0  ;;  %v939_v13 = vpop.f32.mrb[13].mxu1 }
 0x158   : > { %v1011_v16 = vadd.f32 %v826_v12, %v465_v4  ;;  %v1013_v17 = vadd.f32 %v939_v13, %v467_v5  ;;  %v828_v18 = vpop.f32.mrb[14].mxu0  ;;  %v941_v19 = vpop.f32.mrb[14].mxu1  ;;  %v489_v12 = vld [vmem:[#allocation2 + $0x188] sm:$0xff]  ;;  %v491_v13 = vld [vmem:[#allocation2 + $0x198] sm:$0xff] }
 0x159   : > { %1074 = vst [vmem:[#allocation2 + $0xc0] sm:$0xff] %v1010_v10  ;;  %1076 = vst [vmem:[#allocation2 + $0xd0] sm:$0xff] %v1012_v11  ;;  %v1014_v20 = vadd.f32 %v828_v18, %v468_v8  ;;  %v1016_v21 = vadd.f32 %v941_v19, %v470_v9  ;;  %v830_v22 = vpop.f32.mrb[15].mxu0  ;;  %v943_v23 = vpop.f32.mrb[15].mxu1  ;;  %v488_v10 = vld [vmem:[#allocation2 + $0x180] sm:$0xff]  ;;  %v490_v11 = vld [vmem:[#allocation2 + $0x190] sm:$0xff] }
 0x15a   : > { %1075 = vst [vmem:[#allocation2 + $0xc8] sm:$0xff] %v1011_v16  ;;  %1077 = vst [vmem:[#allocation2 + $0xd8] sm:$0xff] %v1013_v17  ;;  %v1015_v24 = vadd.f32 %v830_v22, %v469_v14  ;;  %v1017_v25 = vadd.f32 %v943_v23, %v471_v15  ;;  %v492_v16 = vld [vmem:[#allocation2 + $0x1a0] sm:$0xff]  ;;  %v494_v17 = vld [vmem:[#allocation2 + $0x1b0] sm:$0xff] }
 0x15b   : > { %1078 = vst [vmem:[#allocation2 + $0xe0] sm:$0xff] %v1014_v20  ;;  %1080 = vst [vmem:[#allocation2 + $0xf0] sm:$0xff] %v1016_v21  ;;  %v493_v22 = vld [vmem:[#allocation2 + $0x1a8] sm:$0xff]  ;;  %v495_v23 = vld [vmem:[#allocation2 + $0x1b8] sm:$0xff] }
 0x15c   : > { %1079 = vst [vmem:[#allocation2 + $0xe8] sm:$0xff] %v1015_v24  ;;  %1081 = vst [vmem:[#allocation2 + $0xf8] sm:$0xff] %v1017_v25 }
 0x15e   : > { %v834_v30 = vpop.f32.mrb[16].mxu0  ;;  %v947_v31 = vpop.f32.mrb[16].mxu1 }
 0x15f   : > { %v1018_v34 = vadd.f32 %v834_v30, %v472_v26  ;;  %v1020_v35 = vadd.f32 %v947_v31, %v474_v27  ;;  %v836_v36 = vpop.f32.mrb[17].mxu0  ;;  %v949_v37 = vpop.f32.mrb[17].mxu1 }
 0x160   : > { %v1019_v40 = vadd.f32 %v836_v36, %v473_v28  ;;  %v1021_v41 = vadd.f32 %v949_v37, %v475_v29  ;;  %v838_v42 = vpop.f32.mrb[18].mxu0  ;;  %v951_v43 = vpop.f32.mrb[18].mxu1  ;;  %v497_v36 = vld [vmem:[#allocation2 + $0x1c8] sm:$0xff]  ;;  %v499_v37 = vld [vmem:[#allocation2 + $0x1d8] sm:$0xff] }
 0x161   : > { %1082 = vst [vmem:[#allocation2 + $0x100] sm:$0xff] %v1018_v34  ;;  %1084 = vst [vmem:[#allocation2 + $0x110] sm:$0xff] %v1020_v35  ;;  %v1022_v44 = vadd.f32 %v838_v42, %v476_v32  ;;  %v1024_v45 = vadd.f32 %v951_v43, %v478_v33  ;;  %v840_v46 = vpop.f32.mrb[19].mxu0  ;;  %v953_v47 = vpop.f32.mrb[19].mxu1  ;;  %v496_v34 = vld [vmem:[#allocation2 + $0x1c0] sm:$0xff]  ;;  %v498_v35 = vld [vmem:[#allocation2 + $0x1d0] sm:$0xff] }
 0x162   : > { %1083 = vst [vmem:[#allocation2 + $0x108] sm:$0xff] %v1019_v40  ;;  %1085 = vst [vmem:[#allocation2 + $0x118] sm:$0xff] %v1021_v41  ;;  %v1023_v48 = vadd.f32 %v840_v46, %v477_v38  ;;  %v1025_v49 = vadd.f32 %v953_v47, %v479_v39  ;;  %v500_v40 = vld [vmem:[#allocation2 + $0x1e0] sm:$0xff]  ;;  %v502_v41 = vld [vmem:[#allocation2 + $0x1f0] sm:$0xff] }
 0x163   : > { %1086 = vst [vmem:[#allocation2 + $0x120] sm:$0xff] %v1022_v44  ;;  %1088 = vst [vmem:[#allocation2 + $0x130] sm:$0xff] %v1024_v45  ;;  %v501_v46 = vld [vmem:[#allocation2 + $0x1e8] sm:$0xff]  ;;  %v503_v47 = vld [vmem:[#allocation2 + $0x1f8] sm:$0xff] }
 0x164   : > { %1087 = vst [vmem:[#allocation2 + $0x128] sm:$0xff] %v1023_v48  ;;  %1089 = vst [vmem:[#allocation2 + $0x138] sm:$0xff] %v1025_v49 }
 0x166   : > { %v844_v54 = vpop.f32.mrb[20].mxu0  ;;  %v957_v55 = vpop.f32.mrb[20].mxu1 }
 0x167   : > { %v1026_v58 = vadd.f32 %v844_v54, %v480_v50  ;;  %v1028_v59 = vadd.f32 %v957_v55, %v482_v51  ;;  %v846_v60 = vpop.f32.mrb[21].mxu0  ;;  %v959_v61 = vpop.f32.mrb[21].mxu1 }
 0x168   : > { %v1027_v0 = vadd.f32 %v846_v60, %v481_v52  ;;  %v1029_v1 = vadd.f32 %v959_v61, %v483_v53  ;;  %v848_v2 = vpop.f32.mrb[22].mxu0  ;;  %v961_v3 = vpop.f32.mrb[22].mxu1  ;;  %v1182_v60 = vld [vmem:[%s2342_s2] sm:$0xf] (!%p1730_p11) }
 0x169   : > { %1090 = vst [vmem:[#allocation2 + $0x140] sm:$0xff] %v1026_v58  ;;  %1092 = vst [vmem:[#allocation2 + $0x150] sm:$0xff] %v1028_v59  ;;  %v1030_v4 = vadd.f32 %v848_v2, %v484_v56  ;;  %v1032_v5 = vadd.f32 %v961_v3, %v486_v57  ;;  %v850_v6 = vpop.f32.mrb[23].mxu0  ;;  %v963_v7 = vpop.f32.mrb[23].mxu1  ;;  %v1184_v58 = vlaneseq (!%p1730_p11)  ;;  %v1118_v61 = vld [vmem:[#allocation2] sm:$0xff] (!%p1730_p11)  ;;  %v1120_v3 = vld [vmem:[#allocation2 + $0x10] sm:$0xff] (!%p1730_p11) }
 0x16a   : > { %1091 = vst [vmem:[#allocation2 + $0x148] sm:$0xff] %v1027_v0  ;;  %1093 = vst [vmem:[#allocation2 + $0x158] sm:$0xff] %v1029_v1  ;;  %v1031_v8 = vadd.f32 %v850_v6, %v485_v62  ;;  %v1033_v9 = vadd.f32 %v963_v7, %v487_v63  ;;  %v1119_v62 = vld [vmem:[#allocation2 + $0x8] sm:$0xff] (!%p1730_p11) }
 0x16b   : > { %1094 = vst [vmem:[#allocation2 + $0x160] sm:$0xff] %v1030_v4  ;;  %1096 = vst [vmem:[#allocation2 + $0x170] sm:$0xff] %v1032_v5  ;;  %v1185_v59 = vshrl.u32 (!%p1730_p11), %v1184_v58, 7  ;;  %v1121_v4 = vld [vmem:[#allocation2 + $0x18] sm:$0xff] (!%p1730_p11)  ;;  %v1122_v5 = vld [vmem:[#allocation2 + $0x20] sm:$0xff] (!%p1730_p11) }
 0x16c   : > { %1095 = vst [vmem:[#allocation2 + $0x168] sm:$0xff] %v1031_v8  ;;  %1097 = vst [vmem:[#allocation2 + $0x178] sm:$0xff] %v1033_v9 }
 0x16d   : > { %v1186_v63 = vsub.s32 (!%p1730_p11), 0, %v1185_v59  ;;  %v1190_v0 = vsub.s32 (!%p1730_p11), 1, %v1185_v59  ;;  %v1194_v1 = vsub.s32 (!%p1730_p11), 2, %v1185_v59  ;;  %v1198_v2 = vsub.s32 (!%p1730_p11), 3, %v1185_v59 }
 0x16e   : > { %v854_v14 = vpop.f32.mrb[24].mxu0  ;;  %v967_v15 = vpop.f32.mrb[24].mxu1 }
 0x16f   : > { %v1034_v18 = vadd.f32 %v854_v14, %v488_v10  ;;  %v1036_v19 = vadd.f32 %v967_v15, %v490_v11  ;;  %v856_v20 = vpop.f32.mrb[25].mxu0  ;;  %v969_v21 = vpop.f32.mrb[25].mxu1  ;;  %v2157_v6 = vrot.slane (!%p1730_p11), %v1182_v60, %v1186_v63  ;;  %v2159_v7 = vrot.slane (!%p1730_p11), %v1182_v60, %v1190_v0  ;;  %v1123_v10 = vld [vmem:[#allocation2 + $0x28] sm:$0xff] (!%p1730_p11)  ;;  %v1124_v11 = vld [vmem:[#allocation2 + $0x30] sm:$0xff] (!%p1730_p11) }
 0x170   : > { %v1035_v24 = vadd.f32 %v856_v20, %v489_v12  ;;  %v1037_v25 = vadd.f32 %v969_v21, %v491_v13  ;;  %v858_v26 = vpop.f32.mrb[26].mxu0  ;;  %v971_v27 = vpop.f32.mrb[26].mxu1  ;;  %v2161_v8 = vrot.slane (!%p1730_p11), %v1182_v60, %v1194_v1  ;;  %v2163_v9 = vrot.slane (!%p1730_p11), %v1182_v60, %v1198_v2  ;;  %v1125_v12 = vld [vmem:[#allocation2 + $0x38] sm:$0xff] (!%p1730_p11)  ;;  %v1126_v21 = vld [vmem:[#allocation2 + $0x40] sm:$0xff] (!%p1730_p11) }
 0x171   : > { %1098 = vst [vmem:[#allocation2 + $0x180] sm:$0xff] %v1034_v18  ;;  %1100 = vst [vmem:[#allocation2 + $0x190] sm:$0xff] %v1036_v19  ;;  %v1038_v28 = vadd.f32 %v858_v26, %v492_v16  ;;  %v1040_v29 = vadd.f32 %v971_v27, %v494_v17  ;;  %v860_v30 = vpop.f32.mrb[27].mxu0  ;;  %v973_v31 = vpop.f32.mrb[27].mxu1  ;;  %v1204_v13 = vadd.f32 (!%p1730_p11), %v2157_v6, %v1118_v61  ;;  %v1128_v27 = vld [vmem:[#allocation2 + $0x50] sm:$0xff] (!%p1730_p11)  ;;  %v1138_v61 = vld [vmem:[#allocation2 + $0xa0] sm:$0xff] (!%p1730_p11) }
 0x172   : > { %1099 = vst [vmem:[#allocation2 + $0x188] sm:$0xff] %v1035_v24  ;;  %1101 = vst [vmem:[#allocation2 + $0x198] sm:$0xff] %v1037_v25  ;;  %v1039_v32 = vadd.f32 %v860_v30, %v493_v22  ;;  %v1041_v33 = vadd.f32 %v973_v31, %v495_v23  ;;  %v1205_v14 = vadd.f32 (!%p1730_p11), %v2159_v7, %v1119_v62  ;;  %v1127_v22 = vld [vmem:[#allocation2 + $0x48] sm:$0xff] (!%p1730_p11) }
 0x173   : > { %1102 = vst [vmem:[#allocation2 + $0x1a0] sm:$0xff] %v1038_v28  ;;  %1104 = vst [vmem:[#allocation2 + $0x1b0] sm:$0xff] %v1040_v29  ;;  %v1206_v15 = vadd.f32 (!%p1730_p11), %v2161_v8, %v1120_v3  ;;  %v1207_v16 = vadd.f32 (!%p1730_p11), %v2163_v9, %v1121_v4  ;;  %v1208_v17 = vadd.f32 (!%p1730_p11), %v2157_v6, %v1122_v5  ;;  %v1268_v23 = vmax.f32 (!%p1730_p11), %v1204_v13, 0.0  ;;  %v1129_v28 = vld [vmem:[#allocation2 + $0x58] sm:$0xff] (!%p1730_p11)  ;;  %v1139_v62 = vld [vmem:[#allocation2 + $0xa8] sm:$0xff] (!%p1730_p11) }
 0x174   : > { %1103 = vst [vmem:[#allocation2 + $0x1a8] sm:$0xff] %v1039_v32  ;;  %1105 = vst [vmem:[#allocation2 + $0x1b8] sm:$0xff] %v1041_v33  ;;  %v1209_v18 = vadd.f32 (!%p1730_p11), %v2159_v7, %v1123_v10  ;;  %v1210_v19 = vadd.f32 (!%p1730_p11), %v2161_v8, %v1124_v11  ;;  %v1211_v20 = vadd.f32 (!%p1730_p11), %v2163_v9, %v1125_v12  ;;  %v1269_v24 = vmax.f32 (!%p1730_p11), %v1205_v14, 0.0  ;;  %v1130_v33 = vld [vmem:[#allocation2 + $0x60] sm:$0xff] (!%p1730_p11)  ;;  %v1140_v3 = vld [vmem:[#allocation2 + $0xb0] sm:$0xff] (!%p1730_p11) }
 0x175   : > { %v1270_v25 = vmax.f32 (!%p1730_p11), %v1206_v15, 0.0  ;;  %v1271_v26 = vmax.f32 (!%p1730_p11), %v1207_v16, 0.0  ;;  %v1272_v29 = vmax.f32 (!%p1730_p11), %v1208_v17, 0.0  ;;  %v1141_v4 = vld [vmem:[#allocation2 + $0xb8] sm:$0xff] (!%p1730_p11)  ;;  %v1142_v13 = vld [vmem:[#allocation2 + $0xc0] sm:$0xff] (!%p1730_p11)  ;;  %v1224_v16 = vadd.f32 (!%p1730_p11), %v2157_v6, %v1138_v61 }
 0x176   : > { %v864_v38 = vpop.f32.mrb[28].mxu0  ;;  %v977_v39 = vpop.f32.mrb[28].mxu1  ;;  %1117 = sbr.rel (%p1730_p11) target bundleno = 417 (0x1a1), region = 81  ;;  %v1273_v30 = vmax.f32 (!%p1730_p11), %v1209_v18, 0.0  ;;  %v1274_v31 = vmax.f32 (!%p1730_p11), %v1210_v19, 0.0  ;;  %v1275_v32 = vmax.f32 (!%p1730_p11), %v1211_v20, 0.0  ;;  %v1225_v17 = vadd.f32 (!%p1730_p11), %v2159_v7, %v1139_v62 }
 0x177   : > { %v1042_v42 = vadd.f32 %v864_v38, %v496_v34  ;;  %v1044_v43 = vadd.f32 %v977_v39, %v498_v35  ;;  %v866_v44 = vpop.f32.mrb[29].mxu0  ;;  %v979_v45 = vpop.f32.mrb[29].mxu1  ;;  %v1131_v34 = vld [vmem:[#allocation2 + $0x68] sm:$0xff] (!%p1730_p11)  ;;  %v1768_v35 = vpack.c.bf16 (!%p1730_p11), %v1269_v24, %v1268_v23  ;;  %v1213_v38 = vadd.f32 (!%p1730_p11), %v2159_v7, %v1127_v22  ;;  %v1132_v39 = vld [vmem:[#allocation2 + $0x70] sm:$0xff] (!%p1730_p11)  ;;  %v1145_v24 = vld [vmem:[#allocation2 + $0xd8] sm:$0xff] (!%p1730_p11) }
 0x178   : > { %v1043_v48 = vadd.f32 %v866_v44, %v497_v36  ;;  %v1045_v49 = vadd.f32 %v979_v45, %v499_v37  ;;  %v868_v50 = vpop.f32.mrb[30].mxu0  ;;  %v981_v51 = vpop.f32.mrb[30].mxu1  ;;  %v1769_v36 = vpack.c.bf16 (!%p1730_p11), %v1271_v26, %v1270_v25  ;;  %v1212_v37 = vadd.f32 (!%p1730_p11), %v2157_v6, %v1126_v21  ;;  %v1134_v45 = vld [vmem:[#allocation2 + $0x80] sm:$0xff] (!%p1730_p11)  ;;  %v1143_v18 = vld [vmem:[#allocation2 + $0xc8] sm:$0xff] (!%p1730_p11)  ;;  %v1144_v23 = vld [vmem:[#allocation2 + $0xd0] sm:$0xff] (!%p1730_p11) }
 0x179   : > { %1106 = vst [vmem:[#allocation2 + $0x1c0] sm:$0xff] %v1042_v42  ;;  %1108 = vst [vmem:[#allocation2 + $0x1d0] sm:$0xff] %v1044_v43  ;;  %v1046_v52 = vadd.f32 %v868_v50, %v500_v40  ;;  %v1048_v53 = vadd.f32 %v981_v51, %v502_v41  ;;  %v870_v54 = vpop.f32.mrb[31].mxu0  ;;  %v983_v55 = vpop.f32.mrb[31].mxu1  ;;  %v1133_v40 = vld [vmem:[#allocation2 + $0x78] sm:$0xff] (!%p1730_p11)  ;;  %v1770_v41 = vpack.c.bf16 (!%p1730_p11), %v1273_v30, %v1272_v29  ;;  %v1135_v50 = vld [vmem:[#allocation2 + $0x88] sm:$0xff] (!%p1730_p11) }
 0x17a   : > { %1107 = vst [vmem:[#allocation2 + $0x1c8] sm:$0xff] %v1043_v48  ;;  %1109 = vst [vmem:[#allocation2 + $0x1d8] sm:$0xff] %v1045_v49  ;;  %v1047_v56 = vadd.f32 %v870_v54, %v501_v46  ;;  %v1049_v57 = vadd.f32 %v983_v55, %v503_v47  ;;  %v1771_v42 = vpack.c.bf16 (!%p1730_p11), %v1275_v32, %v1274_v31  ;;  %v1276_v46 = vmax.f32 (!%p1730_p11), %v1212_v37, 0.0  ;;  %v1136_v55 = vld [vmem:[#allocation2 + $0x90] sm:$0xff] (!%p1730_p11)  ;;  %v1146_v29 = vld [vmem:[#allocation2 + $0xe0] sm:$0xff] (!%p1730_p11) }
 0x17b   : > { %1110 = vst [vmem:[#allocation2 + $0x1e0] sm:$0xff] %v1046_v52  ;;  %1112 = vst [vmem:[#allocation2 + $0x1f0] sm:$0xff] %v1048_v53  ;;  %v1214_v43 = vadd.f32 (!%p1730_p11), %v2161_v8, %v1128_v27  ;;  %v1215_v44 = vadd.f32 (!%p1730_p11), %v2163_v9, %v1129_v28  ;;  %v1277_v47 = vmax.f32 (!%p1730_p11), %v1213_v38, 0.0  ;;  %v1216_v48 = vadd.f32 (!%p1730_p11), %v2157_v6, %v1130_v33  ;;  %v1147_v30 = vld [vmem:[#allocation2 + $0xe8] sm:$0xff] (!%p1730_p11) }
 0x17c   : > { %1111 = vst [vmem:[#allocation2 + $0x1e8] sm:$0xff] %v1047_v56  ;;  %1113 = vst [vmem:[#allocation2 + $0x1f8] sm:$0xff] %v1049_v57  ;;  %v1217_v49 = vadd.f32 (!%p1730_p11), %v2159_v7, %v1131_v34  ;;  %v1218_v53 = vadd.f32 (!%p1730_p11), %v2161_v8, %v1132_v39  ;;  %v1219_v54 = vadd.f32 (!%p1730_p11), %v2163_v9, %v1133_v40  ;;  %v1137_v56 = vld [vmem:[#allocation2 + $0x98] sm:$0xff] (!%p1730_p11)  ;;  %v1288_v26 = vmax.f32 (!%p1730_p11), %v1224_v16, 0.0 }
 0x17d   : > { %1524 = vst [vmem:[%s2343_s3] sm:$0xff] %v1768_v35  ;;  %1525 = vst [vmem:[%s2343_s3 + $0x8] sm:$0xff] %v1769_v36  ;;  %v1278_v51 = vmax.f32 %v1214_v43, 0.0  ;;  %v1279_v52 = vmax.f32 %v1215_v44, 0.0  ;;  %v1772_v57 = vpack.c.bf16 %v1277_v47, %v1276_v46  ;;  %v1280_v58 = vmax.f32 %v1216_v48, 0.0  ;;  %v1148_v35 = vld [vmem:[#allocation2 + $0xf0] sm:$0xff]  ;;  %v1149_v36 = vld [vmem:[#allocation2 + $0xf8] sm:$0xff] }
 0x17e   : > { %1526 = vst [vmem:[%s2343_s3 + $0x10] sm:$0xff] %v1770_v41  ;;  %1527 = vst [vmem:[%s2343_s3 + $0x18] sm:$0xff] %v1771_v42  ;;  %v1281_v59 = vmax.f32 %v1217_v49, 0.0  ;;  %v1220_v60 = vadd.f32 %v2157_v6, %v1134_v45  ;;  %v1282_v0 = vmax.f32 %v1218_v53, 0.0  ;;  %v1283_v1 = vmax.f32 %v1219_v54, 0.0  ;;  %v1150_v41 = vld [vmem:[#allocation2 + $0x100] sm:$0xff] }
 0x17f   : > { %v1773_v63 = vpack.c.bf16 %v1279_v52, %v1278_v51  ;;  %v1221_v2 = vadd.f32 %v2159_v7, %v1135_v50  ;;  %1528 = vst [vmem:[%s2343_s3 + $0x20] sm:$0xff] %v1772_v57  ;;  %v1222_v11 = vadd.f32 %v2161_v8, %v1136_v55  ;;  %v1223_v12 = vadd.f32 %v2163_v9, %v1137_v56  ;;  %v1151_v46 = vld [vmem:[#allocation2 + $0x108] sm:$0xff]  ;;  %v1152_v51 = vld [vmem:[#allocation2 + $0x110] sm:$0xff]  ;;  %v1153_v52 = vld [vmem:[#allocation2 + $0x118] sm:$0xff] }
 0x180   : > { %v1774_v5 = vpack.c.bf16 %v1281_v59, %v1280_v58  ;;  %v1284_v10 = vmax.f32 %v1220_v60, 0.0  ;;  %v1775_v14 = vpack.c.bf16 %v1283_v1, %v1282_v0  ;;  %v1226_v21 = vadd.f32 %v2161_v8, %v1140_v3  ;;  %v1154_v57 = vld [vmem:[#allocation2 + $0x120] sm:$0xff]  ;;  %v1155_v58 = vld [vmem:[#allocation2 + $0x128] sm:$0xff]  ;;  %v1157_v0 = vld [vmem:[#allocation2 + $0x138] sm:$0xff] }
 0x181   : > { %1529 = vst [vmem:[%s2343_s3 + $0x28] sm:$0xff] %v1773_v63  ;;  %v1285_v15 = vmax.f32 %v1221_v2, 0.0  ;;  %v1286_v19 = vmax.f32 %v1222_v11, 0.0  ;;  %v1287_v20 = vmax.f32 %v1223_v12, 0.0  ;;  %v1227_v22 = vadd.f32 %v2163_v9, %v1141_v4  ;;  %v1156_v63 = vld [vmem:[#allocation2 + $0x130] sm:$0xff] }
 0x182   : > { %1530 = vst [vmem:[%s2343_s3 + $0x30] sm:$0xff] %v1774_v5  ;;  %1531 = vst [vmem:[%s2343_s3 + $0x38] sm:$0xff] %v1775_v14  ;;  %v1289_v27 = vmax.f32 %v1225_v17, 0.0  ;;  %v1228_v28 = vadd.f32 %v2157_v6, %v1142_v13  ;;  %v1290_v32 = vmax.f32 %v1226_v21, 0.0  ;;  %v1229_v34 = vadd.f32 %v2159_v7, %v1143_v18  ;;  %v1158_v5 = vld [vmem:[#allocation2 + $0x140] sm:$0xff]  ;;  %v1159_v14 = vld [vmem:[#allocation2 + $0x148] sm:$0xff] }
 0x183   : > { %v1776_v25 = vpack.c.bf16 %v1285_v15, %v1284_v10  ;;  %v1777_v31 = vpack.c.bf16 %v1287_v20, %v1286_v19  ;;  %v1291_v33 = vmax.f32 %v1227_v22, 0.0  ;;  %v1230_v39 = vadd.f32 %v2161_v8, %v1144_v23  ;;  %v1160_v19 = vld [vmem:[#allocation2 + $0x150] sm:$0xff]  ;;  %v1161_v20 = vld [vmem:[#allocation2 + $0x158] sm:$0xff] }
 0x184   : > { %v1778_v37 = vpack.c.bf16 %v1289_v27, %v1288_v26  ;;  %v1292_v38 = vmax.f32 %v1228_v28, 0.0  ;;  %v1231_v40 = vadd.f32 %v2163_v9, %v1145_v24  ;;  %v1293_v43 = vmax.f32 %v1229_v34, 0.0  ;;  %v1163_v26 = vld [vmem:[#allocation2 + $0x168] sm:$0xff] }
 0x185   : > { %1532 = vst [vmem:[%s2343_s3 + $0x40] sm:$0xff] %v1776_v25  ;;  %1533 = vst [vmem:[%s2343_s3 + $0x48] sm:$0xff] %v1777_v31  ;;  %v1779_v42 = vpack.c.bf16 %v1291_v33, %v1290_v32  ;;  %v1232_v44 = vadd.f32 %v2157_v6, %v1146_v29  ;;  %v1233_v45 = vadd.f32 %v2159_v7, %v1147_v30  ;;  %v1294_v47 = vmax.f32 %v1230_v39, 0.0  ;;  %v1162_v25 = vld [vmem:[#allocation2 + $0x160] sm:$0xff]  ;;  %v1164_v31 = vld [vmem:[#allocation2 + $0x170] sm:$0xff] }
 0x186   : > { %1534 = vst [vmem:[%s2343_s3 + $0x50] sm:$0xff] %v1778_v37  ;;  %v1295_v48 = vmax.f32 %v1231_v40, 0.0  ;;  %v1234_v49 = vadd.f32 %v2161_v8, %v1148_v35  ;;  %v1235_v50 = vadd.f32 %v2163_v9, %v1149_v36  ;;  %v1780_v53 = vpack.c.bf16 %v1293_v43, %v1292_v38  ;;  %v1165_v32 = vld [vmem:[#allocation2 + $0x178] sm:$0xff]  ;;  %v1166_v37 = vld [vmem:[#allocation2 + $0x180] sm:$0xff] }
 0x187   : > { %1535 = vst [vmem:[%s2343_s3 + $0x58] sm:$0xff] %v1779_v42  ;;  %v1296_v54 = vmax.f32 %v1232_v44, 0.0  ;;  %v1297_v55 = vmax.f32 %v1233_v45, 0.0  ;;  %v1236_v56 = vadd.f32 %v2157_v6, %v1150_v41  ;;  %v1237_v62 = vadd.f32 %v2159_v7, %v1151_v46  ;;  %v1167_v42 = vld [vmem:[#allocation2 + $0x188] sm:$0xff] }
 0x188   : > { %v1781_v59 = vpack.c.bf16 %v1295_v48, %v1294_v47  ;;  %v1298_v60 = vmax.f32 %v1234_v49, 0.0  ;;  %v1299_v61 = vmax.f32 %v1235_v50, 0.0  ;;  %1536 = vst [vmem:[%s2343_s3 + $0x60] sm:$0xff] %v1780_v53  ;;  %v1238_v3 = vadd.f32 %v2161_v8, %v1152_v51  ;;  %v1168_v47 = vld [vmem:[#allocation2 + $0x190] sm:$0xff]  ;;  %v1169_v48 = vld [vmem:[#allocation2 + $0x198] sm:$0xff]  ;;  %v1170_v53 = vld [vmem:[#allocation2 + $0x1a0] sm:$0xff] }
 0x189   : > { %v1782_v1 = vpack.c.bf16 %v1297_v55, %v1296_v54  ;;  %v1300_v2 = vmax.f32 %v1236_v56, 0.0  ;;  %v1239_v4 = vadd.f32 %v2163_v9, %v1153_v52  ;;  %v1301_v11 = vmax.f32 %v1237_v62, 0.0  ;;  %v1171_v54 = vld [vmem:[#allocation2 + $0x1a8] sm:$0xff] }
 0x18a   : > { %1537 = vst [vmem:[%s2343_s3 + $0x68] sm:$0xff] %v1781_v59  ;;  %v1783_v10 = vpack.c.bf16 %v1299_v61, %v1298_v60  ;;  %v1240_v12 = vadd.f32 %v2157_v6, %v1154_v57  ;;  %v1241_v13 = vadd.f32 %v2159_v7, %v1155_v58  ;;  %v1302_v15 = vmax.f32 %v1238_v3, 0.0  ;;  %v1172_v59 = vld [vmem:[#allocation2 + $0x1b0] sm:$0xff]  ;;  %v1173_v60 = vld [vmem:[#allocation2 + $0x1b8] sm:$0xff] }
 0x18b   : > { %1538 = vst [vmem:[%s2343_s3 + $0x70] sm:$0xff] %v1782_v1  ;;  %v1303_v16 = vmax.f32 %v1239_v4, 0.0  ;;  %v1242_v17 = vadd.f32 %v2161_v8, %v1156_v63  ;;  %v1243_v18 = vadd.f32 %v2163_v9, %v1157_v0  ;;  %v1784_v21 = vpack.c.bf16 %v1301_v11, %v1300_v2  ;;  %v1174_v1 = vld [vmem:[#allocation2 + $0x1c0] sm:$0xff] }
 0x18c   : > { %1539 = vst [vmem:[%s2343_s3 + $0x78] sm:$0xff] %v1783_v10  ;;  %v1304_v22 = vmax.f32 %v1240_v12, 0.0  ;;  %v1305_v23 = vmax.f32 %v1241_v13, 0.0  ;;  %v1244_v24 = vadd.f32 %v2157_v6, %v1158_v5  ;;  %v1245_v30 = vadd.f32 %v2159_v7, %v1159_v14  ;;  %v1175_v10 = vld [vmem:[#allocation2 + $0x1c8] sm:$0xff] }
 0x18d   : > { %v1785_v27 = vpack.c.bf16 %v1303_v16, %v1302_v15  ;;  %v1306_v28 = vmax.f32 %v1242_v17, 0.0  ;;  %v1307_v29 = vmax.f32 %v1243_v18, 0.0  ;;  %1540 = vst [vmem:[%s2343_s3 + $0x80] sm:$0xff] %v1784_v21  ;;  %v1246_v35 = vadd.f32 %v2161_v8, %v1160_v19  ;;  %v1176_v15 = vld [vmem:[#allocation2 + $0x1d0] sm:$0xff]  ;;  %v1177_v16 = vld [vmem:[#allocation2 + $0x1d8] sm:$0xff]  ;;  %v1178_v21 = vld [vmem:[#allocation2 + $0x1e0] sm:$0xff] }
 0x18e   : > { %v1786_v33 = vpack.c.bf16 %v1305_v23, %v1304_v22  ;;  %v1308_v34 = vmax.f32 %v1244_v24, 0.0  ;;  %v1247_v36 = vadd.f32 %v2163_v9, %v1161_v20  ;;  %v1309_v39 = vmax.f32 %v1245_v30, 0.0  ;;  %v1179_v22 = vld [vmem:[#allocation2 + $0x1e8] sm:$0xff] }
 0x18f   : > { %1541 = vst [vmem:[%s2343_s3 + $0x88] sm:$0xff] %v1785_v27  ;;  %v1787_v38 = vpack.c.bf16 %v1307_v29, %v1306_v28  ;;  %v1248_v40 = vadd.f32 %v2157_v6, %v1162_v25  ;;  %v1249_v41 = vadd.f32 %v2159_v7, %v1163_v26  ;;  %v1310_v43 = vmax.f32 %v1246_v35, 0.0  ;;  %v1180_v27 = vld [vmem:[#allocation2 + $0x1f0] sm:$0xff]  ;;  %v1181_v28 = vld [vmem:[#allocation2 + $0x1f8] sm:$0xff] }
 0x190   : > { %1542 = vst [vmem:[%s2343_s3 + $0x90] sm:$0xff] %v1786_v33  ;;  %v1311_v44 = vmax.f32 %v1247_v36, 0.0  ;;  %v1250_v45 = vadd.f32 %v2161_v8, %v1164_v31  ;;  %v1251_v46 = vadd.f32 %v2163_v9, %v1165_v32  ;;  %v1788_v49 = vpack.c.bf16 %v1309_v39, %v1308_v34 }
 0x191   : > { %1543 = vst [vmem:[%s2343_s3 + $0x98] sm:$0xff] %v1787_v38  ;;  %v1312_v50 = vmax.f32 %v1248_v40, 0.0  ;;  %v1313_v51 = vmax.f32 %v1249_v41, 0.0  ;;  %v1252_v52 = vadd.f32 %v2157_v6, %v1166_v37  ;;  %v1253_v58 = vadd.f32 %v2159_v7, %v1167_v42 }
 0x192   : > { %v1789_v55 = vpack.c.bf16 %v1311_v44, %v1310_v43  ;;  %v1314_v56 = vmax.f32 %v1250_v45, 0.0  ;;  %v1315_v57 = vmax.f32 %v1251_v46, 0.0  ;;  %1544 = vst [vmem:[%s2343_s3 + $0xa0] sm:$0xff] %v1788_v49  ;;  %v1254_v63 = vadd.f32 %v2161_v8, %v1168_v47 }
 0x193   : > { %v1790_v61 = vpack.c.bf16 %v1313_v51, %v1312_v50  ;;  %v1316_v62 = vmax.f32 %v1252_v52, 0.0  ;;  %v1255_v0 = vadd.f32 %v2163_v9, %v1169_v48  ;;  %v1317_v3 = vmax.f32 %v1253_v58, 0.0 }
 0x194   : > { %1545 = vst [vmem:[%s2343_s3 + $0xa8] sm:$0xff] %v1789_v55  ;;  %v1791_v2 = vpack.c.bf16 %v1315_v57, %v1314_v56  ;;  %v1256_v4 = vadd.f32 %v2157_v6, %v1170_v53  ;;  %v1257_v5 = vadd.f32 %v2159_v7, %v1171_v54  ;;  %v1318_v11 = vmax.f32 %v1254_v63, 0.0 }
 0x195   : > { %1546 = vst [vmem:[%s2343_s3 + $0xb0] sm:$0xff] %v1790_v61  ;;  %v1319_v12 = vmax.f32 %v1255_v0, 0.0  ;;  %v1258_v13 = vadd.f32 %v2161_v8, %v1172_v59  ;;  %v1259_v14 = vadd.f32 %v2163_v9, %v1173_v60  ;;  %v1792_v17 = vpack.c.bf16 %v1317_v3, %v1316_v62 }
 0x196   : > { %1547 = vst [vmem:[%s2343_s3 + $0xb8] sm:$0xff] %v1791_v2  ;;  %v1320_v18 = vmax.f32 %v1256_v4, 0.0  ;;  %v1321_v19 = vmax.f32 %v1257_v5, 0.0  ;;  %v1260_v20 = vadd.f32 %v2157_v6, %v1174_v1  ;;  %v1261_v26 = vadd.f32 %v2159_v7, %v1175_v10 }
 0x197   : > { %v1793_v23 = vpack.c.bf16 %v1319_v12, %v1318_v11  ;;  %v1322_v24 = vmax.f32 %v1258_v13, 0.0  ;;  %v1323_v25 = vmax.f32 %v1259_v14, 0.0  ;;  %1548 = vst [vmem:[%s2343_s3 + $0xc0] sm:$0xff] %v1792_v17  ;;  %v1262_v31 = vadd.f32 %v2161_v8, %v1176_v15 }
 0x198   : > { %v1794_v29 = vpack.c.bf16 %v1321_v19, %v1320_v18  ;;  %v1324_v30 = vmax.f32 %v1260_v20, 0.0  ;;  %v1263_v32 = vadd.f32 %v2163_v9, %v1177_v16  ;;  %v1325_v34 = vmax.f32 %v1261_v26, 0.0 }
 0x199   : > { %1549 = vst [vmem:[%s2343_s3 + $0xc8] sm:$0xff] %v1793_v23  ;;  %v1795_v33 = vpack.c.bf16 %v1323_v25, %v1322_v24  ;;  %v1264_v35 = vadd.f32 %v2157_v6, %v1178_v21  ;;  %v1265_v36 = vadd.f32 %v2159_v7, %v1179_v22  ;;  %v1326_v37 = vmax.f32 %v1262_v31, 0.0 }
 0x19a   : > { %1550 = vst [vmem:[%s2343_s3 + $0xd0] sm:$0xff] %v1794_v29  ;;  %v1327_v38 = vmax.f32 %v1263_v32, 0.0  ;;  %v1266_v39 = vadd.f32 %v2161_v8, %v1180_v27  ;;  %v1267_v40 = vadd.f32 %v2163_v9, %v1181_v28  ;;  %v1796_v41 = vpack.c.bf16 %v1325_v34, %v1324_v30 }
 0x19b   : > { %1551 = vst [vmem:[%s2343_s3 + $0xd8] sm:$0xff] %v1795_v33  ;;  %v1328_v42 = vmax.f32 %v1264_v35, 0.0  ;;  %v1329_v43 = vmax.f32 %v1265_v36, 0.0 }
 0x19c   : > { %v1797_v6 = vpack.c.bf16 %v1327_v38, %v1326_v37  ;;  %v1330_v44 = vmax.f32 %v1266_v39, 0.0  ;;  %v1331_v7 = vmax.f32 %v1267_v40, 0.0  ;;  %1552 = vst [vmem:[%s2343_s3 + $0xe0] sm:$0xff] %v1796_v41 }
 0x19d   : > { %v1798_v45 = vpack.c.bf16 %v1329_v43, %v1328_v42 }
 0x19e   : > { %1553 = vst [vmem:[%s2343_s3 + $0xe8] sm:$0xff] %v1797_v6  ;;  %v1799_v8 = vpack.c.bf16 %v1331_v7, %v1330_v44 }
 0x19f   : > { %1554 = vst [vmem:[%s2343_s3 + $0xf0] sm:$0xff] %v1798_v45 }
 0x1a0   : > { %1555 = vst [vmem:[%s2343_s3 + $0xf8] sm:$0xff] %v1799_v8 }
 0x1a1 PF: > { %s13_s16 = sadd.s32 1, %s1936_s16   ;;  %s2344_s12 = smov %s1924_s13 }
 0x1a2   : > { %p10_p12 = scmp.ge.s32.totalorder %s13_s16, 5   ;;  %s2345_s13 = smov %s1995_s20 }
 0x1a3   : > { %s2346_s14 = smov %s1932_s15  ;;  %s2347_s15 = smov %s2349_s17 }
 0x1a4   :  { %12 = sbr.rel (!%p10_p12) target bundleno = 3 (0x3), region = 122 }

// kernel: pool_to_feature_vector.19
= control target key start
LH: loop header
LB: loop body
LE: loop exit
PB: predicated region body
PF: predicated region fallthrough
CT: control target
= control target key end

     0   :  { %6 = vsyncpa [#allocation4], 0  ;;  %s515_s6 = smov 0   ;;  %s517_s7 = smov 0   ;;  %s626_s0 = inlined_call_operand.vmem [shape: bf16[2,64,512], index: 0, kind: input, shape index: {}]   ;;  %s627_s1 = inlined_call_operand.hbm [shape: f32[2,512], index: 1, kind: output, shape index: {}]  }
   0x1   :  { %s519_s8 = smov 0  }
   0x2 LB: > { %s531_s9 = sadd.s32 4294967295, %s500_s8   ;;  %s534_s10 = sadd.s32 1, %s500_s8   ;;  %s500_s8 = sphi %s519_s8, %s630_s8   ;;  %s496_s7 = sphi %s517_s7, %s629_s7   ;;  %s492_s6 = sphi %s515_s6, %s628_s6  }
   0x3   : > { %s16_s11 = ssub.s32 %s500_s8, %s534_s10  ;;  %s19_s12 = sadd.s32 1, %s496_s7 }
   0x4   : > { %p17_p0 = scmp.eq.s32.totalorder %s16_s11, 0  ;;  %p26_p1 = scmp.ne.s32.totalorder %s496_s7, %s492_s6 }
   0x5   : > { %p27_p2 = scmp.eq.s32.totalorder %s500_s8, 0  ;;  %p400_p4 = scmp.ge.s32.totalorder %s500_s8, 2 }
   0x6   : > { %s543_s13 = scalar_select %p17_p0, %s496_s7, %s19_s12  }
   0x7   : > { %p28_p3 = por %p27_p2, %p26_p1  ;;  %73 = sbr.rel (%p400_p4) target bundleno = 26 (0x1a), region = 16 }
   0xe   : > { %76 = sbr.rel (!%p28_p3) target bundleno = 26 (0x1a), region = 20  ;;  %s78_s14 = sand.u32 (%p28_p3), 1, %s496_s7  }
   0xf   : > { %s414_s15 = sshll.u32 (%p28_p3), %s500_s8, 6  ;;  %s401_s16 = sshll.u32 (%p28_p3), %s78_s14, 7 }
  0x10   : > { %s551_s19 = scalar_lea.vmem (%p28_p3), %s626_s0, %s414_s15  ;;  %s80_s20 = scalar_lea.vmem (%p28_p3), [#allocation2], %s401_s16 }
  0x11   : > { %v97_v0 = vld [vmem:[%s551_s19] sm:$0xff] (%p28_p3)  ;;  %v99_v1 = vld [vmem:[%s551_s19 + $0x8] sm:$0xff] (%p28_p3)  ;;  %v101_v2 = vld [vmem:[%s551_s19 + $0x10] sm:$0xff] (%p28_p3) }
  0x12   : > { %98 = vst [vmem:[%s80_s20] sm:$0xff] (%p28_p3), %v97_v0  ;;  %100 = vst [vmem:[%s80_s20 + $0x8] sm:$0xff] (%p28_p3), %v99_v1  ;;  %v103_v3 = vld [vmem:[%s551_s19 + $0x18] sm:$0xff] (%p28_p3)  ;;  %v105_v4 = vld [vmem:[%s551_s19 + $0x20] sm:$0xff] (%p28_p3) }
  0x13   : > { %102 = vst [vmem:[%s80_s20 + $0x10] sm:$0xff] (%p28_p3), %v101_v2  ;;  %v107_v5 = vld [vmem:[%s551_s19 + $0x28] sm:$0xff] (%p28_p3)  ;;  %104 = vst [vmem:[%s80_s20 + $0x18] sm:$0xff] (%p28_p3), %v103_v3  ;;  %v109_v6 = vld [vmem:[%s551_s19 + $0x30] sm:$0xff] (%p28_p3) }
  0x14   : > { %106 = vst [vmem:[%s80_s20 + $0x20] sm:$0xff] (%p28_p3), %v105_v4  ;;  %108 = vst [vmem:[%s80_s20 + $0x28] sm:$0xff] (%p28_p3), %v107_v5  ;;  %v111_v7 = vld [vmem:[%s551_s19 + $0x38] sm:$0xff] (%p28_p3)  ;;  %v113_v8 = vld [vmem:[%s551_s19 + $0x80] sm:$0xff] (%p28_p3) }
  0x15   : > { %110 = vst [vmem:[%s80_s20 + $0x30] sm:$0xff] %v109_v6  ;;  %112 = vst [vmem:[%s80_s20 + $0x38] sm:$0xff] %v111_v7  ;;  %v115_v9 = vld [vmem:[%s551_s19 + $0x88] sm:$0xff]  ;;  %v117_v10 = vld [vmem:[%s551_s19 + $0x90] sm:$0xff] }
  0x16   : > { %114 = vst [vmem:[%s80_s20 + $0x40] sm:$0xff] %v113_v8  ;;  %v119_v11 = vld [vmem:[%s551_s19 + $0x98] sm:$0xff]  ;;  %116 = vst [vmem:[%s80_s20 + $0x48] sm:$0xff] %v115_v9  ;;  %v121_v12 = vld [vmem:[%s551_s19 + $0xa0] sm:$0xff] }
  0x17   : > { %118 = vst [vmem:[%s80_s20 + $0x50] sm:$0xff] %v117_v10  ;;  %120 = vst [vmem:[%s80_s20 + $0x58] sm:$0xff] %v119_v11  ;;  %v123_v13 = vld [vmem:[%s551_s19 + $0xa8] sm:$0xff]  ;;  %v125_v14 = vld [vmem:[%s551_s19 + $0xb0] sm:$0xff] }
  0x18   : > { %122 = vst [vmem:[%s80_s20 + $0x60] sm:$0xff] %v121_v12  ;;  %124 = vst [vmem:[%s80_s20 + $0x68] sm:$0xff] %v123_v13  ;;  %v127_v15 = vld [vmem:[%s551_s19 + $0xb8] sm:$0xff] }
  0x19   : > { %126 = vst [vmem:[%s80_s20 + $0x70] sm:$0xff] %v125_v14  ;;  %128 = vst [vmem:[%s80_s20 + $0x78] sm:$0xff] %v127_v15 }
  0x1a PF: > { %p405_p5 = scmp.ge.s32.totalorder %s500_s8, 1  ;;  %p133_p6 = scmp.lt.s32.totalorder %s500_s8, 3 }
  0x1c   : > { %p134_p7 = pnand %p405_p5, %p133_p6 }
  0x1d   : > { %s140_s21 = sand.u32 (!%p134_p7), 1, %s492_s6   ;;  %p407_p8 = scmp.ne.s32.totalorder (!%p134_p7), %s531_s9, 0 }
  0x1e   : > { %137 = sbr.rel (%p134_p7) target bundleno = 126 (0x7e), region = 43  ;;  %s406_s22 = sshll.u32 (!%p134_p7), %s140_s21, 7 }
  0x1f   : > { %s572_s23 = scalar_lea.vmem (!%p134_p7), [#allocation2], %s406_s22 }
  0x25   : > { %158 = sbr.rel (%p407_p8) target bundleno = 44 (0x2c), region = 51  ;;  %v502_v16 = vmov (!%p407_p8), 0.0  }
  0x26   : > { %159 = vst [vmem:[#allocation3] sm:$0xff] (!%p407_p8), %v502_v16 }
  0x2c PF: > { %v161_v17 = vld [vmem:[%s572_s23] sm:$0xff]  ;;  %v162_v18 = vld [vmem:[%s572_s23 + $0x8] sm:$0xff]  ;;  %v294_v19 = vlaneseq  ;;  %v163_v20 = vld [vmem:[%s572_s23 + $0x10] sm:$0xff]  ;;  %vm328_vm0 = vcmask 1041409   ;;  %vm330_vm1 = vcmask 1043459   ;;  %vm332_vm2 = vcmask 1045509  }
  0x2d   : > { %v164_v21 = vld [vmem:[%s572_s23 + $0x18] sm:$0xff]  ;;  %v165_v22 = vld [vmem:[%s572_s23 + $0x20] sm:$0xff]  ;;  %v177_v23 = vunpack.c.l.bf16 %v161_v17  ;;  %v178_v24 = vunpack.c.h.bf16 %v161_v17  ;;  %v179_v25 = vunpack.c.l.bf16 %v162_v18  ;;  %v180_v26 = vunpack.c.h.bf16 %v162_v18  ;;  %v166_v27 = vld [vmem:[%s572_s23 + $0x28] sm:$0xff]  ;;  %p408_p9 = scmp.ne.s32.totalorder %s531_s9, 1 }
  0x2e   : > { %v167_v28 = vld [vmem:[%s572_s23 + $0x30] sm:$0xff]  ;;  %v168_v29 = vld [vmem:[%s572_s23 + $0x38] sm:$0xff]  ;;  %v181_v30 = vunpack.c.l.bf16 %v163_v20  ;;  %v182_v31 = vunpack.c.h.bf16 %v163_v20  ;;  %v183_v32 = vunpack.c.l.bf16 %v164_v21  ;;  %v184_v33 = vunpack.c.h.bf16 %v164_v21  ;;  %v169_v34 = vld [vmem:[%s572_s23 + $0x40] sm:$0xff] }
  0x2f   : > { %v170_v35 = vld [vmem:[%s572_s23 + $0x48] sm:$0xff]  ;;  %v171_v36 = vld [vmem:[%s572_s23 + $0x50] sm:$0xff]  ;;  %v185_v37 = vunpack.c.l.bf16 %v165_v22  ;;  %v186_v38 = vunpack.c.h.bf16 %v165_v22  ;;  %v187_v39 = vunpack.c.l.bf16 %v166_v27  ;;  %v188_v40 = vunpack.c.h.bf16 %v166_v27  ;;  %v172_v41 = vld [vmem:[%s572_s23 + $0x58] sm:$0xff] }
  0x30   : > { %v173_v42 = vld [vmem:[%s572_s23 + $0x60] sm:$0xff]  ;;  %v174_v43 = vld [vmem:[%s572_s23 + $0x68] sm:$0xff]  ;;  %v189_v44 = vunpack.c.l.bf16 %v167_v28  ;;  %v190_v45 = vunpack.c.h.bf16 %v167_v28  ;;  %v191_v46 = vunpack.c.l.bf16 %v168_v29  ;;  %v192_v47 = vunpack.c.h.bf16 %v168_v29  ;;  %v175_v48 = vld [vmem:[%s572_s23 + $0x70] sm:$0xff] }
  0x31   : > { %v176_v49 = vld [vmem:[%s572_s23 + $0x78] sm:$0xff]  ;;  %v193_v50 = vunpack.c.l.bf16 %v169_v34  ;;  %v194_v51 = vunpack.c.h.bf16 %v169_v34  ;;  %v195_v52 = vunpack.c.l.bf16 %v170_v35  ;;  %v196_v53 = vunpack.c.h.bf16 %v170_v35 }
  0x32   : > { %v197_v54 = vunpack.c.l.bf16 %v171_v36  ;;  %v198_v55 = vunpack.c.h.bf16 %v171_v36  ;;  %v199_v56 = vunpack.c.l.bf16 %v172_v41  ;;  %v200_v57 = vunpack.c.h.bf16 %v172_v41 }
  0x33   : > { %v201_v58 = vunpack.c.l.bf16 %v173_v42  ;;  %v202_v59 = vunpack.c.h.bf16 %v173_v42  ;;  %v203_v60 = vunpack.c.l.bf16 %v174_v43  ;;  %v204_v61 = vunpack.c.h.bf16 %v174_v43 }
  0x34   : > { %v205_v62 = vunpack.c.l.bf16 %v175_v48  ;;  %v206_v63 = vunpack.c.h.bf16 %v175_v48  ;;  %v207_v0 = vunpack.c.l.bf16 %v176_v49  ;;  %v208_v1 = vunpack.c.h.bf16 %v176_v49 }
  0x35   : > { %v209_v2 = vadd.f32 %v181_v30, %v177_v23  ;;  %v218_v3 = vadd.f32 %v182_v31, %v178_v24  ;;  %v227_v4 = vadd.f32 %v183_v32, %v179_v25  ;;  %v236_v5 = vadd.f32 %v184_v33, %v180_v26 }
  0x36   : > { %v245_v6 = vadd.f32 %v197_v54, %v193_v50  ;;  %v254_v7 = vadd.f32 %v198_v55, %v194_v51  ;;  %v263_v8 = vadd.f32 %v199_v56, %v195_v52  ;;  %v272_v9 = vadd.f32 %v200_v57, %v196_v53 }
  0x37   : > { %v210_v10 = vadd.f32 %v209_v2, %v185_v37  ;;  %v219_v11 = vadd.f32 %v218_v3, %v186_v38  ;;  %v228_v12 = vadd.f32 %v227_v4, %v187_v39  ;;  %v237_v13 = vadd.f32 %v236_v5, %v188_v40 }
  0x38   : > { %v246_v14 = vadd.f32 %v245_v6, %v201_v58  ;;  %v255_v15 = vadd.f32 %v254_v7, %v202_v59  ;;  %v264_v16 = vadd.f32 %v263_v8, %v203_v60  ;;  %v273_v17 = vadd.f32 %v272_v9, %v204_v61 }
  0x39   : > { %v211_v18 = vadd.f32 %v210_v10, %v189_v44  ;;  %v220_v20 = vadd.f32 %v219_v11, %v190_v45  ;;  %v229_v21 = vadd.f32 %v228_v12, %v191_v46  ;;  %v238_v22 = vadd.f32 %v237_v13, %v192_v47 }
  0x3a   : > { %v247_v23 = vadd.f32 %v246_v14, %v205_v62  ;;  %v256_v24 = vadd.f32 %v255_v15, %v206_v63  ;;  %v265_v25 = vadd.f32 %v264_v16, %v207_v0  ;;  %v274_v26 = vadd.f32 %v273_v17, %v208_v1 }
  0x3b   : > { %v212_v27 = vrot.slane %v211_v18, 4  ;;  %v221_v28 = vrot.slane %v220_v20, 4  ;;  %v230_v29 = vrot.slane %v229_v21, 4  ;;  %v239_v30 = vrot.slane %v238_v22, 4 }
  0x3c   : > { %v248_v31 = vrot.slane %v247_v23, 4  ;;  %v257_v32 = vrot.slane %v256_v24, 4  ;;  %v266_v33 = vrot.slane %v265_v25, 4  ;;  %v275_v34 = vrot.slane %v274_v26, 4 }
  0x3d   : > { %v213_v35 = vadd.f32 %v212_v27, %v211_v18  ;;  %v222_v36 = vadd.f32 %v221_v28, %v220_v20  ;;  %v231_v37 = vadd.f32 %v230_v29, %v229_v21  ;;  %v240_v38 = vadd.f32 %v239_v30, %v238_v22  ;;  %v160_v29 = vld [vmem:[#allocation3] sm:$0xff] }
  0x3e   : > { %v249_v39 = vadd.f32 %v248_v31, %v247_v23  ;;  %v258_v40 = vadd.f32 %v257_v32, %v256_v24  ;;  %v267_v41 = vadd.f32 %v266_v33, %v265_v25  ;;  %v276_v42 = vadd.f32 %v275_v34, %v274_v26 }
  0x3f   : > { %v214_v43 = vrot.slane %v213_v35, 2  ;;  %v223_v44 = vrot.slane %v222_v36, 2  ;;  %v232_v45 = vrot.slane %v231_v37, 2  ;;  %v241_v46 = vrot.slane %v240_v38, 2 }
  0x40   : > { %v250_v47 = vrot.slane %v249_v39, 2  ;;  %v259_v48 = vrot.slane %v258_v40, 2  ;;  %v268_v49 = vrot.slane %v267_v41, 2  ;;  %v277_v50 = vrot.slane %v276_v42, 2 }
  0x41   : > { %v215_v51 = vadd.f32 %v214_v43, %v213_v35  ;;  %v224_v52 = vadd.f32 %v223_v44, %v222_v36  ;;  %v233_v53 = vadd.f32 %v232_v45, %v231_v37  ;;  %v242_v54 = vadd.f32 %v241_v46, %v240_v38 }
  0x42   : > { %v251_v55 = vadd.f32 %v250_v47, %v249_v39  ;;  %v260_v56 = vadd.f32 %v259_v48, %v258_v40  ;;  %v269_v57 = vadd.f32 %v268_v49, %v267_v41  ;;  %v278_v58 = vadd.f32 %v277_v50, %v276_v42 }
  0x43   : > { %v216_v59 = vrot.slane %v215_v51, 1  ;;  %v225_v60 = vrot.slane %v224_v52, 1  ;;  %v234_v61 = vrot.slane %v233_v53, 1  ;;  %v243_v62 = vrot.slane %v242_v54, 1 }
  0x44   : > { %v252_v63 = vrot.slane %v251_v55, 1  ;;  %v261_v0 = vrot.slane %v260_v56, 1  ;;  %v270_v1 = vrot.slane %v269_v57, 1  ;;  %v279_v2 = vrot.slane %v278_v58, 1 }
  0x45   : > { %v217_v3 = vadd.f32 %v216_v59, %v215_v51  ;;  %v226_v4 = vadd.f32 %v225_v60, %v224_v52  ;;  %v235_v5 = vadd.f32 %v234_v61, %v233_v53  ;;  %v244_v6 = vadd.f32 %v243_v62, %v242_v54 }
  0x46   : > { %v253_v7 = vadd.f32 %v252_v63, %v251_v55  ;;  %v262_v8 = vadd.f32 %v261_v0, %v260_v56  ;;  %v271_v9 = vadd.f32 %v270_v1, %v269_v57  ;;  %v280_v10 = vadd.f32 %v279_v2, %v278_v58 }
  0x47   : > { %v503_v11 = vmov 1983009808   ;;  %v295_v13 = vshrl.u32 %v294_v19, 7  ;;  %v289_v14 = vcombine.low %v217_v3, %v226_v4  ;;  %v290_v15 = vcombine.low %v235_v5, %v244_v6 }
  0x48   : > { %v292_v12 = vunpack.c.l.s4 %v503_v11  ;;  %v306_v17 = vcombine.low %v253_v7, %v262_v8  ;;  %v307_v18 = vcombine.low %v271_v9, %v280_v10  ;;  %vm334_vm3 = vcmask 1047559  }
  0x4a   : > { %v293_v16 = vunpack.c.0.s8 %v292_v12 }
  0x4c   : > { %v296_v20 = vsub.s32 %v293_v16, %v295_v13 }
  0x4e   : > { %v297_v21 = vrot.slane %v289_v14, %v296_v20  ;;  %v304_v22 = vrot.slane %v290_v15, %v296_v20  ;;  %v314_v23 = vrot.slane %v306_v17, %v296_v20  ;;  %v321_v24 = vrot.slane %v307_v18, %v296_v20 }
  0x50   : > { %v305_v25 = vcombine.low %v297_v21, %v304_v22  ;;  %v322_v26 = vcombine.low %v314_v23, %v321_v24 }
  0x52   : > { %v327_v27 = vrot.slane %v322_v26, 7 }
  0x54   : > { %v329_v28 = vsel %vm328_vm0, %v327_v27, %v305_v25  ;;  %342 = sbr.rel (%p408_p9) target bundleno = 101 (0x65), region = 55 }
  0x55   : > { %v331_v19 = vsel %vm330_vm1, %v327_v27, %v329_v28 }
  0x56   : > { %v333_v30 = vsel %vm332_vm2, %v327_v27, %v331_v19 }
  0x57   : > { %v335_v31 = vsel %vm334_vm3, %v327_v27, %v333_v30 }
  0x58   : > { %v337_v32 = vadd.f32 %v335_v31, %v160_v29 }
  0x5a   : > { %338 = vst [vmem:[#allocation3] sm:$0xff] %v337_v32 }
  0x61   : > { %v343_v33 = vld [vmem:[#allocation3] sm:$0xff] }
  0x62   : > { %v344_v34 = vmul.f32 0.015625, %v343_v33 }
  0x64   : > { %345 = vst [vmem:[#allocation3] sm:$0xff] %v344_v34 }
  0x65 PF: > { %p419_p10 = scmp.eq.s32.totalorder %s531_s9, 1  ;;  %s504_s24 = smov [#allocation3]  }
  0x66   : > { %s353_s25 = sshll.u32 %s504_s24, 4  ;;  %s354_s25 = int_to_ptr.vmem [resolvable:$true] %s353_s25 }
  0x67   : > { %s448_s26 = scalar_lea.vmem %s354_s25, 128  ;;  %p455_p0 = scmp.lt.s32.totalorder %s354_s25, %s354_s25 }
  0x68   : > { %p449_p11 = scmp.ne.s32.totalorder %s354_s25, %s448_s26  ;;  %p456_p1 = scmp.lt.s32.totalorder %s448_s26, %s448_s26 }
  0x6a   : > { %p450_p12 = pnand %p449_p11, %p419_p10  ;;  %p457_p2 = por %p456_p1, %p455_p0 }
  0x6c   : > { %p451_p13 = pneg %p450_p12 }
  0x6e   : > { %p458_p3 = pnand %p457_p2, %p451_p13 }
  0x70   : > { %461 = shalt.err (!%p458_p3)
}
  0x71   : > { %s462_s29 = scalar_lea.hbm %s627_s1, 128 }
  0x72   : > { %p463_p4 = scmp.ne.s32.totalorder %s627_s1, %s462_s29  ;;  %p468_p7 = scmp.lt.u32.totalorder %s462_s29, %s627_s1 }
  0x74   : > { %p464_p5 = pnand %p463_p4, %p419_p10 }
  0x76   : > { %p465_p6 = pneg %p464_p5 }
  0x78   : > { %p470_p8 = pnand %p468_p7, %p465_p6 }
  0x7a   : > { %473 = shalt.err (!%p470_p8)
}
  0x7b   : > { %416 = dma.vmem_to_hbm [thread:$0]  (%p419_p10), %s354_s25, 128, %s627_s1, [#allocation4]  }
  0x7c   : > { %487 = dma.done.wait (%p419_p10), [#allocation4], 128  }
  0x7d   : > { %489 = vsyncadd (%p419_p10), [#allocation4], 4294967168 }
  0x7e PF: > { %p9_p9 = scmp.ge.s32.totalorder %s534_s10, 4   ;;  %s628_s6 = smov %s496_s7 }
  0x7f   : > { %s629_s7 = smov %s543_s13  ;;  %s630_s8 = smov %s534_s10 }
  0x80   :  { %11 = sbr.rel (!%p9_p9) target bundleno = 2 (0x2), region = 87 }
  0x87   :  { %366 = vsyncpa [#allocation4], 1 }
  0x88   :  { %368 = vsyncpa [#allocation4 + $0x1], 1 }

// kernel: pool_to_feature_vector.15
= control target key start
LH: loop header
LB: loop body
LE: loop exit
PB: predicated region body
PF: predicated region fallthrough
CT: control target
= control target key end

     0   :  { %v1526_v1 = vmov 0   ;;  %v829_v41 = vlaneseq  ;;  %s2187_s1 = inlined_call_operand.vmem [shape: bf16[128,512], index: 1, kind: input, shape index: {}]   ;;  %s2188_s0 = inlined_call_operand.vmem [shape: bf16[128,128], index: 0, kind: input, shape index: {}]   ;;  %s2189_s2 = inlined_call_operand.vmem [shape: f32[1,512], index: 2, kind: input, shape index: {}]   ;;  %s2190_s3 = inlined_call_operand.vmem [shape: bf16[128,512], index: 3, kind: input, shape index: {}]   ;;  %s2191_s4 = inlined_call_operand.vmem [shape: bf16[128,512], index: 4, kind: output, shape index: {}]  }
   0x1   :  { %v1470_v0 = vld [vmem:[%s2187_s1 + $0x4] ss:$16 sps:$4 sm:$0xff]   ;;  %438 = vmatprep.mubr.bf16.mxu0 %v1526_v1  ;;  %551 = vmatprep.mubr.bf16.mxu1 %v1526_v1  ;;  %v1472_v2 = vld [vmem:[%s2187_s1 + $0xc] ss:$16 sps:$4 sm:$0xff]   ;;  %v1474_v3 = vld [vmem:[%s2187_s1] ss:$16 sps:$4 sm:$0xff]  }
   0x2   :  { %406 = vmatprep.subr.bf16.mxu0 %v1470_v0  ;;  %v1475_v4 = vld [vmem:[%s2187_s1 + $0x8] ss:$16 sps:$4 sm:$0xff]   ;;  %519 = vmatprep.subr.bf16.mxu1 %v1472_v2  ;;  %v1476_v5 = vld [vmem:[%s2187_s1 + $0x24] ss:$16 sps:$4 sm:$0xff]   ;;  %v1478_v6 = vld [vmem:[%s2187_s1 + $0x2c] ss:$16 sps:$4 sm:$0xff]  }
   0x3   :  { %407 = vmatpush1.bf16.msra.mxu0 %v1474_v3  ;;  %520 = vmatpush1.bf16.msra.mxu1 %v1475_v4  ;;  %v1480_v7 = vld [vmem:[%s2187_s1 + $0x20] ss:$16 sps:$4 sm:$0xff]   ;;  %v1481_v8 = vld [vmem:[%s2187_s1 + $0x28] ss:$16 sps:$4 sm:$0xff]   ;;  %v1482_v9 = vld [vmem:[%s2187_s1 + $0x44] ss:$16 sps:$4 sm:$0xff]  }
   0x4   :  { %408 = vmatprep.subr.bf16.mxu0 %v1476_v5  ;;  %521 = vmatprep.subr.bf16.mxu1 %v1478_v6  ;;  %v1484_v10 = vld [vmem:[%s2187_s1 + $0x4c] ss:$16 sps:$4 sm:$0xff]   ;;  %v1486_v11 = vld [vmem:[%s2187_s1 + $0x40] ss:$16 sps:$4 sm:$0xff]   ;;  %v1487_v12 = vld [vmem:[%s2187_s1 + $0x48] ss:$16 sps:$4 sm:$0xff]  }
   0x5   :  { %v1488_v13 = vld [vmem:[%s2187_s1 + $0x64] ss:$16 sps:$4 sm:$0xff]   ;;  %v1490_v14 = vld [vmem:[%s2187_s1 + $0x6c] ss:$16 sps:$4 sm:$0xff]   ;;  %v1492_v15 = vld [vmem:[%s2187_s1 + $0x60] ss:$16 sps:$4 sm:$0xff]  }
   0x6   :  { %v1493_v16 = vld [vmem:[%s2187_s1 + $0x68] ss:$16 sps:$4 sm:$0xff]   ;;  %v1494_v17 = vld [vmem:[%s2187_s1 + $0x84] ss:$16 sps:$4 sm:$0xff]   ;;  %v1496_v18 = vld [vmem:[%s2187_s1 + $0x8c] ss:$16 sps:$4 sm:$0xff]  }
   0x7   :  { %409 = vmatpush1.bf16.msra.mxu0 %v1480_v7  ;;  %522 = vmatpush1.bf16.msra.mxu1 %v1481_v8  ;;  %v1498_v19 = vld [vmem:[%s2187_s1 + $0x80] ss:$16 sps:$4 sm:$0xff]   ;;  %v1499_v20 = vld [vmem:[%s2187_s1 + $0x88] ss:$16 sps:$4 sm:$0xff]   ;;  %v1500_v21 = vld [vmem:[%s2187_s1 + $0xa4] ss:$16 sps:$4 sm:$0xff]  }
   0x8   :  { %410 = vmatprep.subr.bf16.mxu0 %v1482_v9  ;;  %523 = vmatprep.subr.bf16.mxu1 %v1484_v10  ;;  %v1502_v22 = vld [vmem:[%s2187_s1 + $0xac] ss:$16 sps:$4 sm:$0xff]   ;;  %v1504_v23 = vld [vmem:[%s2187_s1 + $0xa0] ss:$16 sps:$4 sm:$0xff]   ;;  %v1505_v24 = vld [vmem:[%s2187_s1 + $0xa8] ss:$16 sps:$4 sm:$0xff]  }
   0x9   :  { %v1506_v25 = vld [vmem:[%s2187_s1 + $0xc4] ss:$16 sps:$4 sm:$0xff]   ;;  %v1508_v26 = vld [vmem:[%s2187_s1 + $0xcc] ss:$16 sps:$4 sm:$0xff]   ;;  %v1510_v27 = vld [vmem:[%s2187_s1 + $0xc0] ss:$16 sps:$4 sm:$0xff]  }
   0xa   :  { %v1511_v28 = vld [vmem:[%s2187_s1 + $0xc8] ss:$16 sps:$4 sm:$0xff]   ;;  %v1512_v29 = vld [vmem:[%s2187_s1 + $0xe4] ss:$16 sps:$4 sm:$0xff]   ;;  %v1514_v30 = vld [vmem:[%s2187_s1 + $0xec] ss:$16 sps:$4 sm:$0xff]  }
   0xb   :  { %411 = vmatpush1.bf16.msra.mxu0 %v1486_v11  ;;  %524 = vmatpush1.bf16.msra.mxu1 %v1487_v12  ;;  %v1516_v31 = vld [vmem:[%s2187_s1 + $0xe0] ss:$16 sps:$4 sm:$0xff]   ;;  %v1517_v32 = vld [vmem:[%s2187_s1 + $0xe8] ss:$16 sps:$4 sm:$0xff]   ;;  %v830_v42 = vshrl.u32 %v829_v41, 7 }
   0xc   :  { %412 = vmatprep.subr.bf16.mxu0 %v1488_v13  ;;  %525 = vmatprep.subr.bf16.mxu1 %v1490_v14  ;;  %v1518_v33 = vld [vmem:[%s2188_s0] sm:$0xff]   ;;  %v1519_v34 = vld [vmem:[%s2188_s0 + $0x8] sm:$0xff]   ;;  %v1520_v35 = vld [vmem:[%s2188_s0 + $0x10] sm:$0xff]  }
   0xd   :  { %v1521_v36 = vld [vmem:[%s2188_s0 + $0x18] sm:$0xff]   ;;  %v1522_v37 = vld [vmem:[%s2188_s0 + $0x20] sm:$0xff]   ;;  %v1523_v38 = vld [vmem:[%s2188_s0 + $0x28] sm:$0xff]   ;;  %v831_v43 = vsub.s32 0, %v830_v42  ;;  %v839_v44 = vsub.s32 2, %v830_v42  ;;  %v835_v45 = vsub.s32 1, %v830_v42 }
   0xe   :  { %v1524_v39 = vld [vmem:[%s2188_s0 + $0x30] sm:$0xff]   ;;  %v1525_v40 = vld [vmem:[%s2188_s0 + $0x38] sm:$0xff]   ;;  %v843_v46 = vsub.s32 3, %v830_v42  ;;  %v827_v47 = vld [vmem:[%s2189_s2] sm:$0xf] }
   0xf   :  { %413 = vmatpush1.bf16.msra.mxu0 %v1492_v15  ;;  %526 = vmatpush1.bf16.msra.mxu1 %v1493_v16  ;;  %v1694_v48 = vld [vmem:[%s2190_s3] sm:$0xff]  ;;  %v1699_v49 = vld [vmem:[%s2190_s3 + $0x8] sm:$0xff]  ;;  %v1704_v50 = vld [vmem:[%s2190_s3 + $0x10] sm:$0xff]  ;;  %v1711_v52 = vrot.slane %v827_v47, %v831_v43  ;;  %v1713_v53 = vrot.slane %v827_v47, %v839_v44  ;;  %v1715_v54 = vrot.slane %v827_v47, %v835_v45 }
  0x10   :  { %414 = vmatprep.subr.bf16.mxu0 %v1494_v17  ;;  %527 = vmatprep.subr.bf16.mxu1 %v1496_v18  ;;  %v1709_v51 = vld [vmem:[%s2190_s3 + $0x18] sm:$0xff]  ;;  %v1717_v55 = vrot.slane %v827_v47, %v843_v46  ;;  %v1722_v56 = vld [vmem:[%s2190_s3 + $0x20] sm:$0xff]  ;;  %v1727_v57 = vld [vmem:[%s2190_s3 + $0x28] sm:$0xff]  ;;  %v945_v58 = vunpack.c.l.bf16 %v1694_v48  ;;  %v947_v59 = vunpack.c.l.bf16 %v1699_v49  ;;  %v946_v60 = vunpack.c.h.bf16 %v1694_v48 }
  0x11   :  { %v948_v61 = vunpack.c.h.bf16 %v1699_v49  ;;  %v1736_v62 = vld [vmem:[%s2190_s3 + $0x30] sm:$0xff]  ;;  %v1741_v63 = vld [vmem:[%s2190_s3 + $0x38] sm:$0xff]  ;;  %v949_v0 = vunpack.c.l.bf16 %v1704_v50  ;;  %v950_v2 = vunpack.c.h.bf16 %v1704_v50  ;;  %v952_v3 = vunpack.c.h.bf16 %v1709_v51  ;;  %v1750_v4 = vld [vmem:[%s2190_s3 + $0x40] sm:$0xff] }
  0x12   :  { %v1755_v5 = vld [vmem:[%s2190_s3 + $0x48] sm:$0xff]  ;;  %v953_v6 = vunpack.c.l.bf16 %v1722_v56  ;;  %v955_v7 = vunpack.c.l.bf16 %v1727_v57  ;;  %v954_v8 = vunpack.c.h.bf16 %v1722_v56  ;;  %v956_v9 = vunpack.c.h.bf16 %v1727_v57  ;;  %v1764_v10 = vld [vmem:[%s2190_s3 + $0x50] sm:$0xff]  ;;  %v1769_v11 = vld [vmem:[%s2190_s3 + $0x58] sm:$0xff] }
  0x13   :  { %415 = vmatpush1.bf16.msra.mxu0 %v1498_v19  ;;  %528 = vmatpush1.bf16.msra.mxu1 %v1499_v20  ;;  %v957_v12 = vunpack.c.l.bf16 %v1736_v62  ;;  %v959_v13 = vunpack.c.l.bf16 %v1741_v63  ;;  %v958_v14 = vunpack.c.h.bf16 %v1736_v62  ;;  %v960_v15 = vunpack.c.h.bf16 %v1741_v63  ;;  %v1778_v16 = vld [vmem:[%s2190_s3 + $0x60] sm:$0xff]  ;;  %v1783_v17 = vld [vmem:[%s2190_s3 + $0x68] sm:$0xff] }
  0x14   :  { %416 = vmatprep.subr.bf16.mxu0 %v1500_v21  ;;  %529 = vmatprep.subr.bf16.mxu1 %v1502_v22  ;;  %v961_v18 = vunpack.c.l.bf16 %v1750_v4  ;;  %v963_v19 = vunpack.c.l.bf16 %v1755_v5  ;;  %v962_v20 = vunpack.c.h.bf16 %v1750_v4  ;;  %v964_v21 = vunpack.c.h.bf16 %v1755_v5  ;;  %v1792_v22 = vld [vmem:[%s2190_s3 + $0x70] sm:$0xff] }
  0x17   :  { %417 = vmatpush1.bf16.msra.mxu0 %v1504_v23  ;;  %530 = vmatpush1.bf16.msra.mxu1 %v1505_v24  ;;  %v1797_v23 = vld [vmem:[%s2190_s3 + $0x78] sm:$0xff]  ;;  %v965_v24 = vunpack.c.l.bf16 %v1764_v10 }
  0x18   :  { %418 = vmatprep.subr.bf16.mxu0 %v1506_v25  ;;  %531 = vmatprep.subr.bf16.mxu1 %v1508_v26  ;;  %v967_v25 = vunpack.c.l.bf16 %v1769_v11  ;;  %v966_v26 = vunpack.c.h.bf16 %v1764_v10 }
  0x1b   :  { %419 = vmatpush1.bf16.msra.mxu0 %v1510_v27  ;;  %532 = vmatpush1.bf16.msra.mxu1 %v1511_v28  ;;  %v968_v27 = vunpack.c.h.bf16 %v1769_v11  ;;  %v1806_v28 = vld [vmem:[%s2190_s3 + $0x80] sm:$0xff] }
  0x1c   :  { %420 = vmatprep.subr.bf16.mxu0 %v1512_v29  ;;  %533 = vmatprep.subr.bf16.mxu1 %v1514_v30  ;;  %v1811_v29 = vld [vmem:[%s2190_s3 + $0x88] sm:$0xff]  ;;  %v969_v30 = vunpack.c.l.bf16 %v1778_v16 }
  0x1f   :  { %421 = vmatpush1.bf16.msra.mxu0 %v1516_v31  ;;  %534 = vmatpush1.bf16.msra.mxu1 %v1517_v32 }
  0x22   :  { %439 = vmatmul.mubr.bf16.vlgmr.msra.gmra.mrb[0].mxu0 %v1518_v33  ;;  %552 = vmatmul.mubr.bf16.vlgmr.msra.gmra.mrb[0].mxu1 %v1518_v33 }
  0x23   :  { %448 = vmatprep.mubr.bf16.mxu0 %v1526_v1  ;;  %561 = vmatprep.mubr.bf16.mxu1 %v1526_v1 }
  0x2a   :  { %449 = vmatmul.mubr.bf16.gmra.mrb[4].mxu0 %v1519_v34  ;;  %562 = vmatmul.mubr.bf16.gmra.mrb[4].mxu1 %v1519_v34 }
  0x2b   :  { %458 = vmatprep.mubr.bf16.mxu0 %v1526_v1  ;;  %571 = vmatprep.mubr.bf16.mxu1 %v1526_v1 }
  0x32   :  { %459 = vmatmul.mubr.bf16.gmra.mrb[8].mxu0 %v1520_v35  ;;  %572 = vmatmul.mubr.bf16.gmra.mrb[8].mxu1 %v1520_v35 }
  0x33   :  { %468 = vmatprep.mubr.bf16.mxu0 %v1526_v1  ;;  %581 = vmatprep.mubr.bf16.mxu1 %v1526_v1 }
  0x3a   :  { %469 = vmatmul.mubr.bf16.gmra.mrb[12].mxu0 %v1521_v36  ;;  %582 = vmatmul.mubr.bf16.gmra.mrb[12].mxu1 %v1521_v36 }
  0x3b   :  { %478 = vmatprep.mubr.bf16.mxu0 %v1526_v1  ;;  %591 = vmatprep.mubr.bf16.mxu1 %v1526_v1 }
  0x42   :  { %479 = vmatmul.mubr.bf16.gmra.mrb[16].mxu0 %v1522_v37  ;;  %592 = vmatmul.mubr.bf16.gmra.mrb[16].mxu1 %v1522_v37 }
  0x43   :  { %488 = vmatprep.mubr.bf16.mxu0 %v1526_v1  ;;  %601 = vmatprep.mubr.bf16.mxu1 %v1526_v1 }
  0x4a   :  { %489 = vmatmul.mubr.bf16.gmra.mrb[20].mxu0 %v1523_v38  ;;  %602 = vmatmul.mubr.bf16.gmra.mrb[20].mxu1 %v1523_v38  ;;  %v1836_v38 = vld [vmem:[%s2190_s3 + $0x90] sm:$0xff] }
  0x4b   :  { %498 = vmatprep.mubr.bf16.mxu0 %v1526_v1  ;;  %611 = vmatprep.mubr.bf16.mxu1 %v1526_v1 }
  0x52   :  { %499 = vmatmul.mubr.bf16.gmra.mrb[24].mxu0 %v1524_v39  ;;  %612 = vmatmul.mubr.bf16.gmra.mrb[24].mxu1 %v1524_v39 }
  0x53   :  { %508 = vmatprep.mubr.bf16.mxu0 %v1526_v1  ;;  %621 = vmatprep.mubr.bf16.mxu1 %v1526_v1  ;;  %v951_v1 = vunpack.c.l.bf16 %v1709_v51  ;;  %v982_v51 = vunpack.c.h.bf16 %v1836_v38 }
  0x5a   :  { %509 = vmatmul.mubr.bf16.gmra.mrb[28].mxu0 %v1525_v40  ;;  %622 = vmatmul.mubr.bf16.gmra.mrb[28].mxu1 %v1525_v40 }
  0xf5   :  { %v440_v34 = vpop.f32.mrb[0].mxu0  ;;  %v553_v35 = vpop.f32.mrb[0].mxu1 }
  0xf6   :  { %v849_v40 = vadd.f32 %v1711_v52, %v440_v34  ;;  %v851_v41 = vadd.f32 %v1713_v53, %v553_v35  ;;  %v442_v42 = vpop.f32.mrb[1].mxu0  ;;  %v555_v43 = vpop.f32.mrb[1].mxu1 }
  0xf7   :  { %v850_v46 = vadd.f32 %v1715_v54, %v442_v42  ;;  %v852_v47 = vadd.f32 %v1717_v55, %v555_v43  ;;  %v444_v48 = vpop.f32.mrb[2].mxu0  ;;  %v557_v49 = vpop.f32.mrb[2].mxu1 }
  0xf8   :  { %v1009_v37 = vadd.f32 %v945_v58, %v849_v40  ;;  %v1011_v34 = vadd.f32 %v947_v59, %v851_v41  ;;  %v853_v35 = vadd.f32 %v1711_v52, %v444_v48  ;;  %v855_v36 = vadd.f32 %v1713_v53, %v557_v49  ;;  %v446_v33 = vpop.f32.mrb[3].mxu0  ;;  %v559_v44 = vpop.f32.mrb[3].mxu1  ;;  %v1841_v58 = vld [vmem:[%s2190_s3 + $0x98] sm:$0xff] }
  0xf9   :  { %v1010_v32 = vadd.f32 %v946_v60, %v850_v46  ;;  %v1012_v45 = vadd.f32 %v948_v61, %v852_v47  ;;  %v854_v42 = vadd.f32 %v1715_v54, %v446_v33  ;;  %v856_v43 = vadd.f32 %v1717_v55, %v559_v44 }
  0xfa   :  { %v1073_v59 = vmax.f32 %v1009_v37, 0.0  ;;  %v1075_v40 = vmax.f32 %v1011_v34, 0.0  ;;  %v1013_v60 = vadd.f32 %v949_v0, %v853_v35  ;;  %v1015_v61 = vadd.f32 %v951_v1, %v855_v36 }
  0xfb   :  { %v1074_v33 = vmax.f32 %v1010_v32, 0.0  ;;  %v1076_v41 = vmax.f32 %v1012_v45, 0.0  ;;  %v1014_v44 = vadd.f32 %v950_v2, %v854_v42  ;;  %v1016_v46 = vadd.f32 %v952_v3, %v856_v43 }
  0xfc   :  { %v1077_v47 = vmax.f32 %v1013_v60, 0.0  ;;  %v1079_v48 = vmax.f32 %v1015_v61, 0.0  ;;  %v981_v49 = vunpack.c.l.bf16 %v1836_v38  ;;  %v983_v37 = vunpack.c.l.bf16 %v1841_v58 }
  0xfd   :  { %v1437_v34 = vpack.c.bf16 %v1074_v33, %v1073_v59  ;;  %v1438_v39 = vpack.c.bf16 %v1076_v41, %v1075_v40  ;;  %v1078_v0 = vmax.f32 %v1014_v44, 0.0  ;;  %v1080_v35 = vmax.f32 %v1016_v46, 0.0  ;;  %v450_v31 = vpop.f32.mrb[4].mxu0  ;;  %v563_v1 = vpop.f32.mrb[4].mxu1 }
  0xfe   :  { %v857_v32 = vadd.f32 %v1711_v52, %v450_v31  ;;  %v859_v50 = vadd.f32 %v1713_v53, %v563_v1  ;;  %v452_v2 = vpop.f32.mrb[5].mxu0  ;;  %v565_v36 = vpop.f32.mrb[5].mxu1  ;;  %v984_v3 = vunpack.c.h.bf16 %v1841_v58 }
  0xff   :  { %1329 = vst [vmem:[%s2191_s4] sm:$0xff] %v1437_v34  ;;  %1330 = vst [vmem:[%s2191_s4 + $0x8] sm:$0xff] %v1438_v39  ;;  %v1439_v45 = vpack.c.bf16 %v1078_v0, %v1077_v47  ;;  %v1440_v42 = vpack.c.bf16 %v1080_v35, %v1079_v48  ;;  %v858_v31 = vadd.f32 %v1715_v54, %v452_v2  ;;  %v454_v59 = vpop.f32.mrb[6].mxu0  ;;  %v567_v40 = vpop.f32.mrb[6].mxu1  ;;  %v1886_v48 = vld [vmem:[%s2190_s3 + $0xa0] sm:$0xff]  ;;  %v1891_v34 = vld [vmem:[%s2190_s3 + $0xa8] sm:$0xff] }
 0x100   :  { %v860_v43 = vadd.f32 %v1717_v55, %v565_v36  ;;  %v1017_v60 = vadd.f32 %v953_v6, %v857_v32  ;;  %v1019_v61 = vadd.f32 %v955_v7, %v859_v50  ;;  %v861_v33 = vadd.f32 %v1711_v52, %v454_v59  ;;  %v456_v44 = vpop.f32.mrb[7].mxu0  ;;  %v569_v39 = vpop.f32.mrb[7].mxu1 }
 0x101   :  { %v863_v41 = vadd.f32 %v1713_v53, %v567_v40  ;;  %1331 = vst [vmem:[%s2191_s4 + $0x10] sm:$0xff] %v1439_v45  ;;  %1332 = vst [vmem:[%s2191_s4 + $0x18] sm:$0xff] %v1440_v42  ;;  %v1018_v6 = vadd.f32 %v954_v8, %v858_v31  ;;  %v862_v46 = vadd.f32 %v1715_v54, %v456_v44  ;;  %v985_v36 = vunpack.c.l.bf16 %v1886_v48 }
 0x102   :  { %v1020_v7 = vadd.f32 %v956_v9, %v860_v43  ;;  %v864_v47 = vadd.f32 %v1717_v55, %v569_v39  ;;  %v1081_v0 = vmax.f32 %v1017_v60, 0.0  ;;  %v1083_v56 = vmax.f32 %v1019_v61, 0.0 }
 0x103   :  { %v1021_v57 = vadd.f32 %v957_v12, %v861_v33  ;;  %v1023_v8 = vadd.f32 %v959_v13, %v863_v41  ;;  %v1082_v9 = vmax.f32 %v1018_v6, 0.0  ;;  %v1022_v1 = vadd.f32 %v958_v14, %v862_v46 }
 0x104   :  { %v1084_v35 = vmax.f32 %v1020_v7, 0.0  ;;  %v1024_v32 = vadd.f32 %v960_v15, %v864_v47  ;;  %v987_v45 = vunpack.c.l.bf16 %v1891_v34  ;;  %v986_v63 = vunpack.c.h.bf16 %v1886_v48 }
 0x105   :  { %v1085_v50 = vmax.f32 %v1021_v57, 0.0  ;;  %v1087_v2 = vmax.f32 %v1023_v8, 0.0  ;;  %v1441_v42 = vpack.c.bf16 %v1082_v9, %v1081_v0  ;;  %v1086_v12 = vmax.f32 %v1022_v1, 0.0  ;;  %v460_v59 = vpop.f32.mrb[8].mxu0  ;;  %v573_v13 = vpop.f32.mrb[8].mxu1  ;;  %v1941_v1 = vld [vmem:[%s2190_s3 + $0xb8] sm:$0xff] }
 0x106   :  { %v1442_v31 = vpack.c.bf16 %v1084_v35, %v1083_v56  ;;  %v1088_v43 = vmax.f32 %v1024_v32, 0.0  ;;  %v865_v40 = vadd.f32 %v1711_v52, %v460_v59  ;;  %v867_v62 = vadd.f32 %v1713_v53, %v573_v13  ;;  %v462_v14 = vpop.f32.mrb[9].mxu0  ;;  %v575_v60 = vpop.f32.mrb[9].mxu1  ;;  %v1936_v35 = vld [vmem:[%s2190_s3 + $0xb0] sm:$0xff] }
 0x107   :  { %v988_v15 = vunpack.c.h.bf16 %v1891_v34  ;;  %1333 = vst [vmem:[%s2191_s4 + $0x20] sm:$0xff] %v1441_v42  ;;  %v1443_v61 = vpack.c.bf16 %v1086_v12, %v1085_v50  ;;  %v866_v41 = vadd.f32 %v1715_v54, %v462_v14  ;;  %v868_v44 = vadd.f32 %v1717_v55, %v575_v60  ;;  %v464_v39 = vpop.f32.mrb[10].mxu0  ;;  %v577_v6 = vpop.f32.mrb[10].mxu1 }
 0x108   :  { %1334 = vst [vmem:[%s2191_s4 + $0x28] sm:$0xff] %v1442_v31  ;;  %v1444_v33 = vpack.c.bf16 %v1088_v43, %v1087_v2  ;;  %v1025_v7 = vadd.f32 %v961_v18, %v865_v40  ;;  %v1027_v46 = vadd.f32 %v963_v19, %v867_v62  ;;  %v869_v47 = vadd.f32 %v1711_v52, %v464_v39  ;;  %v466_v56 = vpop.f32.mrb[11].mxu0  ;;  %v579_v57 = vpop.f32.mrb[11].mxu1 }
 0x109   :  { %v871_v0 = vadd.f32 %v1713_v53, %v577_v6  ;;  %1335 = vst [vmem:[%s2191_s4 + $0x30] sm:$0xff] %v1443_v61  ;;  %v1026_v18 = vadd.f32 %v962_v20, %v866_v41  ;;  %v1028_v19 = vadd.f32 %v964_v21, %v868_v44  ;;  %v870_v8 = vadd.f32 %v1715_v54, %v466_v56 }
 0x10a   :  { %1336 = vst [vmem:[%s2191_s4 + $0x38] sm:$0xff] %v1444_v33  ;;  %v872_v9 = vadd.f32 %v1717_v55, %v579_v57  ;;  %v1089_v32 = vmax.f32 %v1025_v7, 0.0  ;;  %v1091_v4 = vmax.f32 %v1027_v46, 0.0  ;;  %v1029_v5 = vadd.f32 %v965_v24, %v869_v47 }
 0x10b   :  { %v1031_v20 = vadd.f32 %v967_v25, %v871_v0  ;;  %v1090_v21 = vmax.f32 %v1026_v18, 0.0  ;;  %v1092_v50 = vmax.f32 %v1028_v19, 0.0  ;;  %v1030_v2 = vadd.f32 %v966_v26, %v870_v8 }
 0x10c   :  { %v1032_v42 = vadd.f32 %v968_v27, %v872_v9  ;;  %v1093_v31 = vmax.f32 %v1029_v5, 0.0  ;;  %v989_v43 = vunpack.c.l.bf16 %v1936_v35  ;;  %v991_v59 = vunpack.c.l.bf16 %v1941_v1 }
 0x10d   :  { %v1095_v12 = vmax.f32 %v1031_v20, 0.0  ;;  %v1445_v13 = vpack.c.bf16 %v1090_v21, %v1089_v32  ;;  %v1446_v40 = vpack.c.bf16 %v1092_v50, %v1091_v4  ;;  %v1094_v24 = vmax.f32 %v1030_v2, 0.0  ;;  %v470_v14 = vpop.f32.mrb[12].mxu0  ;;  %v583_v25 = vpop.f32.mrb[12].mxu1  ;;  %v1986_v20 = vld [vmem:[%s2190_s3 + $0xc0] sm:$0xff]  ;;  %v1991_v21 = vld [vmem:[%s2190_s3 + $0xc8] sm:$0xff] }
 0x10e   :  { %v1096_v62 = vmax.f32 %v1032_v42, 0.0  ;;  %v873_v60 = vadd.f32 %v1711_v52, %v470_v14  ;;  %v875_v10 = vadd.f32 %v1713_v53, %v583_v25  ;;  %v472_v26 = vpop.f32.mrb[13].mxu0  ;;  %v585_v61 = vpop.f32.mrb[13].mxu1  ;;  %v990_v11 = vunpack.c.h.bf16 %v1936_v35 }
 0x10f   :  { %v992_v27 = vunpack.c.h.bf16 %v1941_v1  ;;  %1337 = vst [vmem:[%s2191_s4 + $0x40] sm:$0xff] %v1445_v13  ;;  %1338 = vst [vmem:[%s2191_s4 + $0x48] sm:$0xff] %v1446_v40  ;;  %v1447_v33 = vpack.c.bf16 %v1094_v24, %v1093_v31  ;;  %v874_v44 = vadd.f32 %v1715_v54, %v472_v26  ;;  %v876_v39 = vadd.f32 %v1717_v55, %v585_v61  ;;  %v474_v6 = vpop.f32.mrb[14].mxu0  ;;  %v587_v7 = vpop.f32.mrb[14].mxu1 }
 0x110   :  { %v1448_v41 = vpack.c.bf16 %v1096_v62, %v1095_v12  ;;  %v1033_v46 = vadd.f32 %v969_v30, %v873_v60  ;;  %v2192_v47 = vunpack.c.l.bf16 %v1783_v17  ;;  %v877_v56 = vadd.f32 %v1711_v52, %v474_v6  ;;  %v476_v18 = vpop.f32.mrb[15].mxu0  ;;  %v589_v19 = vpop.f32.mrb[15].mxu1 }
 0x111   :  { %v879_v57 = vadd.f32 %v1713_v53, %v587_v7  ;;  %1339 = vst [vmem:[%s2191_s4 + $0x50] sm:$0xff] %v1447_v33  ;;  %v2193_v8 = vunpack.c.h.bf16 %v1778_v16  ;;  %v2194_v9 = vunpack.c.h.bf16 %v1783_v17  ;;  %v878_v4 = vadd.f32 %v1715_v54, %v476_v18 }
 0x112   :  { %v1035_v0 = vadd.f32 %v2192_v47, %v875_v10  ;;  %1340 = vst [vmem:[%s2191_s4 + $0x58] sm:$0xff] %v1448_v41  ;;  %v880_v5 = vadd.f32 %v1717_v55, %v589_v19  ;;  %v1097_v50 = vmax.f32 %v1033_v46, 0.0  ;;  %v2195_v2 = vunpack.c.l.bf16 %v1792_v22 }
 0x113   :  { %v1034_v30 = vadd.f32 %v2193_v8, %v874_v44  ;;  %v1036_v32 = vadd.f32 %v2194_v9, %v876_v39  ;;  %v2196_v42 = vunpack.c.l.bf16 %v1797_v23  ;;  %v2197_v40 = vunpack.c.h.bf16 %v1792_v22 }
 0x114   :  { %v1099_v16 = vmax.f32 %v1035_v0, 0.0  ;;  %v1037_v17 = vadd.f32 %v2195_v2, %v877_v56  ;;  %v2198_v62 = vunpack.c.h.bf16 %v1797_v23  ;;  %v993_v10 = vunpack.c.l.bf16 %v1986_v20 }
 0x115   :  { %v1039_v31 = vadd.f32 %v2196_v42, %v879_v57  ;;  %v1098_v12 = vmax.f32 %v1034_v30, 0.0  ;;  %v1100_v13 = vmax.f32 %v1036_v32, 0.0  ;;  %v1038_v24 = vadd.f32 %v2197_v40, %v878_v4  ;;  %v480_v39 = vpop.f32.mrb[16].mxu0  ;;  %v593_v6 = vpop.f32.mrb[16].mxu1 }
 0x116   :  { %v1040_v14 = vadd.f32 %v2198_v62, %v880_v5  ;;  %v1101_v25 = vmax.f32 %v1037_v17, 0.0  ;;  %v995_v26 = vunpack.c.l.bf16 %v1991_v21  ;;  %v881_v7 = vadd.f32 %v1711_v52, %v480_v39  ;;  %v482_v46 = vpop.f32.mrb[17].mxu0  ;;  %v595_v47 = vpop.f32.mrb[17].mxu1  ;;  %v2036_v62 = vld [vmem:[%s2190_s3 + $0xd0] sm:$0xff] }
 0x117   :  { %v1103_v60 = vmax.f32 %v1039_v31, 0.0  ;;  %v1449_v61 = vpack.c.bf16 %v1098_v12, %v1097_v50  ;;  %v1450_v33 = vpack.c.bf16 %v1100_v13, %v1099_v16  ;;  %v1102_v41 = vmax.f32 %v1038_v24, 0.0  ;;  %v484_v8 = vpop.f32.mrb[18].mxu0  ;;  %v597_v30 = vpop.f32.mrb[18].mxu1 }
 0x118   :  { %v1104_v44 = vmax.f32 %v1040_v14, 0.0  ;;  %v883_v22 = vadd.f32 %v1713_v53, %v593_v6  ;;  %v994_v23 = vunpack.c.h.bf16 %v1986_v20  ;;  %v996_v0 = vunpack.c.h.bf16 %v1991_v21  ;;  %v486_v2 = vpop.f32.mrb[19].mxu0  ;;  %v599_v17 = vpop.f32.mrb[19].mxu1  ;;  %v2041_v14 = vld [vmem:[%s2190_s3 + $0xd8] sm:$0xff] }
 0x119   :  { %1341 = vst [vmem:[%s2191_s4 + $0x60] sm:$0xff] %v1449_v61  ;;  %1342 = vst [vmem:[%s2191_s4 + $0x68] sm:$0xff] %v1450_v33  ;;  %v1451_v56 = vpack.c.bf16 %v1102_v41, %v1101_v25  ;;  %v882_v18 = vadd.f32 %v1715_v54, %v482_v46  ;;  %v884_v19 = vadd.f32 %v1717_v55, %v595_v47  ;;  %v2199_v9 = vunpack.c.l.bf16 %v1806_v28 }
 0x11a   :  { %v1452_v57 = vpack.c.bf16 %v1104_v44, %v1103_v60  ;;  %v2200_v4 = vunpack.c.l.bf16 %v1811_v29  ;;  %v885_v50 = vadd.f32 %v1711_v52, %v484_v8  ;;  %v887_v16 = vadd.f32 %v1713_v53, %v597_v30 }
 0x11b   :  { %v1041_v32 = vadd.f32 %v2199_v9, %v881_v7  ;;  %1343 = vst [vmem:[%s2191_s4 + $0x70] sm:$0xff] %v1451_v56  ;;  %v2201_v42 = vunpack.c.h.bf16 %v1806_v28  ;;  %v2202_v12 = vunpack.c.h.bf16 %v1811_v29  ;;  %v886_v40 = vadd.f32 %v1715_v54, %v486_v2 }
 0x11c   :  { %v1043_v5 = vadd.f32 %v2200_v4, %v883_v22  ;;  %1344 = vst [vmem:[%s2191_s4 + $0x78] sm:$0xff] %v1452_v57  ;;  %v888_v24 = vadd.f32 %v1717_v55, %v599_v17  ;;  %v1045_v29 = vadd.f32 %v981_v49, %v885_v50  ;;  %v1047_v60 = vadd.f32 %v983_v37, %v887_v16 }
 0x11d   :  { %v1042_v31 = vadd.f32 %v2201_v42, %v882_v18  ;;  %v1044_v13 = vadd.f32 %v2202_v12, %v884_v19  ;;  %v1105_v25 = vmax.f32 %v1041_v32, 0.0  ;;  %v1046_v41 = vadd.f32 %v982_v51, %v886_v40  ;;  %v490_v57 = vpop.f32.mrb[20].mxu0  ;;  %v603_v37 = vpop.f32.mrb[20].mxu1  ;;  %v2086_v40 = vld [vmem:[%s2190_s3 + $0xe0] sm:$0xff] }
 0x11e   :  { %v1107_v28 = vmax.f32 %v1043_v5, 0.0  ;;  %v1048_v44 = vadd.f32 %v984_v3, %v888_v24  ;;  %v1109_v39 = vmax.f32 %v1045_v29, 0.0  ;;  %v1111_v6 = vmax.f32 %v1047_v60, 0.0  ;;  %v492_v51 = vpop.f32.mrb[21].mxu0  ;;  %v605_v19 = vpop.f32.mrb[21].mxu1  ;;  %v2091_v24 = vld [vmem:[%s2190_s3 + $0xe8] sm:$0xff] }
 0x11f   :  { %v1106_v61 = vmax.f32 %v1042_v31, 0.0  ;;  %v1108_v33 = vmax.f32 %v1044_v13, 0.0  ;;  %v997_v7 = vunpack.c.l.bf16 %v2036_v62  ;;  %v999_v22 = vunpack.c.l.bf16 %v2041_v14  ;;  %v494_v4 = vpop.f32.mrb[22].mxu0  ;;  %v607_v5 = vpop.f32.mrb[22].mxu1 }
 0x120   :  { %v1110_v49 = vmax.f32 %v1046_v41, 0.0  ;;  %v1112_v56 = vmax.f32 %v1048_v44, 0.0  ;;  %v889_v18 = vadd.f32 %v1711_v52, %v490_v57  ;;  %v891_v38 = vadd.f32 %v1713_v53, %v603_v37  ;;  %v496_v42 = vpop.f32.mrb[23].mxu0  ;;  %v609_v31 = vpop.f32.mrb[23].mxu1 }
 0x121   :  { %v1453_v46 = vpack.c.bf16 %v1106_v61, %v1105_v25  ;;  %v1454_v47 = vpack.c.bf16 %v1108_v33, %v1107_v28  ;;  %v998_v58 = vunpack.c.h.bf16 %v2036_v62  ;;  %v1000_v3 = vunpack.c.h.bf16 %v2041_v14 }
 0x122   :  { %v1455_v8 = vpack.c.bf16 %v1110_v49, %v1109_v39  ;;  %v1456_v30 = vpack.c.bf16 %v1112_v56, %v1111_v6  ;;  %v890_v9 = vadd.f32 %v1715_v54, %v492_v51  ;;  %v892_v32 = vadd.f32 %v1717_v55, %v605_v19 }
 0x123   :  { %1345 = vst [vmem:[%s2191_s4 + $0x80] sm:$0xff] %v1453_v46  ;;  %1346 = vst [vmem:[%s2191_s4 + $0x88] sm:$0xff] %v1454_v47  ;;  %v1049_v50 = vadd.f32 %v985_v36, %v889_v18  ;;  %v1051_v16 = vadd.f32 %v987_v45, %v891_v38  ;;  %v893_v2 = vadd.f32 %v1711_v52, %v494_v4  ;;  %v1001_v41 = vunpack.c.l.bf16 %v2086_v40 }
 0x124   :  { %v895_v17 = vadd.f32 %v1713_v53, %v607_v5  ;;  %1347 = vst [vmem:[%s2191_s4 + $0x90] sm:$0xff] %v1455_v8  ;;  %1348 = vst [vmem:[%s2191_s4 + $0x98] sm:$0xff] %v1456_v30  ;;  %v1050_v36 = vadd.f32 %v986_v63, %v890_v9  ;;  %v1052_v45 = vadd.f32 %v988_v15, %v892_v32  ;;  %v1003_v44 = vunpack.c.l.bf16 %v2091_v24 }
 0x125   :  { %v894_v12 = vadd.f32 %v1715_v54, %v496_v42  ;;  %v896_v13 = vadd.f32 %v1717_v55, %v609_v31  ;;  %v1113_v25 = vmax.f32 %v1049_v50, 0.0  ;;  %v1115_v48 = vmax.f32 %v1051_v16, 0.0  ;;  %v500_v47 = vpop.f32.mrb[24].mxu0 }
 0x126   :  { %v1053_v34 = vadd.f32 %v989_v43, %v893_v2  ;;  %v1055_v63 = vadd.f32 %v991_v59, %v895_v17  ;;  %v1114_v15 = vmax.f32 %v1050_v36, 0.0  ;;  %v1116_v28 = vmax.f32 %v1052_v45, 0.0  ;;  %v613_v59 = vpop.f32.mrb[24].mxu1  ;;  %v943_v2 = vld [vmem:[%s2190_s3 + $0xf0] sm:$0xff]  ;;  %v944_v17 = vld [vmem:[%s2190_s3 + $0xf8] sm:$0xff] }
 0x127   :  { %v1054_v29 = vadd.f32 %v990_v11, %v894_v12  ;;  %v1056_v60 = vadd.f32 %v992_v27, %v896_v13  ;;  %v897_v49 = vadd.f32 %v1711_v52, %v500_v47  ;;  %v899_v35 = vadd.f32 %v1713_v53, %v613_v59  ;;  %v502_v11 = vpop.f32.mrb[25].mxu0  ;;  %v615_v56 = vpop.f32.mrb[25].mxu1 }
 0x128   :  { %v1117_v61 = vmax.f32 %v1053_v34, 0.0  ;;  %v1119_v33 = vmax.f32 %v1055_v63, 0.0  ;;  %v1457_v39 = vpack.c.bf16 %v1114_v15, %v1113_v25  ;;  %v1458_v6 = vpack.c.bf16 %v1116_v28, %v1115_v48  ;;  %v504_v51 = vpop.f32.mrb[26].mxu0  ;;  %v617_v19 = vpop.f32.mrb[26].mxu1 }
 0x129   :  { %v1118_v43 = vmax.f32 %v1054_v29, 0.0  ;;  %v1120_v46 = vmax.f32 %v1056_v60, 0.0  ;;  %v1002_v1 = vunpack.c.h.bf16 %v2086_v40  ;;  %v1004_v27 = vunpack.c.h.bf16 %v2091_v24  ;;  %v506_v4 = vpop.f32.mrb[27].mxu0  ;;  %v619_v5 = vpop.f32.mrb[27].mxu1 }
 0x12a   :  { %1349 = vst [vmem:[%s2191_s4 + $0xa0] sm:$0xff] %v1457_v39  ;;  %1350 = vst [vmem:[%s2191_s4 + $0xa8] sm:$0xff] %v1458_v6  ;;  %v898_v18 = vadd.f32 %v1715_v54, %v502_v11  ;;  %v900_v38 = vadd.f32 %v1717_v55, %v615_v56  ;;  %v1057_v8 = vadd.f32 %v993_v10, %v897_v49  ;;  %v1005_v25 = vunpack.c.l.bf16 %v943_v2 }
 0x12b   :  { %v1459_v57 = vpack.c.bf16 %v1118_v43, %v1117_v61  ;;  %v1460_v37 = vpack.c.bf16 %v1120_v46, %v1119_v33  ;;  %v1059_v30 = vadd.f32 %v995_v26, %v899_v35  ;;  %v901_v9 = vadd.f32 %v1711_v52, %v504_v51 }
 0x12c   :  { %v903_v32 = vadd.f32 %v1713_v53, %v617_v19  ;;  %v1058_v10 = vadd.f32 %v994_v23, %v898_v18  ;;  %v1060_v26 = vadd.f32 %v996_v0, %v900_v38  ;;  %v902_v50 = vadd.f32 %v1715_v54, %v506_v4 }
 0x12d   :  { %1351 = vst [vmem:[%s2191_s4 + $0xb0] sm:$0xff] %v1459_v57  ;;  %1352 = vst [vmem:[%s2191_s4 + $0xb8] sm:$0xff] %v1460_v37  ;;  %v904_v16 = vadd.f32 %v1717_v55, %v619_v5  ;;  %v1121_v42 = vmax.f32 %v1057_v8, 0.0  ;;  %v1123_v31 = vmax.f32 %v1059_v30, 0.0  ;;  %v1061_v20 = vadd.f32 %v997_v7, %v901_v9  ;;  %v510_v7 = vpop.f32.mrb[28].mxu0  ;;  %v623_v29 = vpop.f32.mrb[28].mxu1 }
 0x12e   :  { %v1063_v21 = vadd.f32 %v999_v22, %v903_v32  ;;  %v1122_v23 = vmax.f32 %v1058_v10, 0.0  ;;  %v1124_v0 = vmax.f32 %v1060_v26, 0.0  ;;  %v1062_v36 = vadd.f32 %v998_v58, %v902_v50  ;;  %v512_v61 = vpop.f32.mrb[29].mxu0  ;;  %v625_v62 = vpop.f32.mrb[29].mxu1 }
 0x12f   :  { %v1064_v45 = vadd.f32 %v1000_v3, %v904_v16  ;;  %v1125_v12 = vmax.f32 %v1061_v20, 0.0  ;;  %v1007_v48 = vunpack.c.l.bf16 %v944_v17  ;;  %v905_v22 = vadd.f32 %v1711_v52, %v510_v7  ;;  %v514_v43 = vpop.f32.mrb[30].mxu0  ;;  %v627_v46 = vpop.f32.mrb[30].mxu1 }
 0x130   :  { %v1127_v13 = vmax.f32 %v1063_v21, 0.0  ;;  %v1461_v34 = vpack.c.bf16 %v1122_v23, %v1121_v42  ;;  %v1462_v63 = vpack.c.bf16 %v1124_v0, %v1123_v31  ;;  %v1126_v15 = vmax.f32 %v1062_v36, 0.0  ;;  %v516_v11 = vpop.f32.mrb[31].mxu0  ;;  %v629_v56 = vpop.f32.mrb[31].mxu1 }
 0x131   :  { %v1128_v28 = vmax.f32 %v1064_v45, 0.0  ;;  %v907_v60 = vadd.f32 %v1713_v53, %v623_v29  ;;  %v1006_v58 = vunpack.c.h.bf16 %v943_v2  ;;  %v1008_v33 = vunpack.c.h.bf16 %v944_v17 }
 0x132   :  { %1353 = vst [vmem:[%s2191_s4 + $0xc0] sm:$0xff] %v1461_v34  ;;  %1354 = vst [vmem:[%s2191_s4 + $0xc8] sm:$0xff] %v1462_v63  ;;  %v1463_v14 = vpack.c.bf16 %v1126_v15, %v1125_v12  ;;  %v906_v39 = vadd.f32 %v1715_v54, %v512_v61  ;;  %v908_v6 = vadd.f32 %v1717_v55, %v625_v62 }
 0x133   :  { %v1464_v3 = vpack.c.bf16 %v1128_v28, %v1127_v13  ;;  %v1065_v47 = vadd.f32 %v1001_v41, %v905_v22  ;;  %v1067_v59 = vadd.f32 %v1003_v44, %v907_v60  ;;  %v909_v49 = vadd.f32 %v1711_v52, %v514_v43 }
 0x134   :  { %v911_v35 = vadd.f32 %v1713_v53, %v627_v46  ;;  %1355 = vst [vmem:[%s2191_s4 + $0xd0] sm:$0xff] %v1463_v14  ;;  %v1066_v41 = vadd.f32 %v1002_v1, %v906_v39  ;;  %v1068_v44 = vadd.f32 %v1004_v27, %v908_v6  ;;  %v910_v52 = vadd.f32 %v1715_v54, %v516_v11 }
 0x135   :  { %1356 = vst [vmem:[%s2191_s4 + $0xd8] sm:$0xff] %v1464_v3  ;;  %v912_v53 = vadd.f32 %v1717_v55, %v629_v56  ;;  %v1129_v57 = vmax.f32 %v1065_v47, 0.0  ;;  %v1131_v37 = vmax.f32 %v1067_v59, 0.0  ;;  %v1069_v18 = vadd.f32 %v1005_v25, %v909_v49 }
 0x136   :  { %v1071_v38 = vadd.f32 %v1007_v48, %v911_v35  ;;  %v1130_v51 = vmax.f32 %v1066_v41, 0.0  ;;  %v1132_v19 = vmax.f32 %v1068_v44, 0.0  ;;  %v1070_v8 = vadd.f32 %v1006_v58, %v910_v52 }
 0x137   :  { %v1072_v30 = vadd.f32 %v1008_v33, %v912_v53  ;;  %v1133_v9 = vmax.f32 %v1069_v18, 0.0 }
 0x138   :  { %v1135_v32 = vmax.f32 %v1071_v38, 0.0  ;;  %v1465_v4 = vpack.c.bf16 %v1130_v51, %v1129_v57  ;;  %v1466_v40 = vpack.c.bf16 %v1132_v19, %v1131_v37  ;;  %v1134_v1 = vmax.f32 %v1070_v8, 0.0 }
 0x139   :  { %v1136_v5 = vmax.f32 %v1072_v30, 0.0 }
 0x13a   :  { %1357 = vst [vmem:[%s2191_s4 + $0xe0] sm:$0xff] %v1465_v4  ;;  %1358 = vst [vmem:[%s2191_s4 + $0xe8] sm:$0xff] %v1466_v40  ;;  %v1467_v54 = vpack.c.bf16 %v1134_v1, %v1133_v9 }
 0x13b   :  { %v1468_v55 = vpack.c.bf16 %v1136_v5, %v1135_v32 }
 0x13c   :  { %1359 = vst [vmem:[%s2191_s4 + $0xf0] sm:$0xff] %v1467_v54 }
 0x13d   :  { %1360 = vst [vmem:[%s2191_s4 + $0xf8] sm:$0xff] %v1468_v55 }

</bundles_post_ra>
